<compile_context>
chip_gen: v6e
topology: v6e:2x2x1
jax: 0.10.0
libtpu: 0.0.40
codegen_flags: <defaults>
</compile_context>

<pallas_src>
import functools
import math

import jax
import jax.numpy as jnp
from jax.experimental import pallas as pl
from jax.experimental.pallas import tpu as pltpu

_BN_EPS = 1e-5
_LRELU_SLOPE = 0.2
_SUBLANE = 8
_MAX_TILE_M = 512


def _round_up(x, m):
    return (x + m - 1) // m * m


def _vmem_params(semantics, *block_bytes):
    # Assume double-buffering of every block + headroom; cap at 48 MiB so the
    # request is always valid on v7x (64 MiB physical VMEM).
    need = 2 * sum(int(b) for b in block_bytes) + (4 << 20)
    need = int(min(max(need, 16 << 20), 48 << 20))
    return pltpu.CompilerParams(dimension_semantics=semantics,
                                vmem_limit_bytes=need)


# ----------------------------- Pallas kernels -----------------------------

def _conv_s2d_matmuls(x_ref, w_ref, ho, wo):
    """4x4/stride-2 conv as a 2x2/stride-1 conv over the space-to-depth tile:
    four shifted sub-matmuls accumulated in f32 (no patch matrix in HBM)."""
    acc = None
    for idx in range(4):
        dh, dw = divmod(idx, 2)
        xs = x_ref[dh:dh + ho, dw:dw + wo, :]          # (ho, wo, 4*cin) bf16
        xs = xs.reshape(ho * wo, xs.shape[-1])         # wo % 8 == 0 (aligned)
        part = jnp.dot(xs, w_ref[idx], preferred_element_type=jnp.float32)
        acc = part if acc is None else acc + part
    return acc                                         # (ho*wo, cout) f32


def _conv_s2d_lrelu_kernel(x_ref, w_ref, o_ref, *, ho, wo):
    acc = _conv_s2d_matmuls(x_ref, w_ref, ho, wo)
    o_ref[...] = jnp.where(acc > 0.0, acc, _LRELU_SLOPE * acc).astype(o_ref.dtype)


def _conv_s2d_stats_kernel(x_ref, w_ref, y_ref, stats_ref, *, ho, wo):
    """Conv, write raw y (bf16) + per-image (sum, sumsq) partial BN stats."""
    acc = _conv_s2d_matmuls(x_ref, w_ref, ho, wo)
    y_ref[...] = acc.astype(y_ref.dtype)
    stats_ref[...] = jnp.concatenate(
        [jnp.sum(acc, axis=0, keepdims=True),
         jnp.sum(acc * acc, axis=0, keepdims=True)], axis=0)


def _bn_lrelu_kernel(y_ref, ss_ref, o_ref):
    """Single FMA with the pre-folded (scale, shift) + LeakyReLU(0.2)."""
    z = y_ref[...].astype(jnp.float32) * ss_ref[0:1, :] + ss_ref[1:2, :]
    o_ref[...] = jnp.where(z > 0.0, z, _LRELU_SLOPE * z).astype(o_ref.dtype)


def _matmul_act_kernel(p_ref, w_ref, o_ref, *, act):
    y = jnp.dot(p_ref[...], w_ref[...], preferred_element_type=jnp.float32)
    if act == "lrelu":
        y = jnp.where(y > 0.0, y, _LRELU_SLOPE * y)
    elif act == "sigmoid":
        y = jax.nn.sigmoid(y)
    elif act == "tanh":
        y = jnp.tanh(y)
    o_ref[...] = y.astype(o_ref.dtype)


def _tail_kernel(y_ref, ss_ref, w_ref, o_ref, *, act):
    """Fused tiny tail: BN apply + LeakyReLU on the 4x4 map, then the final
    4x4/stride-1 conv (16 accumulated sub-matmuls) + output activation."""
    z = y_ref[...].astype(jnp.float32) * ss_ref[0:1, :] + ss_ref[1:2, :]
    z = jnp.where(z > 0.0, z, _LRELU_SLOPE * z).astype(jnp.bfloat16)
    acc = None
    for t in range(16):
        part = jnp.dot(z[:, t, :], w_ref[t], preferred_element_type=jnp.float32)
        acc = part if acc is None else acc + part
    if act == "sigmoid":
        acc = jax.nn.sigmoid(acc)
    elif act == "tanh":
        acc = jnp.tanh(acc)
    o_ref[...] = acc.astype(o_ref.dtype)


# --------------------------- pallas_call wrappers ---------------------------

def _conv_s2d_lrelu(x_s2d, w4):
    n, hs, ws, c4 = x_s2d.shape
    ho, wo = hs - 1, ws - 1
    cout = w4.shape[2]
    kernel = functools.partial(_conv_s2d_lrelu_kernel, ho=ho, wo=wo)
    return pl.pallas_call(
        kernel,
        out_shape=jax.ShapeDtypeStruct((n, ho * wo, cout), jnp.bfloat16),
        grid_spec=pltpu.PrefetchScalarGridSpec(
            num_scalar_prefetch=0, grid=(n,),
            in_specs=[pl.BlockSpec((None, hs, ws, c4), lambda i: (i, 0, 0, 0)),
                      pl.BlockSpec((4, c4, cout), lambda i: (0, 0, 0))],
            out_specs=pl.BlockSpec((None, ho * wo, cout), lambda i: (i, 0, 0))),
        compiler_params=_vmem_params(
            ("parallel",), hs * ws * c4 * 2, 4 * c4 * cout * 2,
            ho * wo * cout * 2, ho * wo * cout * 4),
        cost_estimate=pl.CostEstimate(
            flops=2 * n * ho * wo * 4 * c4 * cout, transcendentals=0,
            bytes_accessed=n * (hs * ws * c4 * 2 + ho * wo * cout * 2)
            + 4 * c4 * cout * 2),
    )(x_s2d, w4)


def _conv_s2d_stats(x_s2d, w4):
    n, hs, ws, c4 = x_s2d.shape
    ho, wo = hs - 1, ws - 1
    cout = w4.shape[2]
    kernel = functools.partial(_conv_s2d_stats_kernel, ho=ho, wo=wo)
    return pl.pallas_call(
        kernel,
        out_shape=(jax.ShapeDtypeStruct((n, ho * wo, cout), jnp.bfloat16),
                   jax.ShapeDtypeStruct((n, 2, cout), jnp.float32)),
        grid_spec=pltpu.PrefetchScalarGridSpec(
            num_scalar_prefetch=0, grid=(n,),
            in_specs=[pl.BlockSpec((None, hs, ws, c4), lambda i: (i, 0, 0, 0)),
                      pl.BlockSpec((4, c4, cout), lambda i: (0, 0, 0))],
            out_specs=[pl.BlockSpec((None, ho * wo, cout), lambda i: (i, 0, 0)),
                       pl.BlockSpec((None, 2, cout), lambda i: (i, 0, 0))]),
        compiler_params=_vmem_params(
            ("parallel",), hs * ws * c4 * 2, 4 * c4 * cout * 2,
            ho * wo * cout * 2, 2 * cout * 4, ho * wo * cout * 4),
        cost_estimate=pl.CostEstimate(
            flops=2 * n * ho * wo * 4 * c4 * cout + 3 * n * ho * wo * cout,
            transcendentals=0,
            bytes_accessed=n * (hs * ws * c4 * 2 + ho * wo * cout * 2
                                + 2 * cout * 4) + 4 * c4 * cout * 2),
    )(x_s2d, w4)


def _bn_lrelu(y, ss):
    n, m_img, cout = y.shape
    return pl.pallas_call(
        _bn_lrelu_kernel,
        out_shape=jax.ShapeDtypeStruct((n, m_img, cout), jnp.bfloat16),
        grid_spec=pltpu.PrefetchScalarGridSpec(
            num_scalar_prefetch=0, grid=(n,),
            in_specs=[pl.BlockSpec((None, m_img, cout), lambda i: (i, 0, 0)),
                      pl.BlockSpec((2, cout), lambda i: (0, 0))],
            out_specs=pl.BlockSpec((None, m_img, cout), lambda i: (i, 0, 0))),
        compiler_params=_vmem_params(
            ("parallel",), m_img * cout * 2, 2 * cout * 4, m_img * cout * 2),
        cost_estimate=pl.CostEstimate(
            flops=4 * n * m_img * cout, transcendentals=0,
            bytes_accessed=n * m_img * cout * 4 + 2 * cout * 4),
    )(y, ss)


def _matmul_act(p, wmat, act, out_dtype):
    """Row-tiled (P @ W) + activation; used for the small fallback layers and
    the generic final conv (everything here is tiny)."""
    m, k = p.shape
    cout = wmat.shape[1]
    tile_m = min(_MAX_TILE_M, _round_up(m, _SUBLANE))
    mp = _round_up(m, tile_m)
    if mp != m:
        p = jnp.pad(p, ((0, mp - m), (0, 0)))
    out_bytes = jnp.dtype(out_dtype).itemsize
    kernel = functools.partial(_matmul_act_kernel, act=act)
    out = pl.pallas_call(
        kernel,
        out_shape=jax.ShapeDtypeStruct((mp, cout), out_dtype),
        grid_spec=pltpu.PrefetchScalarGridSpec(
            num_scalar_prefetch=0, grid=(mp // tile_m,),
            in_specs=[pl.BlockSpec((tile_m, k), lambda i: (i, 0)),
                      pl.BlockSpec((k, cout), lambda i: (0, 0))],
            out_specs=pl.BlockSpec((tile_m, cout), lambda i: (i, 0))),
        compiler_params=_vmem_params(
            ("parallel",), tile_m * k * 2, k * cout * 2,
            tile_m * cout * out_bytes, tile_m * cout * 4),
        cost_estimate=pl.CostEstimate(
            flops=2 * mp * k * cout,
            transcendentals=mp * cout if act in ("sigmoid", "tanh") else 0,
            bytes_accessed=mp * k * 2 + k * cout * 2 + mp * cout * out_bytes),
    )(p, wmat)
    return out[:m]


def _tail(y, ss, w16, act):
    """Fused last-BN-apply + final 4x4 conv + output activation (one launch)."""
    n, m_img, cin = y.shape          # m_img == 16 (4x4 spatial)
    no = w16.shape[2]
    kernel = functools.partial(_tail_kernel, act=act)
    return pl.pallas_call(
        kernel,
        out_shape=jax.ShapeDtypeStruct((n, no), jnp.float32),
        grid_spec=pltpu.PrefetchScalarGridSpec(
            num_scalar_prefetch=0, grid=(1,),
            in_specs=[pl.BlockSpec((n, m_img, cin), lambda i: (0, 0, 0)),
                      pl.BlockSpec((2, cin), lambda i: (0, 0)),
                      pl.BlockSpec((16, cin, no), lambda i: (0, 0, 0))],
            out_specs=pl.BlockSpec((n, no), lambda i: (0, 0))),
        compiler_params=_vmem_params(
            ("arbitrary",), n * m_img * cin * 2, 2 * cin * 4,
            16 * cin * no * 2, n * no * 4),
        cost_estimate=pl.CostEstimate(
            flops=2 * n * 16 * cin * no + 4 * n * m_img * cin,
            transcendentals=n * no,
            bytes_accessed=n * m_img * cin * 2 + 16 * cin * no * 2 + n * no * 4),
    )(y, ss, w16)


# ------------------------------- JAX glue ----------------------------------

def _pad_s2d(x):
    """NHWC bf16 -> pad 1 + space-to-depth(2): (N, H/2+1, W/2+1, 4C).
    Channel packing order is (ph, pw, c) to match _prep_conv_s2d."""
    n, h, w, c = x.shape
    assert h % 2 == 0 and w % 2 == 0, "spatial dims must be even"
    xp = jnp.pad(x, ((0, 0), (1, 1), (1, 1), (0, 0)))
    hs, ws = (h + 2) // 2, (w + 2) // 2
    xs = xp.reshape(n, hs, 2, ws, 2, c)
    xs = jnp.transpose(xs, (0, 1, 3, 2, 4, 5))
    return xs.reshape(n, hs, ws, 4 * c)


def _s2d_patches(x_s2d, ho, wo):
    """Patch matrix of the 2x2/stride-1 conv over the s2d tensor (only used
    for tiny, non-sublane-aligned layers); ordering matches w4.reshape."""
    n = x_s2d.shape[0]
    c4 = x_s2d.shape[-1]
    cols = [x_s2d[:, dh:dh + ho, dw:dw + wo, :]
            for dh in range(2) for dw in range(2)]
    return jnp.stack(cols, axis=3).reshape(n * ho * wo, 4 * c4)


def _im2col_s1(x, k):
    """Generic stride-1 / no-pad im2col for the final conv fallback path."""
    n, h, w, c = x.shape
    ho, wo = h - k + 1, w - k + 1
    cols = [x[:, i:i + ho, j:j + wo, :] for i in range(k) for j in range(k)]
    return jnp.stack(cols, axis=3).reshape(n * ho * wo, k * k * c), n, ho, wo


def _fold_bn(stats, gamma, beta, m_total):
    """Reduce per-image (sum, sumsq) partials and fold BN into (scale, shift).
    Training-mode (biased) batch statistics, matching the PyTorch module."""
    s = jnp.sum(stats, axis=0)                        # (2, cout) f32
    mean = s[0] / m_total
    var = jnp.maximum(s[1] / m_total - mean * mean, 0.0)  # guard cancellation
    scale = gamma * jax.lax.rsqrt(var + _BN_EPS)
    shift = beta - mean * scale
    return jnp.stack([scale, shift], axis=0)          # (2, cout) f32


def _conv_stride2(x_nhwc, w4, act, want_stats):
    """conv(4, stride 2, pad 1, bias=False).  Returns y (N, Ho*Wo, cout) bf16
    (activation fused when act=='lrelu' and not want_stats) and per-image BN
    stat partials (N, 2, cout) when requested."""
    n, h, w, _ = x_nhwc.shape
    ho, wo = h // 2, w // 2
    cout = w4.shape[2]
    xs = _pad_s2d(x_nhwc)
    if wo % _SUBLANE == 0:
        if want_stats:
            return _conv_s2d_stats(xs, w4)
        return _conv_s2d_lrelu(xs, w4), None
    # TODO(synk): fuse im2col for the non-aligned tiny layers too; today they
    # build a (small) patch matrix in XLA and use the plain matmul kernel.
    p = _s2d_patches(xs, ho, wo)
    y = _matmul_act(p, w4.reshape(-1, cout),
                    "none" if want_stats else act, jnp.bfloat16)
    y = y.reshape(n, ho * wo, cout)
    if want_stats:
        yf = y.astype(jnp.float32)
        stats = jnp.stack([jnp.sum(yf, axis=1), jnp.sum(yf * yf, axis=1)],
                          axis=1)
        return y, stats
    return y, None


def _prep_conv_s2d(w_oihw):
    """PyTorch (Cout, Cin, 4, 4) -> bf16 (4, 4*Cin, Cout): leading axis indexes
    (dh, dw) of the equivalent 2x2/stride-1 conv; second axis is (ph, pw, ci)
    to match _pad_s2d's channel packing."""
    cout, cin = w_oihw.shape[0], w_oihw.shape[1]
    w_hwio = jnp.transpose(w_oihw, (2, 3, 1, 0))      # (4, 4, cin, cout)
    w6 = w_hwio.reshape(2, 2, 2, 2, cin, cout)        # (dh, ph, dw, pw, ...)
    w6 = jnp.transpose(w6, (0, 2, 1, 3, 4, 5))        # (dh, dw, ph, pw, ...)
    return w6.reshape(4, 4 * cin, cout).astype(jnp.bfloat16)


def _prep_conv_final(w_oihw):
    """(no, Cin, 4, 4) -> bf16 (16, Cin, no) ordered (kh*4+kw, ci, no)."""
    no, cin = w_oihw.shape[0], w_oihw.shape[1]
    return jnp.transpose(w_oihw, (2, 3, 1, 0)).reshape(16, cin, no).astype(
        jnp.bfloat16)


def init_discr_params(key, nc=1, ndf=64, act="sigmoid", no=1, w=64,
                      nb_blocks=None):
    """Deterministic re-implementation of weights_init; weights are reshaped /
    bf16-cast once here (hoisted off the hot path)."""
    if nb_blocks is None:
        nb_blocks = int(math.log(w) / math.log(2)) - 3
    keys = jax.random.split(key, 2 + 2 * nb_blocks)
    ki = iter(keys)
    nf = ndf

    w0 = 0.02 * jax.random.normal(next(ki), (nf, nc, 4, 4), dtype=jnp.float32)
    params = {"act": act, "no": no, "conv0": {"w": _prep_conv_s2d(w0)}}

    blocks = []
    for _ in range(nb_blocks):
        wt = 0.02 * jax.random.normal(next(ki), (nf * 2, nf, 4, 4),
                                      dtype=jnp.float32)
        gamma = 1.0 + 0.02 * jax.random.normal(next(ki), (nf * 2,),
                                               dtype=jnp.float32)
        beta = jnp.zeros((nf * 2,), dtype=jnp.float32)
        blocks.append({"w": _prep_conv_s2d(wt), "gamma": gamma, "beta": beta})
        nf = nf * 2
    params["blocks"] = blocks

    wout = 0.02 * jax.random.normal(next(ki), (no, nf, 4, 4), dtype=jnp.float32)
    params["conv_out"] = {"w": _prep_conv_final(wout)}
    return params


def discr_forward(params, x_nchw):
    """Forward pass of Discr.  x_nchw: (N, nc, H, W) f32 -> (N*Ho*Wo, no)."""
    no, act = params["no"], params["act"]
    x = jnp.transpose(x_nchw, (0, 2, 3, 1)).astype(jnp.bfloat16)   # NHWC bf16
    n, h, w, _ = x.shape

    # layer 0: conv(4, s2, p1, bias=False) + LeakyReLU(0.2)
    y, _ = _conv_stride2(x, params["conv0"]["w"], "lrelu", want_stats=False)
    h, w = h // 2, w // 2
    x = y.reshape(n, h, w, -1)

    # middle blocks: conv + BatchNorm(training-mode batch stats) + LeakyReLU
    blocks = params["blocks"]
    for bi, blk in enumerate(blocks):
        y, stats = _conv_stride2(x, blk["w"], "lrelu", want_stats=True)
        h, w = h // 2, w // 2
        ss = _fold_bn(stats, blk["gamma"], blk["beta"], float(n * h * w))
        if bi == len(blocks) - 1 and h == 4 and w == 4:
            # fused tiny tail: BN apply + LeakyReLU + final conv + output act
            return _tail(y, ss, params["conv_out"]["w"], act)
        x = _bn_lrelu(y, ss).reshape(n, h, w, -1)

    # generic tail: final conv(4, s1, p0, bias=False) + output activation
    p, n2, hf, wf = _im2col_s1(x, 4)
    y = _matmul_act(p, params["conv_out"]["w"].reshape(-1, no), act,
                    jnp.float32)
    out = y[: n2 * hf * wf]
    out_nchw = jnp.transpose(out.reshape(n2, hf, wf, no), (0, 3, 1, 2))
    return out_nchw.reshape(-1, no)


if __name__ == "__main__":
    key = jax.random.PRNGKey(0)
    kp, kx, kp2, kx2 = jax.random.split(key, 4)

    # Config 1: 32x32 input, 2 BN blocks — exercises the fused s2d conv+lrelu,
    # fused conv+stats, BN-apply and fused-tail kernels.
    params = init_discr_params(kp, nc=1, ndf=8, act="sigmoid", no=1, w=32,
                               nb_blocks=2)
    x = jax.random.normal(kx, (2, 1, 32, 32), dtype=jnp.float32)
    fwd = jax.jit(lambda inp: discr_forward(params, inp))
    out = jax.block_until_ready(fwd(x))
    assert out.shape == (2, 1), out.shape
    assert bool(jnp.all(jnp.isfinite(out)))
    assert bool(jnp.all((out >= 0.0) & (out <= 1.0)))   # sigmoid range

    # Config 2: no BN blocks — exercises the small-layer fallback conv path
    # and the generic (non-fused) final-conv path.
    params2 = init_discr_params(kp2, nc=1, ndf=8, act="sigmoid", no=1, w=8,
                                nb_blocks=0)
    x2 = jax.random.normal(kx2, (2, 1, 8, 8), dtype=jnp.float32)
    fwd2 = jax.jit(lambda inp: discr_forward(params2, inp))
    out2 = jax.block_until_ready(fwd2(x2))
    assert out2.shape == (2, 1), out2.shape
    assert bool(jnp.all(jnp.isfinite(out2)))

    print("KERNEL_OK")
</pallas_src>

<mosaic_0001>
module attributes {stable_mosaic.version = 11 : i64} {
  func.func @_conv_s2d_lrelu_kernel(%arg0: i32, %arg1: memref<1x17x17x4xbf16, #tpu.memory_space<vmem>>, %arg2: memref<4x4x8xbf16, #tpu.memory_space<vmem>>, %arg3: memref<1x256x8xbf16, #tpu.memory_space<vmem>>) attributes {dimension_semantics = [#tpu.dimension_semantics<parallel>], iteration_bounds = array<i64: 2>, scalar_prefetch = 0 : i64, scratch_operands = 0 : i64, tpu.core_type = #tpu.core_type<tc>, window_params = [{transform_indices = @transform_0, window_bounds = array<i64: 1, 17, 17, 4>}, {pipeline_mode = #tpu.pipeline_mode<synchronous>, transform_indices = @transform_1, window_bounds = array<i64: 4, 4, 8>}, {transform_indices = @transform_2, window_bounds = array<i64: 1, 256, 8>}]} {
    %c0 = arith.constant 0 : index
    %c0_0 = arith.constant 0 : index
    %c0_1 = arith.constant 0 : index
    %c0_2 = arith.constant 0 : index
    %0 = vector.load %arg1[%c0, %c0_0, %c0_1, %c0_2] : memref<1x17x17x4xbf16, #tpu.memory_space<vmem>>, vector<1x16x16x4xbf16>
    %1 = vector.shape_cast %0 : vector<1x16x16x4xbf16> to vector<16x16x4xbf16>
    %2 = vector.shape_cast %1 : vector<16x16x4xbf16> to vector<256x4xbf16>
    %c0_3 = arith.constant 0 : index
    %c0_4 = arith.constant 0 : index
    %c0_5 = arith.constant 0 : index
    %3 = vector.load %arg2[%c0_3, %c0_4, %c0_5] : memref<4x4x8xbf16, #tpu.memory_space<vmem>>, vector<1x4x8xbf16>
    %4 = vector.shape_cast %3 : vector<1x4x8xbf16> to vector<4x8xbf16>
    %cst = arith.constant dense<0.000000e+00> : vector<256x8xf32>
    %5 = tpu.matmul %2, %4, %cst {dimension_numbers = #tpu.dot_dimension_numbers<[1], [0], [0], [1], [0, 0, 1, 1], [], []>} : vector<256x4xbf16>, vector<4x8xbf16>, vector<256x8xf32> -> vector<256x8xf32>
    %c0_6 = arith.constant 0 : index
    %c0_7 = arith.constant 0 : index
    %c1 = arith.constant 1 : index
    %c0_8 = arith.constant 0 : index
    %6 = vector.load %arg1[%c0_6, %c0_7, %c1, %c0_8] : memref<1x17x17x4xbf16, #tpu.memory_space<vmem>>, vector<1x16x16x4xbf16>
    %7 = vector.shape_cast %6 : vector<1x16x16x4xbf16> to vector<16x16x4xbf16>
    %8 = vector.shape_cast %7 : vector<16x16x4xbf16> to vector<256x4xbf16>
    %c1_9 = arith.constant 1 : index
    %c0_10 = arith.constant 0 : index
    %c0_11 = arith.constant 0 : index
    %9 = vector.load %arg2[%c1_9, %c0_10, %c0_11] : memref<4x4x8xbf16, #tpu.memory_space<vmem>>, vector<1x4x8xbf16>
    %10 = vector.shape_cast %9 : vector<1x4x8xbf16> to vector<4x8xbf16>
    %cst_12 = arith.constant dense<0.000000e+00> : vector<256x8xf32>
    %11 = tpu.matmul %8, %10, %cst_12 {dimension_numbers = #tpu.dot_dimension_numbers<[1], [0], [0], [1], [0, 0, 1, 1], [], []>} : vector<256x4xbf16>, vector<4x8xbf16>, vector<256x8xf32> -> vector<256x8xf32>
    %12 = arith.addf %5, %11 : vector<256x8xf32>
    %c0_13 = arith.constant 0 : index
    %c1_14 = arith.constant 1 : index
    %c0_15 = arith.constant 0 : index
    %c0_16 = arith.constant 0 : index
    %13 = vector.load %arg1[%c0_13, %c1_14, %c0_15, %c0_16] : memref<1x17x17x4xbf16, #tpu.memory_space<vmem>>, vector<1x16x16x4xbf16>
    %14 = vector.shape_cast %13 : vector<1x16x16x4xbf16> to vector<16x16x4xbf16>
    %15 = vector.shape_cast %14 : vector<16x16x4xbf16> to vector<256x4xbf16>
    %c2 = arith.constant 2 : index
    %c0_17 = arith.constant 0 : index
    %c0_18 = arith.constant 0 : index
    %16 = vector.load %arg2[%c2, %c0_17, %c0_18] : memref<4x4x8xbf16, #tpu.memory_space<vmem>>, vector<1x4x8xbf16>
    %17 = vector.shape_cast %16 : vector<1x4x8xbf16> to vector<4x8xbf16>
    %cst_19 = arith.constant dense<0.000000e+00> : vector<256x8xf32>
    %18 = tpu.matmul %15, %17, %cst_19 {dimension_numbers = #tpu.dot_dimension_numbers<[1], [0], [0], [1], [0, 0, 1, 1], [], []>} : vector<256x4xbf16>, vector<4x8xbf16>, vector<256x8xf32> -> vector<256x8xf32>
    %19 = arith.addf %12, %18 : vector<256x8xf32>
    %c0_20 = arith.constant 0 : index
    %c1_21 = arith.constant 1 : index
    %c1_22 = arith.constant 1 : index
    %c0_23 = arith.constant 0 : index
    %20 = vector.load %arg1[%c0_20, %c1_21, %c1_22, %c0_23] : memref<1x17x17x4xbf16, #tpu.memory_space<vmem>>, vector<1x16x16x4xbf16>
    %21 = vector.shape_cast %20 : vector<1x16x16x4xbf16> to vector<16x16x4xbf16>
    %22 = vector.shape_cast %21 : vector<16x16x4xbf16> to vector<256x4xbf16>
    %c3 = arith.constant 3 : index
    %c0_24 = arith.constant 0 : index
    %c0_25 = arith.constant 0 : index
    %23 = vector.load %arg2[%c3, %c0_24, %c0_25] : memref<4x4x8xbf16, #tpu.memory_space<vmem>>, vector<1x4x8xbf16>
    %24 = vector.shape_cast %23 : vector<1x4x8xbf16> to vector<4x8xbf16>
    %cst_26 = arith.constant dense<0.000000e+00> : vector<256x8xf32>
    %25 = tpu.matmul %22, %24, %cst_26 {dimension_numbers = #tpu.dot_dimension_numbers<[1], [0], [0], [1], [0, 0, 1, 1], [], []>} : vector<256x4xbf16>, vector<4x8xbf16>, vector<256x8xf32> -> vector<256x8xf32>
    %26 = arith.addf %19, %25 : vector<256x8xf32>
    %cst_27 = arith.constant 0.000000e+00 : f32
    %27 = vector.broadcast %cst_27 : f32 to vector<256x8xf32>
    %28 = arith.cmpf ogt, %26, %27 : vector<256x8xf32>
    %cst_28 = arith.constant 2.000000e-01 : f32
    %29 = vector.broadcast %cst_28 : f32 to vector<256x8xf32>
    %30 = arith.mulf %29, %26 : vector<256x8xf32>
    %31 = arith.select %28, %26, %30 : vector<256x8xi1>, vector<256x8xf32>
    %32 = arith.truncf %31 : vector<256x8xf32> to vector<256x8xbf16>
    %c0_29 = arith.constant 0 : index
    %c0_30 = arith.constant 0 : index
    %c0_31 = arith.constant 0 : index
    %33 = vector.load %arg3[%c0_29, %c0_30, %c0_31] : memref<1x256x8xbf16, #tpu.memory_space<vmem>>, vector<1x256x8xbf16>
    %34 = vector.shape_cast %33 : vector<1x256x8xbf16> to vector<256x8xbf16>
    %35 = vector.shape_cast %32 : vector<256x8xbf16> to vector<1x256x8xbf16>
    tpu.vector_store %arg3[%c0_29, %c0_30, %c0_31], %35 {strides = array<i32>} : memref<1x256x8xbf16, #tpu.memory_space<vmem>>, vector<1x256x8xbf16>,
    return
  }
  func.func @transform_0(%arg0: i32) -> (i32, i32, i32, i32) {
    %c0_i32 = arith.constant 0 : i32
    %c0_i32_0 = arith.constant 0 : i32
    %c0_i32_1 = arith.constant 0 : i32
    %c0_i32_2 = arith.constant 0 : i32
    return %arg0, %c0_i32, %c0_i32_0, %c0_i32_1 : i32, i32, i32, i32
  }
  func.func @transform_1(%arg0: i32) -> (i32, i32, i32) {
    %c0_i32 = arith.constant 0 : i32
    %c0_i32_0 = arith.constant 0 : i32
    %c0_i32_1 = arith.constant 0 : i32
    %c0_i32_2 = arith.constant 0 : i32
    return %c0_i32, %c0_i32_0, %c0_i32_1 : i32, i32, i32
  }
  func.func @transform_2(%arg0: i32) -> (i32, i32, i32) {
    %c0_i32 = arith.constant 0 : i32
    %c0_i32_0 = arith.constant 0 : i32
    %c0_i32_1 = arith.constant 0 : i32
    return %arg0, %c0_i32, %c0_i32_0 : i32, i32, i32
  }
}

module attributes {stable_mosaic.version = 11 : i64} {
  func.func @_conv_s2d_stats_kernel(%arg0: i32, %arg1: memref<1x9x9x32xbf16, #tpu.memory_space<vmem>>, %arg2: memref<4x32x16xbf16, #tpu.memory_space<vmem>>, %arg3: memref<1x64x16xbf16, #tpu.memory_space<vmem>>, %arg4: memref<1x2x16xf32, #tpu.memory_space<vmem>>) attributes {dimension_semantics = [#tpu.dimension_semantics<parallel>], iteration_bounds = array<i64: 2>, scalar_prefetch = 0 : i64, scratch_operands = 0 : i64, tpu.core_type = #tpu.core_type<tc>, window_params = [{transform_indices = @transform_0, window_bounds = array<i64: 1, 9, 9, 32>}, {pipeline_mode = #tpu.pipeline_mode<synchronous>, transform_indices = @transform_1, window_bounds = array<i64: 4, 32, 16>}, {transform_indices = @transform_2, window_bounds = array<i64: 1, 64, 16>}, {transform_indices = @transform_3, window_bounds = array<i64: 1, 2, 16>}]} {
    %c0 = arith.constant 0 : index
    %c0_0 = arith.constant 0 : index
    %c0_1 = arith.constant 0 : index
    %c0_2 = arith.constant 0 : index
    %0 = vector.load %arg1[%c0, %c0_0, %c0_1, %c0_2] : memref<1x9x9x32xbf16, #tpu.memory_space<vmem>>, vector<1x8x8x32xbf16>
    %1 = vector.shape_cast %0 : vector<1x8x8x32xbf16> to vector<8x8x32xbf16>
    %2 = vector.shape_cast %1 : vector<8x8x32xbf16> to vector<64x32xbf16>
    %c0_3 = arith.constant 0 : index
    %c0_4 = arith.constant 0 : index
    %c0_5 = arith.constant 0 : index
    %3 = vector.load %arg2[%c0_3, %c0_4, %c0_5] : memref<4x32x16xbf16, #tpu.memory_space<vmem>>, vector<1x32x16xbf16>
    %4 = vector.shape_cast %3 : vector<1x32x16xbf16> to vector<32x16xbf16>
    %cst = arith.constant dense<0.000000e+00> : vector<64x16xf32>
    %5 = tpu.matmul %2, %4, %cst {dimension_numbers = #tpu.dot_dimension_numbers<[1], [0], [0], [1], [0, 0, 1, 1], [], []>} : vector<64x32xbf16>, vector<32x16xbf16>, vector<64x16xf32> -> vector<64x16xf32>
    %c0_6 = arith.constant 0 : index
    %c0_7 = arith.constant 0 : index
    %c1 = arith.constant 1 : index
    %c0_8 = arith.constant 0 : index
    %6 = vector.load %arg1[%c0_6, %c0_7, %c1, %c0_8] : memref<1x9x9x32xbf16, #tpu.memory_space<vmem>>, vector<1x8x8x32xbf16>
    %7 = vector.shape_cast %6 : vector<1x8x8x32xbf16> to vector<8x8x32xbf16>
    %8 = vector.shape_cast %7 : vector<8x8x32xbf16> to vector<64x32xbf16>
    %c1_9 = arith.constant 1 : index
    %c0_10 = arith.constant 0 : index
    %c0_11 = arith.constant 0 : index
    %9 = vector.load %arg2[%c1_9, %c0_10, %c0_11] : memref<4x32x16xbf16, #tpu.memory_space<vmem>>, vector<1x32x16xbf16>
    %10 = vector.shape_cast %9 : vector<1x32x16xbf16> to vector<32x16xbf16>
    %cst_12 = arith.constant dense<0.000000e+00> : vector<64x16xf32>
    %11 = tpu.matmul %8, %10, %cst_12 {dimension_numbers = #tpu.dot_dimension_numbers<[1], [0], [0], [1], [0, 0, 1, 1], [], []>} : vector<64x32xbf16>, vector<32x16xbf16>, vector<64x16xf32> -> vector<64x16xf32>
    %12 = arith.addf %5, %11 : vector<64x16xf32>
    %c0_13 = arith.constant 0 : index
    %c1_14 = arith.constant 1 : index
    %c0_15 = arith.constant 0 : index
    %c0_16 = arith.constant 0 : index
    %13 = vector.load %arg1[%c0_13, %c1_14, %c0_15, %c0_16] : memref<1x9x9x32xbf16, #tpu.memory_space<vmem>>, vector<1x8x8x32xbf16>
    %14 = vector.shape_cast %13 : vector<1x8x8x32xbf16> to vector<8x8x32xbf16>
    %15 = vector.shape_cast %14 : vector<8x8x32xbf16> to vector<64x32xbf16>
    %c2 = arith.constant 2 : index
    %c0_17 = arith.constant 0 : index
    %c0_18 = arith.constant 0 : index
    %16 = vector.load %arg2[%c2, %c0_17, %c0_18] : memref<4x32x16xbf16, #tpu.memory_space<vmem>>, vector<1x32x16xbf16>
    %17 = vector.shape_cast %16 : vector<1x32x16xbf16> to vector<32x16xbf16>
    %cst_19 = arith.constant dense<0.000000e+00> : vector<64x16xf32>
    %18 = tpu.matmul %15, %17, %cst_19 {dimension_numbers = #tpu.dot_dimension_numbers<[1], [0], [0], [1], [0, 0, 1, 1], [], []>} : vector<64x32xbf16>, vector<32x16xbf16>, vector<64x16xf32> -> vector<64x16xf32>
    %19 = arith.addf %12, %18 : vector<64x16xf32>
    %c0_20 = arith.constant 0 : index
    %c1_21 = arith.constant 1 : index
    %c1_22 = arith.constant 1 : index
    %c0_23 = arith.constant 0 : index
    %20 = vector.load %arg1[%c0_20, %c1_21, %c1_22, %c0_23] : memref<1x9x9x32xbf16, #tpu.memory_space<vmem>>, vector<1x8x8x32xbf16>
    %21 = vector.shape_cast %20 : vector<1x8x8x32xbf16> to vector<8x8x32xbf16>
    %22 = vector.shape_cast %21 : vector<8x8x32xbf16> to vector<64x32xbf16>
    %c3 = arith.constant 3 : index
    %c0_24 = arith.constant 0 : index
    %c0_25 = arith.constant 0 : index
    %23 = vector.load %arg2[%c3, %c0_24, %c0_25] : memref<4x32x16xbf16, #tpu.memory_space<vmem>>, vector<1x32x16xbf16>
    %24 = vector.shape_cast %23 : vector<1x32x16xbf16> to vector<32x16xbf16>
    %cst_26 = arith.constant dense<0.000000e+00> : vector<64x16xf32>
    %25 = tpu.matmul %22, %24, %cst_26 {dimension_numbers = #tpu.dot_dimension_numbers<[1], [0], [0], [1], [0, 0, 1, 1], [], []>} : vector<64x32xbf16>, vector<32x16xbf16>, vector<64x16xf32> -> vector<64x16xf32>
    %26 = arith.addf %19, %25 : vector<64x16xf32>
    %27 = arith.truncf %26 : vector<64x16xf32> to vector<64x16xbf16>
    %c0_27 = arith.constant 0 : index
    %c0_28 = arith.constant 0 : index
    %c0_29 = arith.constant 0 : index
    %28 = vector.load %arg3[%c0_27, %c0_28, %c0_29] : memref<1x64x16xbf16, #tpu.memory_space<vmem>>, vector<1x64x16xbf16>
    %29 = vector.shape_cast %28 : vector<1x64x16xbf16> to vector<64x16xbf16>
    %30 = vector.shape_cast %27 : vector<64x16xbf16> to vector<1x64x16xbf16>
    tpu.vector_store %arg3[%c0_27, %c0_28, %c0_29], %30 {strides = array<i32>} : memref<1x64x16xbf16, #tpu.memory_space<vmem>>, vector<1x64x16xbf16>,
    %cst_30 = arith.constant dense<0.000000e+00> : vector<16xf32>
    %31 = vector.multi_reduction <add>, %26, %cst_30 [0] : vector<64x16xf32> to vector<16xf32>
    %32 = vector.shape_cast %31 : vector<16xf32> to vector<1x16xf32>
    %33 = arith.mulf %26, %26 : vector<64x16xf32>
    %cst_31 = arith.constant dense<0.000000e+00> : vector<16xf32>
    %34 = vector.multi_reduction <add>, %33, %cst_31 [0] : vector<64x16xf32> to vector<16xf32>
    %35 = vector.shape_cast %34 : vector<16xf32> to vector<1x16xf32>
    %36 = tpu.concatenate %32, %35 in 0 : vector<1x16xf32>, vector<1x16xf32> -> vector<2x16xf32>
    %c0_32 = arith.constant 0 : index
    %c0_33 = arith.constant 0 : index
    %c0_34 = arith.constant 0 : index
    %37 = vector.load %arg4[%c0_32, %c0_33, %c0_34] : memref<1x2x16xf32, #tpu.memory_space<vmem>>, vector<1x2x16xf32>
    %38 = vector.shape_cast %37 : vector<1x2x16xf32> to vector<2x16xf32>
    %39 = vector.shape_cast %36 : vector<2x16xf32> to vector<1x2x16xf32>
    tpu.vector_store %arg4[%c0_32, %c0_33, %c0_34], %39 {strides = array<i32>} : memref<1x2x16xf32, #tpu.memory_space<vmem>>, vector<1x2x16xf32>,
    return
  }
  func.func @transform_0(%arg0: i32) -> (i32, i32, i32, i32) {
    %c0_i32 = arith.constant 0 : i32
    %c0_i32_0 = arith.constant 0 : i32
    %c0_i32_1 = arith.constant 0 : i32
    %c0_i32_2 = arith.constant 0 : i32
    return %arg0, %c0_i32, %c0_i32_0, %c0_i32_1 : i32, i32, i32, i32
  }
  func.func @transform_1(%arg0: i32) -> (i32, i32, i32) {
    %c0_i32 = arith.constant 0 : i32
    %c0_i32_0 = arith.constant 0 : i32
    %c0_i32_1 = arith.constant 0 : i32
    %c0_i32_2 = arith.constant 0 : i32
    return %c0_i32, %c0_i32_0, %c0_i32_1 : i32, i32, i32
  }
  func.func @transform_2(%arg0: i32) -> (i32, i32, i32) {
    %c0_i32 = arith.constant 0 : i32
    %c0_i32_0 = arith.constant 0 : i32
    %c0_i32_1 = arith.constant 0 : i32
    return %arg0, %c0_i32, %c0_i32_0 : i32, i32, i32
  }
  func.func @transform_3(%arg0: i32) -> (i32, i32, i32) {
    %c0_i32 = arith.constant 0 : i32
    %c0_i32_0 = arith.constant 0 : i32
    %c0_i32_1 = arith.constant 0 : i32
    return %arg0, %c0_i32, %c0_i32_0 : i32, i32, i32
  }
}

module attributes {stable_mosaic.version = 11 : i64} {
  func.func @_bn_lrelu_kernel(%arg0: i32, %arg1: memref<1x64x16xbf16, #tpu.memory_space<vmem>>, %arg2: memref<2x16xf32, #tpu.memory_space<vmem>>, %arg3: memref<1x64x16xbf16, #tpu.memory_space<vmem>>) attributes {dimension_semantics = [#tpu.dimension_semantics<parallel>], iteration_bounds = array<i64: 2>, scalar_prefetch = 0 : i64, scratch_operands = 0 : i64, tpu.core_type = #tpu.core_type<tc>, window_params = [{transform_indices = @transform_0, window_bounds = array<i64: 1, 64, 16>}, {pipeline_mode = #tpu.pipeline_mode<synchronous>, transform_indices = @transform_1, window_bounds = array<i64: 2, 16>}, {transform_indices = @transform_2, window_bounds = array<i64: 1, 64, 16>}]} {
    %c0 = arith.constant 0 : index
    %c0_0 = arith.constant 0 : index
    %c0_1 = arith.constant 0 : index
    %0 = vector.load %arg1[%c0, %c0_0, %c0_1] : memref<1x64x16xbf16, #tpu.memory_space<vmem>>, vector<1x64x16xbf16>
    %1 = vector.shape_cast %0 : vector<1x64x16xbf16> to vector<64x16xbf16>
    %2 = arith.extf %1 : vector<64x16xbf16> to vector<64x16xf32>
    %c0_2 = arith.constant 0 : index
    %c0_3 = arith.constant 0 : index
    %3 = vector.load %arg2[%c0_2, %c0_3] : memref<2x16xf32, #tpu.memory_space<vmem>>, vector<1x16xf32>
    %4 = vector.broadcast %3 : vector<1x16xf32> to vector<64x16xf32>
    %5 = arith.mulf %2, %4 : vector<64x16xf32>
    %c1 = arith.constant 1 : index
    %c0_4 = arith.constant 0 : index
    %6 = vector.load %arg2[%c1, %c0_4] : memref<2x16xf32, #tpu.memory_space<vmem>>, vector<1x16xf32>
    %7 = vector.broadcast %6 : vector<1x16xf32> to vector<64x16xf32>
    %8 = arith.addf %5, %7 : vector<64x16xf32>
    %cst = arith.constant 0.000000e+00 : f32
    %9 = vector.broadcast %cst : f32 to vector<64x16xf32>
    %10 = arith.cmpf ogt, %8, %9 : vector<64x16xf32>
    %cst_5 = arith.constant 2.000000e-01 : f32
    %11 = vector.broadcast %cst_5 : f32 to vector<64x16xf32>
    %12 = arith.mulf %11, %8 : vector<64x16xf32>
    %13 = arith.select %10, %8, %12 : vector<64x16xi1>, vector<64x16xf32>
    %14 = arith.truncf %13 : vector<64x16xf32> to vector<64x16xbf16>
    %c0_6 = arith.constant 0 : index
    %c0_7 = arith.constant 0 : index
    %c0_8 = arith.constant 0 : index
    %15 = vector.load %arg3[%c0_6, %c0_7, %c0_8] : memref<1x64x16xbf16, #tpu.memory_space<vmem>>, vector<1x64x16xbf16>
    %16 = vector.shape_cast %15 : vector<1x64x16xbf16> to vector<64x16xbf16>
    %17 = vector.shape_cast %14 : vector<64x16xbf16> to vector<1x64x16xbf16>
    tpu.vector_store %arg3[%c0_6, %c0_7, %c0_8], %17 {strides = array<i32>} : memref<1x64x16xbf16, #tpu.memory_space<vmem>>, vector<1x64x16xbf16>,
    return
  }
  func.func @transform_0(%arg0: i32) -> (i32, i32, i32) {
    %c0_i32 = arith.constant 0 : i32
    %c0_i32_0 = arith.constant 0 : i32
    %c0_i32_1 = arith.constant 0 : i32
    return %arg0, %c0_i32, %c0_i32_0 : i32, i32, i32
  }
  func.func @transform_1(%arg0: i32) -> (i32, i32) {
    %c0_i32 = arith.constant 0 : i32
    %c0_i32_0 = arith.constant 0 : i32
    %c0_i32_1 = arith.constant 0 : i32
    return %c0_i32, %c0_i32_0 : i32, i32
  }
  func.func @transform_2(%arg0: i32) -> (i32, i32, i32) {
    %c0_i32 = arith.constant 0 : i32
    %c0_i32_0 = arith.constant 0 : i32
    %c0_i32_1 = arith.constant 0 : i32
    return %arg0, %c0_i32, %c0_i32_0 : i32, i32, i32
  }
}

module attributes {stable_mosaic.version = 11 : i64} {
  func.func @_matmul_act_kernel(%arg0: i32, %arg1: memref<32x256xbf16, #tpu.memory_space<vmem>>, %arg2: memref<256x32xbf16, #tpu.memory_space<vmem>>, %arg3: memref<32x32xbf16, #tpu.memory_space<vmem>>) attributes {dimension_semantics = [#tpu.dimension_semantics<parallel>], iteration_bounds = array<i64: 1>, scalar_prefetch = 0 : i64, scratch_operands = 0 : i64, tpu.core_type = #tpu.core_type<tc>, window_params = [{transform_indices = @transform_0, window_bounds = array<i64: 32, 256>}, {pipeline_mode = #tpu.pipeline_mode<synchronous>, transform_indices = @transform_1, window_bounds = array<i64: 256, 32>}, {transform_indices = @transform_2, window_bounds = array<i64: 32, 32>}]} {
    %c0 = arith.constant 0 : index
    %c0_0 = arith.constant 0 : index
    %0 = vector.load %arg1[%c0, %c0_0] : memref<32x256xbf16, #tpu.memory_space<vmem>>, vector<32x256xbf16>
    %c0_1 = arith.constant 0 : index
    %c0_2 = arith.constant 0 : index
    %1 = vector.load %arg2[%c0_1, %c0_2] : memref<256x32xbf16, #tpu.memory_space<vmem>>, vector<256x32xbf16>
    %cst = arith.constant dense<0.000000e+00> : vector<32x32xf32>
    %2 = tpu.matmul %0, %1, %cst {dimension_numbers = #tpu.dot_dimension_numbers<[1], [0], [0], [1], [0, 0, 1, 1], [], []>} : vector<32x256xbf16>, vector<256x32xbf16>, vector<32x32xf32> -> vector<32x32xf32>
    %3 = arith.truncf %2 : vector<32x32xf32> to vector<32x32xbf16>
    %c0_3 = arith.constant 0 : index
    %c0_4 = arith.constant 0 : index
    %4 = vector.load %arg3[%c0_3, %c0_4] : memref<32x32xbf16, #tpu.memory_space<vmem>>, vector<32x32xbf16>
    tpu.vector_store %arg3[%c0_3, %c0_4], %3 {strides = array<i32>} : memref<32x32xbf16, #tpu.memory_space<vmem>>, vector<32x32xbf16>,
    return
  }
  func.func @transform_0(%arg0: i32) -> (i32, i32) {
    %c0_i32 = arith.constant 0 : i32
    %c0_i32_0 = arith.constant 0 : i32
    return %arg0, %c0_i32 : i32, i32
  }
  func.func @transform_1(%arg0: i32) -> (i32, i32) {
    %c0_i32 = arith.constant 0 : i32
    %c0_i32_0 = arith.constant 0 : i32
    %c0_i32_1 = arith.constant 0 : i32
    return %c0_i32, %c0_i32_0 : i32, i32
  }
  func.func @transform_2(%arg0: i32) -> (i32, i32) {
    %c0_i32 = arith.constant 0 : i32
    %c0_i32_0 = arith.constant 0 : i32
    return %arg0, %c0_i32 : i32, i32
  }
}

module attributes {stable_mosaic.version = 11 : i64} {
  func.func @_tail_kernel(%arg0: i32, %arg1: memref<2x16x32xbf16, #tpu.memory_space<vmem>>, %arg2: memref<2x32xf32, #tpu.memory_space<vmem>>, %arg3: memref<16x32x1xbf16, #tpu.memory_space<vmem>>, %arg4: memref<2x1xf32, #tpu.memory_space<vmem>>) attributes {dimension_semantics = [#tpu.dimension_semantics<arbitrary>], iteration_bounds = array<i64: 1>, scalar_prefetch = 0 : i64, scratch_operands = 0 : i64, tpu.core_type = #tpu.core_type<tc>, window_params = [{pipeline_mode = #tpu.pipeline_mode<synchronous>, transform_indices = @transform_0, window_bounds = array<i64: 2, 16, 32>}, {pipeline_mode = #tpu.pipeline_mode<synchronous>, transform_indices = @transform_1, window_bounds = array<i64: 2, 32>}, {pipeline_mode = #tpu.pipeline_mode<synchronous>, transform_indices = @transform_2, window_bounds = array<i64: 16, 32, 1>}, {pipeline_mode = #tpu.pipeline_mode<synchronous>, transform_indices = @transform_3, window_bounds = array<i64: 2, 1>}]} {
    %c0 = arith.constant 0 : index
    %c0_0 = arith.constant 0 : index
    %c0_1 = arith.constant 0 : index
    %0 = vector.load %arg1[%c0, %c0_0, %c0_1] : memref<2x16x32xbf16, #tpu.memory_space<vmem>>, vector<2x16x32xbf16>
    %1 = arith.extf %0 : vector<2x16x32xbf16> to vector<2x16x32xf32>
    %c0_2 = arith.constant 0 : index
    %c0_3 = arith.constant 0 : index
    %2 = vector.load %arg2[%c0_2, %c0_3] : memref<2x32xf32, #tpu.memory_space<vmem>>, vector<1x32xf32>
    %3 = vector.shape_cast %2 : vector<1x32xf32> to vector<1x1x32xf32>
    %4 = vector.broadcast %3 : vector<1x1x32xf32> to vector<2x16x32xf32>
    %5 = arith.mulf %1, %4 : vector<2x16x32xf32>
    %c1 = arith.constant 1 : index
    %c0_4 = arith.constant 0 : index
    %6 = vector.load %arg2[%c1, %c0_4] : memref<2x32xf32, #tpu.memory_space<vmem>>, vector<1x32xf32>
    %7 = vector.shape_cast %6 : vector<1x32xf32> to vector<1x1x32xf32>
    %8 = vector.broadcast %7 : vector<1x1x32xf32> to vector<2x16x32xf32>
    %9 = arith.addf %5, %8 : vector<2x16x32xf32>
    %cst = arith.constant 0.000000e+00 : f32
    %10 = vector.broadcast %cst : f32 to vector<2x16x32xf32>
    %11 = arith.cmpf ogt, %9, %10 : vector<2x16x32xf32>
    %cst_5 = arith.constant 2.000000e-01 : f32
    %12 = vector.broadcast %cst_5 : f32 to vector<2x16x32xf32>
    %13 = arith.mulf %12, %9 : vector<2x16x32xf32>
    %14 = arith.select %11, %9, %13 : vector<2x16x32xi1>, vector<2x16x32xf32>
    %15 = arith.truncf %14 : vector<2x16x32xf32> to vector<2x16x32xbf16>
    %16 = vector.extract_strided_slice %15 {offsets = [0, 0, 0], sizes = [2, 1, 32], strides = [1, 1, 1]} : vector<2x16x32xbf16> to vector<2x1x32xbf16>
    %17 = vector.shape_cast %16 : vector<2x1x32xbf16> to vector<2x32xbf16>
    %c0_6 = arith.constant 0 : index
    %c0_7 = arith.constant 0 : index
    %c0_8 = arith.constant 0 : index
    %18 = vector.load %arg3[%c0_6, %c0_7, %c0_8] : memref<16x32x1xbf16, #tpu.memory_space<vmem>>, vector<1x32x1xbf16>
    %19 = vector.shape_cast %18 : vector<1x32x1xbf16> to vector<32x1xbf16>
    %cst_9 = arith.constant dense<0.000000e+00> : vector<2x1xf32>
    %20 = tpu.matmul %17, %19, %cst_9 {dimension_numbers = #tpu.dot_dimension_numbers<[1], [0], [0], [1], [0, 0, 1, 1], [], []>} : vector<2x32xbf16>, vector<32x1xbf16>, vector<2x1xf32> -> vector<2x1xf32>
    %21 = vector.extract_strided_slice %15 {offsets = [0, 1, 0], sizes = [2, 1, 32], strides = [1, 1, 1]} : vector<2x16x32xbf16> to vector<2x1x32xbf16>
    %22 = vector.shape_cast %21 : vector<2x1x32xbf16> to vector<2x32xbf16>
    %c1_10 = arith.constant 1 : index
    %c0_11 = arith.constant 0 : index
    %c0_12 = arith.constant 0 : index
    %23 = vector.load %arg3[%c1_10, %c0_11, %c0_12] : memref<16x32x1xbf16, #tpu.memory_space<vmem>>, vector<1x32x1xbf16>
    %24 = vector.shape_cast %23 : vector<1x32x1xbf16> to vector<32x1xbf16>
    %cst_13 = arith.constant dense<0.000000e+00> : vector<2x1xf32>
    %25 = tpu.matmul %22, %24, %cst_13 {dimension_numbers = #tpu.dot_dimension_numbers<[1], [0], [0], [1], [0, 0, 1, 1], [], []>} : vector<2x32xbf16>, vector<32x1xbf16>, vector<2x1xf32> -> vector<2x1xf32>
    %26 = arith.addf %20, %25 : vector<2x1xf32>
    %27 = vector.extract_strided_slice %15 {offsets = [0, 2, 0], sizes = [2, 1, 32], strides = [1, 1, 1]} : vector<2x16x32xbf16> to vector<2x1x32xbf16>
    %28 = vector.shape_cast %27 : vector<2x1x32xbf16> to vector<2x32xbf16>
    %c2 = arith.constant 2 : index
    %c0_14 = arith.constant 0 : index
    %c0_15 = arith.constant 0 : index
    %29 = vector.load %arg3[%c2, %c0_14, %c0_15] : memref<16x32x1xbf16, #tpu.memory_space<vmem>>, vector<1x32x1xbf16>
    %30 = vector.shape_cast %29 : vector<1x32x1xbf16> to vector<32x1xbf16>
    %cst_16 = arith.constant dense<0.000000e+00> : vector<2x1xf32>
    %31 = tpu.matmul %28, %30, %cst_16 {dimension_numbers = #tpu.dot_dimension_numbers<[1], [0], [0], [1], [0, 0, 1, 1], [], []>} : vector<2x32xbf16>, vector<32x1xbf16>, vector<2x1xf32> -> vector<2x1xf32>
    %32 = arith.addf %26, %31 : vector<2x1xf32>
    %33 = vector.extract_strided_slice %15 {offsets = [0, 3, 0], sizes = [2, 1, 32], strides = [1, 1, 1]} : vector<2x16x32xbf16> to vector<2x1x32xbf16>
    %34 = vector.shape_cast %33 : vector<2x1x32xbf16> to vector<2x32xbf16>
    %c3 = arith.constant 3 : index
    %c0_17 = arith.constant 0 : index
    %c0_18 = arith.constant 0 : index
    %35 = vector.load %arg3[%c3, %c0_17, %c0_18] : memref<16x32x1xbf16, #tpu.memory_space<vmem>>, vector<1x32x1xbf16>
    %36 = vector.shape_cast %35 : vector<1x32x1xbf16> to vector<32x1xbf16>
    %cst_19 = arith.constant dense<0.000000e+00> : vector<2x1xf32>
    %37 = tpu.matmul %34, %36, %cst_19 {dimension_numbers = #tpu.dot_dimension_numbers<[1], [0], [0], [1], [0, 0, 1, 1], [], []>} : vector<2x32xbf16>, vector<32x1xbf16>, vector<2x1xf32> -> vector<2x1xf32>
    %38 = arith.addf %32, %37 : vector<2x1xf32>
    %39 = vector.extract_strided_slice %15 {offsets = [0, 4, 0], sizes = [2, 1, 32], strides = [1, 1, 1]} : vector<2x16x32xbf16> to vector<2x1x32xbf16>
    %40 = vector.shape_cast %39 : vector<2x1x32xbf16> to vector<2x32xbf16>
    %c4 = arith.constant 4 : index
    %c0_20 = arith.constant 0 : index
    %c0_21 = arith.constant 0 : index
    %41 = vector.load %arg3[%c4, %c0_20, %c0_21] : memref<16x32x1xbf16, #tpu.memory_space<vmem>>, vector<1x32x1xbf16>
    %42 = vector.shape_cast %41 : vector<1x32x1xbf16> to vector<32x1xbf16>
    %cst_22 = arith.constant dense<0.000000e+00> : vector<2x1xf32>
    %43 = tpu.matmul %40, %42, %cst_22 {dimension_numbers = #tpu.dot_dimension_numbers<[1], [0], [0], [1], [0, 0, 1, 1], [], []>} : vector<2x32xbf16>, vector<32x1xbf16>, vector<2x1xf32> -> vector<2x1xf32>
    %44 = arith.addf %38, %43 : vector<2x1xf32>
    %45 = vector.extract_strided_slice %15 {offsets = [0, 5, 0], sizes = [2, 1, 32], strides = [1, 1, 1]} : vector<2x16x32xbf16> to vector<2x1x32xbf16>
    %46 = vector.shape_cast %45 : vector<2x1x32xbf16> to vector<2x32xbf16>
    %c5 = arith.constant 5 : index
    %c0_23 = arith.constant 0 : index
    %c0_24 = arith.constant 0 : index
    %47 = vector.load %arg3[%c5, %c0_23, %c0_24] : memref<16x32x1xbf16, #tpu.memory_space<vmem>>, vector<1x32x1xbf16>
    %48 = vector.shape_cast %47 : vector<1x32x1xbf16> to vector<32x1xbf16>
    %cst_25 = arith.constant dense<0.000000e+00> : vector<2x1xf32>
    %49 = tpu.matmul %46, %48, %cst_25 {dimension_numbers = #tpu.dot_dimension_numbers<[1], [0], [0], [1], [0, 0, 1, 1], [], []>} : vector<2x32xbf16>, vector<32x1xbf16>, vector<2x1xf32> -> vector<2x1xf32>
    %50 = arith.addf %44, %49 : vector<2x1xf32>
    %51 = vector.extract_strided_slice %15 {offsets = [0, 6, 0], sizes = [2, 1, 32], strides = [1, 1, 1]} : vector<2x16x32xbf16> to vector<2x1x32xbf16>
    %52 = vector.shape_cast %51 : vector<2x1x32xbf16> to vector<2x32xbf16>
    %c6 = arith.constant 6 : index
    %c0_26 = arith.constant 0 : index
    %c0_27 = arith.constant 0 : index
    %53 = vector.load %arg3[%c6, %c0_26, %c0_27] : memref<16x32x1xbf16, #tpu.memory_space<vmem>>, vector<1x32x1xbf16>
    %54 = vector.shape_cast %53 : vector<1x32x1xbf16> to vector<32x1xbf16>
    %cst_28 = arith.constant dense<0.000000e+00> : vector<2x1xf32>
    %55 = tpu.matmul %52, %54, %cst_28 {dimension_numbers = #tpu.dot_dimension_numbers<[1], [0], [0], [1], [0, 0, 1, 1], [], []>} : vector<2x32xbf16>, vector<32x1xbf16>, vector<2x1xf32> -> vector<2x1xf32>
    %56 = arith.addf %50, %55 : vector<2x1xf32>
    %57 = vector.extract_strided_slice %15 {offsets = [0, 7, 0], sizes = [2, 1, 32], strides = [1, 1, 1]} : vector<2x16x32xbf16> to vector<2x1x32xbf16>
    %58 = vector.shape_cast %57 : vector<2x1x32xbf16> to vector<2x32xbf16>
    %c7 = arith.constant 7 : index
    %c0_29 = arith.constant 0 : index
    %c0_30 = arith.constant 0 : index
    %59 = vector.load %arg3[%c7, %c0_29, %c0_30] : memref<16x32x1xbf16, #tpu.memory_space<vmem>>, vector<1x32x1xbf16>
    %60 = vector.shape_cast %59 : vector<1x32x1xbf16> to vector<32x1xbf16>
    %cst_31 = arith.constant dense<0.000000e+00> : vector<2x1xf32>
    %61 = tpu.matmul %58, %60, %cst_31 {dimension_numbers = #tpu.dot_dimension_numbers<[1], [0], [0], [1], [0, 0, 1, 1], [], []>} : vector<2x32xbf16>, vector<32x1xbf16>, vector<2x1xf32> -> vector<2x1xf32>
    %62 = arith.addf %56, %61 : vector<2x1xf32>
    %63 = vector.extract_strided_slice %15 {offsets = [0, 8, 0], sizes = [2, 1, 32], strides = [1, 1, 1]} : vector<2x16x32xbf16> to vector<2x1x32xbf16>
    %64 = vector.shape_cast %63 : vector<2x1x32xbf16> to vector<2x32xbf16>
    %c8 = arith.constant 8 : index
    %c0_32 = arith.constant 0 : index
    %c0_33 = arith.constant 0 : index
    %65 = vector.load %arg3[%c8, %c0_32, %c0_33] : memref<16x32x1xbf16, #tpu.memory_space<vmem>>, vector<1x32x1xbf16>
    %66 = vector.shape_cast %65 : vector<1x32x1xbf16> to vector<32x1xbf16>
    %cst_34 = arith.constant dense<0.000000e+00> : vector<2x1xf32>
    %67 = tpu.matmul %64, %66, %cst_34 {dimension_numbers = #tpu.dot_dimension_numbers<[1], [0], [0], [1], [0, 0, 1, 1], [], []>} : vector<2x32xbf16>, vector<32x1xbf16>, vector<2x1xf32> -> vector<2x1xf32>
    %68 = arith.addf %62, %67 : vector<2x1xf32>
    %69 = vector.extract_strided_slice %15 {offsets = [0, 9, 0], sizes = [2, 1, 32], strides = [1, 1, 1]} : vector<2x16x32xbf16> to vector<2x1x32xbf16>
    %70 = vector.shape_cast %69 : vector<2x1x32xbf16> to vector<2x32xbf16>
    %c9 = arith.constant 9 : index
    %c0_35 = arith.constant 0 : index
    %c0_36 = arith.constant 0 : index
    %71 = vector.load %arg3[%c9, %c0_35, %c0_36] : memref<16x32x1xbf16, #tpu.memory_space<vmem>>, vector<1x32x1xbf16>
    %72 = vector.shape_cast %71 : vector<1x32x1xbf16> to vector<32x1xbf16>
    %cst_37 = arith.constant dense<0.000000e+00> : vector<2x1xf32>
    %73 = tpu.matmul %70, %72, %cst_37 {dimension_numbers = #tpu.dot_dimension_numbers<[1], [0], [0], [1], [0, 0, 1, 1], [], []>} : vector<2x32xbf16>, vector<32x1xbf16>, vector<2x1xf32> -> vector<2x1xf32>
    %74 = arith.addf %68, %73 : vector<2x1xf32>
    %75 = vector.extract_strided_slice %15 {offsets = [0, 10, 0], sizes = [2, 1, 32], strides = [1, 1, 1]} : vector<2x16x32xbf16> to vector<2x1x32xbf16>
    %76 = vector.shape_cast %75 : vector<2x1x32xbf16> to vector<2x32xbf16>
    %c10 = arith.constant 10 : index
    %c0_38 = arith.constant 0 : index
    %c0_39 = arith.constant 0 : index
    %77 = vector.load %arg3[%c10, %c0_38, %c0_39] : memref<16x32x1xbf16, #tpu.memory_space<vmem>>, vector<1x32x1xbf16>
    %78 = vector.shape_cast %77 : vector<1x32x1xbf16> to vector<32x1xbf16>
    %cst_40 = arith.constant dense<0.000000e+00> : vector<2x1xf32>
    %79 = tpu.matmul %76, %78, %cst_40 {dimension_numbers = #tpu.dot_dimension_numbers<[1], [0], [0], [1], [0, 0, 1, 1], [], []>} : vector<2x32xbf16>, vector<32x1xbf16>, vector<2x1xf32> -> vector<2x1xf32>
    %80 = arith.addf %74, %79 : vector<2x1xf32>
    %81 = vector.extract_strided_slice %15 {offsets = [0, 11, 0], sizes = [2, 1, 32], strides = [1, 1, 1]} : vector<2x16x32xbf16> to vector<2x1x32xbf16>
    %82 = vector.shape_cast %81 : vector<2x1x32xbf16> to vector<2x32xbf16>
    %c11 = arith.constant 11 : index
    %c0_41 = arith.constant 0 : index
    %c0_42 = arith.constant 0 : index
    %83 = vector.load %arg3[%c11, %c0_41, %c0_42] : memref<16x32x1xbf16, #tpu.memory_space<vmem>>, vector<1x32x1xbf16>
    %84 = vector.shape_cast %83 : vector<1x32x1xbf16> to vector<32x1xbf16>
    %cst_43 = arith.constant dense<0.000000e+00> : vector<2x1xf32>
    %85 = tpu.matmul %82, %84, %cst_43 {dimension_numbers = #tpu.dot_dimension_numbers<[1], [0], [0], [1], [0, 0, 1, 1], [], []>} : vector<2x32xbf16>, vector<32x1xbf16>, vector<2x1xf32> -> vector<2x1xf32>
    %86 = arith.addf %80, %85 : vector<2x1xf32>
    %87 = vector.extract_strided_slice %15 {offsets = [0, 12, 0], sizes = [2, 1, 32], strides = [1, 1, 1]} : vector<2x16x32xbf16> to vector<2x1x32xbf16>
    %88 = vector.shape_cast %87 : vector<2x1x32xbf16> to vector<2x32xbf16>
    %c12 = arith.constant 12 : index
    %c0_44 = arith.constant 0 : index
    %c0_45 = arith.constant 0 : index
    %89 = vector.load %arg3[%c12, %c0_44, %c0_45] : memref<16x32x1xbf16, #tpu.memory_space<vmem>>, vector<1x32x1xbf16>
    %90 = vector.shape_cast %89 : vector<1x32x1xbf16> to vector<32x1xbf16>
    %cst_46 = arith.constant dense<0.000000e+00> : vector<2x1xf32>
    %91 = tpu.matmul %88, %90, %cst_46 {dimension_numbers = #tpu.dot_dimension_numbers<[1], [0], [0], [1], [0, 0, 1, 1], [], []>} : vector<2x32xbf16>, vector<32x1xbf16>, vector<2x1xf32> -> vector<2x1xf32>
    %92 = arith.addf %86, %91 : vector<2x1xf32>
    %93 = vector.extract_strided_slice %15 {offsets = [0, 13, 0], sizes = [2, 1, 32], strides = [1, 1, 1]} : vector<2x16x32xbf16> to vector<2x1x32xbf16>
    %94 = vector.shape_cast %93 : vector<2x1x32xbf16> to vector<2x32xbf16>
    %c13 = arith.constant 13 : index
    %c0_47 = arith.constant 0 : index
    %c0_48 = arith.constant 0 : index
    %95 = vector.load %arg3[%c13, %c0_47, %c0_48] : memref<16x32x1xbf16, #tpu.memory_space<vmem>>, vector<1x32x1xbf16>
    %96 = vector.shape_cast %95 : vector<1x32x1xbf16> to vector<32x1xbf16>
    %cst_49 = arith.constant dense<0.000000e+00> : vector<2x1xf32>
    %97 = tpu.matmul %94, %96, %cst_49 {dimension_numbers = #tpu.dot_dimension_numbers<[1], [0], [0], [1], [0, 0, 1, 1], [], []>} : vector<2x32xbf16>, vector<32x1xbf16>, vector<2x1xf32> -> vector<2x1xf32>
    %98 = arith.addf %92, %97 : vector<2x1xf32>
    %99 = vector.extract_strided_slice %15 {offsets = [0, 14, 0], sizes = [2, 1, 32], strides = [1, 1, 1]} : vector<2x16x32xbf16> to vector<2x1x32xbf16>
    %100 = vector.shape_cast %99 : vector<2x1x32xbf16> to vector<2x32xbf16>
    %c14 = arith.constant 14 : index
    %c0_50 = arith.constant 0 : index
    %c0_51 = arith.constant 0 : index
    %101 = vector.load %arg3[%c14, %c0_50, %c0_51] : memref<16x32x1xbf16, #tpu.memory_space<vmem>>, vector<1x32x1xbf16>
    %102 = vector.shape_cast %101 : vector<1x32x1xbf16> to vector<32x1xbf16>
    %cst_52 = arith.constant dense<0.000000e+00> : vector<2x1xf32>
    %103 = tpu.matmul %100, %102, %cst_52 {dimension_numbers = #tpu.dot_dimension_numbers<[1], [0], [0], [1], [0, 0, 1, 1], [], []>} : vector<2x32xbf16>, vector<32x1xbf16>, vector<2x1xf32> -> vector<2x1xf32>
    %104 = arith.addf %98, %103 : vector<2x1xf32>
    %105 = vector.extract_strided_slice %15 {offsets = [0, 15, 0], sizes = [2, 1, 32], strides = [1, 1, 1]} : vector<2x16x32xbf16> to vector<2x1x32xbf16>
    %106 = vector.shape_cast %105 : vector<2x1x32xbf16> to vector<2x32xbf16>
    %c15 = arith.constant 15 : index
    %c0_53 = arith.constant 0 : index
    %c0_54 = arith.constant 0 : index
    %107 = vector.load %arg3[%c15, %c0_53, %c0_54] : memref<16x32x1xbf16, #tpu.memory_space<vmem>>, vector<1x32x1xbf16>
    %108 = vector.shape_cast %107 : vector<1x32x1xbf16> to vector<32x1xbf16>
    %cst_55 = arith.constant dense<0.000000e+00> : vector<2x1xf32>
    %109 = tpu.matmul %106, %108, %cst_55 {dimension_numbers = #tpu.dot_dimension_numbers<[1], [0], [0], [1], [0, 0, 1, 1], [], []>} : vector<2x32xbf16>, vector<32x1xbf16>, vector<2x1xf32> -> vector<2x1xf32>
    %110 = arith.addf %104, %109 : vector<2x1xf32>
    %111 = arith.negf %110 : vector<2x1xf32>
    %112 = math.exp %111 : vector<2x1xf32>
    %cst_56 = arith.constant 1.000000e+00 : f32
    %113 = vector.broadcast %cst_56 : f32 to vector<2x1xf32>
    %114 = arith.addf %113, %112 : vector<2x1xf32>
    %115 = arith.divf %113, %114 : vector<2x1xf32>
    %c0_57 = arith.constant 0 : index
    %c0_58 = arith.constant 0 : index
    %116 = vector.load %arg4[%c0_57, %c0_58] : memref<2x1xf32, #tpu.memory_space<vmem>>, vector<2x1xf32>
    tpu.vector_store %arg4[%c0_57, %c0_58], %115 {strides = array<i32>} : memref<2x1xf32, #tpu.memory_space<vmem>>, vector<2x1xf32>,
    return
  }
  func.func @transform_0(%arg0: i32) -> (i32, i32, i32) {
    %c0_i32 = arith.constant 0 : i32
    %c0_i32_0 = arith.constant 0 : i32
    %c0_i32_1 = arith.constant 0 : i32
    %c0_i32_2 = arith.constant 0 : i32
    return %c0_i32, %c0_i32_0, %c0_i32_1 : i32, i32, i32
  }
  func.func @transform_1(%arg0: i32) -> (i32, i32) {
    %c0_i32 = arith.constant 0 : i32
    %c0_i32_0 = arith.constant 0 : i32
    %c0_i32_1 = arith.constant 0 : i32
    return %c0_i32, %c0_i32_0 : i32, i32
  }
  func.func @transform_2(%arg0: i32) -> (i32, i32, i32) {
    %c0_i32 = arith.constant 0 : i32
    %c0_i32_0 = arith.constant 0 : i32
    %c0_i32_1 = arith.constant 0 : i32
    %c0_i32_2 = arith.constant 0 : i32
    return %c0_i32, %c0_i32_0, %c0_i32_1 : i32, i32, i32
  }
  func.func @transform_3(%arg0: i32) -> (i32, i32) {
    %c0_i32 = arith.constant 0 : i32
    %c0_i32_0 = arith.constant 0 : i32
    %c0_i32_1 = arith.constant 0 : i32
    return %c0_i32, %c0_i32_0 : i32, i32
  }
}

</mosaic_0001>

<bundles_post_ra>
// kernel: _lambda_.5
= control target key start
LH: loop header
LB: loop body
LE: loop exit
PB: predicated region body
PF: predicated region fallthrough
CT: control target
= control target key end

     0   :  { %s3092_s9 = smov 0   ;;  %s3682_s0 = inlined_call_operand.vmem [shape: bf16[2,17,17,4], index: 0, kind: input, shape index: {}]   ;;  %s3683_s1 = inlined_call_operand.vmem [shape: bf16[4,4,8], index: 1, kind: input, shape index: {}]   ;;  %s3684_s2 = inlined_call_operand.vmem [shape: bf16[2,256,8], index: 2, kind: output, shape index: {}]  }
   0x1 LB: > { %s2534_s10 = sadd.s32 4294967295, %s3075_s9   ;;  %p2538_p0 = scmp.ge.s32.totalorder %s3075_s9, 1  ;;  %s3075_s9 = sphi %s3092_s9, %s12_s9  }
   0x2   : > { %p112_p1 = scmp.lt.s32.totalorder %s3075_s9, 3 }
   0x4   : > { %p113_p2 = pnand %p2538_p0, %p112_p1 }
   0x6   : > { %116 = sbr.rel (%p113_p2) target bundleno = 371 (0x173), region = 28 }
   0xb   : > { %v177_v0 = vld [vmem:[%s3683_s1] sm:$0x3]  ;;  %vm680_vm0 = vcmask 1041408   ;;  %v2542_v1 = vld [vmem:[%s3683_s1 + $0x2] sm:$0x3]  ;;  %p134_p3 = scmp.lt.s32.totalorder %s2534_s10, 1 }
   0xc   : > { %3025 = vmatprep.subr.msk.bf16.mxu1 %vm680_vm0, %v177_v0  ;;  %v974_v2 = vsel %vm680_vm0, %v177_v0, 0  ;;  %3024 = vmatprep.subr.msk.bf16.mxu0 %vm680_vm0, %v2542_v1  ;;  %v682_v3 = vsel %vm680_vm0, %v2542_v1, 0  ;;  %v2639_v4 = vld [vmem:[%s3683_s1 + $0x4] sm:$0x3]  ;;  %v2720_v5 = vld [vmem:[%s3683_s1 + $0x6] sm:$0x3] }
   0xd   : > { %2923 = vmatpush3.bf16.msra.mxu1 %v974_v2  ;;  %s3700_s10 = smov (!%p134_p3, %s2534_s10), 1  ;;  %2889 = vmatpush3.bf16.msra.mxu0 %v682_v3  ;;  %vm631_vm1 = vcmask 31744   ;;  %vm194_vm2 = vsmask.f32 3328  ;;  %vm195_vm3 = vsmask.f32 7440 }
   0xe   : > { %3026 = vmatprep.subr.msk.bf16.mxu0 %vm680_vm0, %v2639_v4  ;;  %s3028_s19 = smul.u32 204, %s3700_s10  ;;  %3027 = vmatprep.subr.msk.bf16.mxu1 %vm680_vm0, %v2720_v5  ;;  %v3127_v6 = vsel %vm680_vm0, %v2639_v4, 0  ;;  %v2027_v7 = vsel %vm680_vm0, %v2720_v5, 0  ;;  %vm3140_vm4 = vmor %vm194_vm2, %vm195_vm3  ;;  %s2787_s23 = sshll.u32 %s3700_s10, 7  ;;  %vm2446_vm6 = vcmask 60416  }
   0xf   : > { %s3567_s26 = scalar_lea.vmem %s3684_s2, %s2787_s23 }
  0x10   : > { %s3124_s22 = scalar_lea.vmem %s3682_s0, %s3028_s19 }
  0x11   : > { %v145_v8 = vld [vmem:[%s3124_s22] sm:$0xf]  ;;  %v146_v9 = vld [vmem:[%s3124_s22 + $0x4] sm:$0xf]  ;;  %v147_v10 = vld [vmem:[%s3124_s22 + $0xc] sm:$0xf] }
  0x12   : > { %v198_v11 = vshrl.u32 %v145_v8, 16  ;;  %v201_v12 = vshll.u32 %v145_v8, 16  ;;  %v207_v13 = vshll.u32 %v146_v9, 16  ;;  %v211_v14 = vshrl.u32 %v146_v9, 16  ;;  %v148_v15 = vld [vmem:[%s3124_s22 + $0x10] sm:$0xf] }
  0x13   : > { %v2575_v16 = vcombine.low %v145_v8, %v146_v9  ;;  %v222_v17 = vshrl.u32 %v147_v10, 16  ;;  %v225_v18 = vshll.u32 %v147_v10, 16  ;;  %v231_v19 = vshll.u32 %v148_v15, 16  ;;  %v178_v20 = vld [vmem:[%s3124_s22 + $0x8] sm:$0x1] }
  0x14   : > { %v200_v21 = vrot.slane %v198_v11, 4  ;;  %v203_v22 = vrot.slane %v201_v12, 5  ;;  %v209_v23 = vrot.slane %v207_v13, 5  ;;  %v213_v24 = vrot.slane %v211_v14, 4  ;;  %v179_v25 = vld [vmem:[%s3124_s22 + $0x14] sm:$0x1] }
  0x15   : > { %2924 = vmatprep.mubr.msk.bf16.mxu1 %vm631_vm1, %v2575_v16  ;;  %v224_v26 = vrot.slane %v222_v17, 4  ;;  %v227_v27 = vrot.slane %v225_v18, 5  ;;  %v233_v28 = vrot.slane %v231_v19, 5  ;;  %v235_v29 = vshrl.u32 %v148_v15, 16  ;;  %v149_v30 = vld [vmem:[%s3124_s22 + $0x18] sm:$0xf] }
  0x16   : > { %v2576_v31 = vcombine.low %v147_v10, %v148_v15  ;;  %v204_v32 = vor.u32 %v203_v22, %v200_v21  ;;  %v214_v33 = vor.u32 %v213_v24, %v209_v23  ;;  %v217_v34 = vshll.u32 %v178_v20, 16  ;;  %v150_v39 = vld [vmem:[%s3124_s22 + $0x1c] sm:$0xf]  ;;  %v151_v49 = vld [vmem:[%s3124_s22 + $0x24] sm:$0xf] }
  0x17   : > { %v237_v35 = vrot.slane %v235_v29, 4  ;;  %v228_v37 = vor.u32 %v227_v27, %v224_v26  ;;  %v241_v38 = vshll.u32 %v179_v25, 16  ;;  %v246_v40 = vshrl.u32 %v149_v30, 16  ;;  %v152_v54 = vld [vmem:[%s3124_s22 + $0x28] sm:$0xf] }
  0x18   : > { %2925 = vmatmul.mubr.msk.bf16.vlgmr.msra.gmra.mxu1 %vm631_vm1, %v2576_v31  ;;  %v205_v41 = vrot.slane %v204_v32, 4  ;;  %v215_v42 = vrot.slane %v214_v33, 4  ;;  %v219_v43 = vrot.slane %v217_v34, 5  ;;  %v249_v44 = vshll.u32 %v149_v30, 16  ;;  %v180_v59 = vld [vmem:[%s3124_s22 + $0x20] sm:$0x1] }
  0x19   : > { %v229_v45 = vrot.slane %v228_v37, 4  ;;  %v238_v46 = vor.u32 %v237_v35, %v233_v28  ;;  %v243_v47 = vrot.slane %v241_v38, 5  ;;  %2991 = vmatpush3.bf16.msra.mxu1 %v2027_v7  ;;  %v248_v48 = vrot.slane %v246_v40, 4  ;;  %v181_v0 = vld [vmem:[%s3124_s22 + $0x2c] sm:$0x1] }
  0x1a   : > { %v210_v50 = vsel %vm3140_vm4, %v205_v41, %v209_v23  ;;  %v220_v51 = vsel %vm3140_vm4, %v215_v42, %v219_v43  ;;  %v251_v52 = vrot.slane %v249_v44, 5  ;;  %v255_v53 = vshll.u32 %v150_v39, 16  ;;  %v153_v5 = vld [vmem:[%s3124_s22 + $0x30] sm:$0xf]  ;;  %v154_v18 = vld [vmem:[%s3124_s22 + $0x34] sm:$0xf] }
  0x1b   : > { %v2543_v55 = vcombine.low %v210_v50, %v220_v51  ;;  %v234_v56 = vsel %vm3140_vm4, %v229_v45, %v233_v28  ;;  %v239_v57 = vrot.slane %v238_v46, 4  ;;  %v259_v58 = vshrl.u32 %v150_v39, 16  ;;  %v155_v28 = vld [vmem:[%s3124_s22 + $0x3c] sm:$0xf]  ;;  %v156_v33 = vld [vmem:[%s3124_s22 + $0x40] sm:$0xf] }
  0x1c   : > { %v257_v60 = vrot.slane %v255_v53, 5  ;;  %v2577_v61 = vcombine.low %v149_v30, %v150_v39  ;;  %v270_v62 = vshrl.u32 %v151_v49, 16  ;;  %v273_v63 = vshll.u32 %v151_v49, 16  ;;  %v182_v42 = vld [vmem:[%s3124_s22 + $0x38] sm:$0x1] }
  0x1d   : > { %2890 = vmatprep.mubr.msk.bf16.mxu0 %vm631_vm1, %v2543_v55  ;;  %v244_v1 = vsel %vm3140_vm4, %v239_v57, %v243_v47  ;;  %v261_v2 = vrot.slane %v259_v58, 4  ;;  %v279_v3 = vshll.u32 %v152_v54, 16  ;;  %v283_v4 = vshrl.u32 %v152_v54, 16  ;;  %v183_v43 = vld [vmem:[%s3124_s22 + $0x44] sm:$0x1] }
  0x1e   : > { %v2544_v7 = vcombine.low %v234_v56, %v244_v1  ;;  %2928 = vmatprep.mubr.msk.bf16.mxu1 %vm631_vm1, %v2577_v61  ;;  %v272_v8 = vrot.slane %v270_v62, 4  ;;  %v275_v9 = vrot.slane %v273_v63, 5  ;;  %v2578_v10 = vcombine.low %v151_v49, %v152_v54 }
  0x1f   : > { %v281_v11 = vrot.slane %v279_v3, 5  ;;  %v285_v12 = vrot.slane %v283_v4, 4  ;;  %v252_v13 = vor.u32 %v251_v52, %v248_v48  ;;  %v262_v14 = vor.u32 %v261_v2, %v257_v60  ;;  %v157_v48 = vld [vmem:[%s3124_s22 + $0x48] sm:$0xf] }
  0x20   : > { %2891 = vmatmul.mubr.msk.bf16.vlgmr.msra.gmra.mxu0 %vm631_vm1, %v2544_v7  ;;  %2929 = vmatmul.mubr.msk.bf16.gmra.mxu1 %vm631_vm1, %v2578_v10  ;;  %v265_v15 = vshll.u32 %v180_v59, 16  ;;  %v276_v16 = vor.u32 %v275_v9, %v272_v8  ;;  %v289_v17 = vshll.u32 %v181_v0, 16  ;;  %v294_v19 = vshrl.u32 %v153_v5, 16  ;;  %v159_v7 = vld [vmem:[%s3124_s22 + $0x54] sm:$0xf] }
  0x21   : > { %2957 = vmatpush3.bf16.msra.mxu0 %v3127_v6  ;;  %v253_v20 = vrot.slane %v252_v13, 4  ;;  %v263_v21 = vrot.slane %v262_v14, 4  ;;  %v286_v22 = vor.u32 %v285_v12, %v281_v11  ;;  %v297_v23 = vshll.u32 %v153_v5, 16  ;;  %v160_v12 = vld [vmem:[%s3124_s22 + $0x58] sm:$0xf] }
  0x22   : > { %v267_v24 = vrot.slane %v265_v15, 5  ;;  %v277_v25 = vrot.slane %v276_v16, 4  ;;  %v291_v26 = vrot.slane %v289_v17, 5  ;;  %v296_v27 = vrot.slane %v294_v19, 4  ;;  %v184_v17 = vld [vmem:[%s3124_s22 + $0x50] sm:$0x1] }
  0x23   : > { %v258_v29 = vsel %vm3140_vm4, %v253_v20, %v257_v60  ;;  %v287_v30 = vrot.slane %v286_v22, 4  ;;  %v299_v31 = vrot.slane %v297_v23, 5  ;;  %v303_v32 = vshll.u32 %v154_v18, 16  ;;  %v158_v60 = vld [vmem:[%s3124_s22 + $0x4c] sm:$0xf] }
  0x24   : > { %v268_v6 = vsel %vm3140_vm4, %v263_v21, %v267_v24  ;;  %v282_v34 = vsel %vm3140_vm4, %v277_v25, %v281_v11  ;;  %v307_v35 = vshrl.u32 %v154_v18, 16  ;;  %v2579_v37 = vcombine.low %v153_v5, %v154_v18  ;;  %v185_v22 = vld [vmem:[%s3124_s22 + $0x5c] sm:$0x1] }
  0x25   : > { %v2545_v38 = vcombine.low %v258_v29, %v268_v6  ;;  %v292_v39 = vsel %vm3140_vm4, %v287_v30, %v291_v26  ;;  %v305_v40 = vrot.slane %v303_v32, 5  ;;  %v318_v41 = vshrl.u32 %v155_v28, 16 }
  0x26   : > { %v2546_v44 = vcombine.low %v282_v34, %v292_v39  ;;  %v309_v45 = vrot.slane %v307_v35, 4  ;;  %2932 = vmatprep.mubr.msk.bf16.mxu1 %vm631_vm1, %v2579_v37  ;;  %v321_v46 = vshll.u32 %v155_v28, 16  ;;  %v327_v47 = vshll.u32 %v156_v33, 16  ;;  %v162_v39 = vld [vmem:[%s3124_s22 + $0x64] sm:$0xf] }
  0x27   : > { %2894 = vmatprep.mubr.msk.bf16.mxu0 %vm631_vm1, %v2545_v38  ;;  %v320_v49 = vrot.slane %v318_v41, 4  ;;  %v331_v50 = vshrl.u32 %v156_v33, 16  ;;  %v2580_v51 = vcombine.low %v155_v28, %v156_v33  ;;  %v300_v52 = vor.u32 %v299_v31, %v296_v27  ;;  %v161_v27 = vld [vmem:[%s3124_s22 + $0x60] sm:$0xf] }
  0x28   : > { %2895 = vmatmul.mubr.msk.bf16.gmra.mxu0 %vm631_vm1, %v2546_v44  ;;  %v323_v53 = vrot.slane %v321_v46, 5  ;;  %v329_v54 = vrot.slane %v327_v47, 5  ;;  %v310_v55 = vor.u32 %v309_v45, %v305_v40  ;;  %v313_v56 = vshll.u32 %v182_v42, 16 }
  0x29   : > { %v333_v57 = vrot.slane %v331_v50, 4  ;;  %2933 = vmatmul.mubr.msk.bf16.gmra.mxu1 %vm631_vm1, %v2580_v51  ;;  %v301_v58 = vrot.slane %v300_v52, 4  ;;  %v337_v59 = vshll.u32 %v183_v43, 16  ;;  %v342_v61 = vshrl.u32 %v157_v48, 16 }
  0x2a   : > { %v311_v62 = vrot.slane %v310_v55, 4  ;;  %v315_v63 = vrot.slane %v313_v56, 5  ;;  %v324_v0 = vor.u32 %v323_v53, %v320_v49  ;;  %v345_v1 = vshll.u32 %v157_v48, 16  ;;  %v163_v49 = vld [vmem:[%s3124_s22 + $0x6c] sm:$0xf] }
  0x2b   : > { %v306_v2 = vsel %vm3140_vm4, %v301_v58, %v305_v40  ;;  %v334_v3 = vor.u32 %v333_v57, %v329_v54  ;;  %v339_v4 = vrot.slane %v337_v59, 5  ;;  %v344_v5 = vrot.slane %v342_v61, 4  ;;  %v186_v59 = vld [vmem:[%s3124_s22 + $0x68] sm:$0x1] }
  0x2c   : > { %v316_v8 = vsel %vm3140_vm4, %v311_v62, %v315_v63  ;;  %v325_v9 = vrot.slane %v324_v0, 4  ;;  %v347_v10 = vrot.slane %v345_v1, 5  ;;  %v351_v11 = vshll.u32 %v158_v60, 16  ;;  %v165_v1 = vld [vmem:[%s3124_s22 + $0x78] sm:$0xf] }
  0x2d   : > { %v2547_v13 = vcombine.low %v306_v2, %v316_v8  ;;  %v335_v14 = vrot.slane %v334_v3, 4  ;;  %v355_v15 = vshrl.u32 %v158_v60, 16  ;;  %v2581_v16 = vcombine.low %v157_v48, %v158_v60  ;;  %v187_v60 = vld [vmem:[%s3124_s22 + $0x74] sm:$0x1] }
  0x2e   : > { %v330_v18 = vsel %vm3140_vm4, %v325_v9, %v329_v54  ;;  %v353_v19 = vrot.slane %v351_v11, 5  ;;  %v366_v20 = vshrl.u32 %v159_v7, 16  ;;  %v369_v21 = vshll.u32 %v159_v7, 16  ;;  %v164_v54 = vld [vmem:[%s3124_s22 + $0x70] sm:$0xf] }
  0x2f   : > { %2898 = vmatprep.mubr.msk.bf16.mxu0 %vm631_vm1, %v2547_v13  ;;  %v340_v23 = vsel %vm3140_vm4, %v335_v14, %v339_v4  ;;  %v357_v24 = vrot.slane %v355_v15, 4  ;;  %2936 = vmatprep.mubr.msk.bf16.mxu1 %vm631_vm1, %v2581_v16  ;;  %v375_v25 = vshll.u32 %v160_v12, 16  ;;  %v379_v26 = vshrl.u32 %v160_v12, 16 }
  0x30   : > { %v2548_v28 = vcombine.low %v330_v18, %v340_v23  ;;  %v368_v29 = vrot.slane %v366_v20, 4  ;;  %v371_v30 = vrot.slane %v369_v21, 5  ;;  %v2582_v31 = vcombine.low %v159_v7, %v160_v12  ;;  %v166_v18 = vld [vmem:[%s3124_s22 + $0x7c] sm:$0xf] }
  0x31   : > { %v377_v32 = vrot.slane %v375_v25, 5  ;;  %v381_v33 = vrot.slane %v379_v26, 4  ;;  %v348_v6 = vor.u32 %v347_v10, %v344_v5  ;;  %v358_v34 = vor.u32 %v357_v24, %v353_v19 }
  0x32   : > { %2899 = vmatmul.mubr.msk.bf16.gmra.mxu0 %vm631_vm1, %v2548_v28  ;;  %2937 = vmatmul.mubr.msk.bf16.gmra.mxu1 %vm631_vm1, %v2582_v31  ;;  %v361_v35 = vshll.u32 %v184_v17, 16  ;;  %v372_v37 = vor.u32 %v371_v30, %v368_v29  ;;  %v385_v38 = vshll.u32 %v185_v22, 16  ;;  %v390_v40 = vshrl.u32 %v161_v27, 16  ;;  %v167_v28 = vld [vmem:[%s3124_s22 + $0x84] sm:$0xf] }
  0x33   : > { %v349_v41 = vrot.slane %v348_v6, 4  ;;  %v359_v42 = vrot.slane %v358_v34, 4  ;;  %v382_v43 = vor.u32 %v381_v33, %v377_v32  ;;  %v393_v44 = vshll.u32 %v161_v27, 16  ;;  %v168_v33 = vld [vmem:[%s3124_s22 + $0x88] sm:$0xf] }
  0x34   : > { %v363_v45 = vrot.slane %v361_v35, 5  ;;  %v373_v46 = vrot.slane %v372_v37, 4  ;;  %v387_v47 = vrot.slane %v385_v38, 5  ;;  %v392_v48 = vrot.slane %v390_v40, 4  ;;  %v188_v38 = vld [vmem:[%s3124_s22 + $0x80] sm:$0x1] }
  0x35   : > { %v354_v50 = vsel %vm3140_vm4, %v349_v41, %v353_v19  ;;  %v383_v51 = vrot.slane %v382_v43, 4  ;;  %v395_v52 = vrot.slane %v393_v44, 5  ;;  %v399_v53 = vshll.u32 %v162_v39, 16  ;;  %v169_v40 = vld [vmem:[%s3124_s22 + $0x90] sm:$0xf] }
  0x36   : > { %v364_v55 = vsel %vm3140_vm4, %v359_v42, %v363_v45  ;;  %v378_v56 = vsel %vm3140_vm4, %v373_v46, %v377_v32  ;;  %v403_v57 = vshrl.u32 %v162_v39, 16  ;;  %v2583_v58 = vcombine.low %v161_v27, %v162_v39  ;;  %v189_v39 = vld [vmem:[%s3124_s22 + $0x8c] sm:$0x1] }
  0x37   : > { %v2549_v61 = vcombine.low %v354_v50, %v364_v55  ;;  %v388_v62 = vsel %vm3140_vm4, %v383_v51, %v387_v47  ;;  %v401_v63 = vrot.slane %v399_v53, 5  ;;  %v414_v0 = vshrl.u32 %v163_v49, 16 }
  0x38   : > { %v2550_v2 = vcombine.low %v378_v56, %v388_v62  ;;  %v405_v3 = vrot.slane %v403_v57, 4  ;;  %2940 = vmatprep.mubr.msk.bf16.mxu1 %vm631_vm1, %v2583_v58  ;;  %v417_v4 = vshll.u32 %v163_v49, 16  ;;  %v423_v5 = vshll.u32 %v164_v54, 16  ;;  %v170_v57 = vld [vmem:[%s3124_s22 + $0x94] sm:$0xf] }
  0x39   : > { %2902 = vmatprep.mubr.msk.bf16.mxu0 %vm631_vm1, %v2549_v61  ;;  %v416_v7 = vrot.slane %v414_v0, 4  ;;  %v427_v8 = vshrl.u32 %v164_v54, 16  ;;  %v2584_v9 = vcombine.low %v163_v49, %v164_v54  ;;  %v396_v10 = vor.u32 %v395_v52, %v392_v48  ;;  %v171_v62 = vld [vmem:[%s3124_s22 + $0x9c] sm:$0xf] }
  0x3a   : > { %2903 = vmatmul.mubr.msk.bf16.gmra.mxu0 %vm631_vm1, %v2550_v2  ;;  %v419_v11 = vrot.slane %v417_v4, 5  ;;  %v425_v12 = vrot.slane %v423_v5, 5  ;;  %v406_v13 = vor.u32 %v405_v3, %v401_v63  ;;  %v409_v14 = vshll.u32 %v186_v59, 16  ;;  %v172_v3 = vld [vmem:[%s3124_s22 + $0xa0] sm:$0xf] }
  0x3b   : > { %v429_v15 = vrot.slane %v427_v8, 4  ;;  %2941 = vmatmul.mubr.msk.bf16.gmra.mxu1 %vm631_vm1, %v2584_v9  ;;  %v397_v16 = vrot.slane %v396_v10, 4  ;;  %v433_v17 = vshll.u32 %v187_v60, 16  ;;  %v438_v19 = vshrl.u32 %v165_v1, 16 }
  0x3c   : > { %v407_v20 = vrot.slane %v406_v13, 4  ;;  %v411_v21 = vrot.slane %v409_v14, 5  ;;  %v420_v22 = vor.u32 %v419_v11, %v416_v7  ;;  %v441_v23 = vshll.u32 %v165_v1, 16 }
  0x3d   : > { %v402_v24 = vsel %vm3140_vm4, %v397_v16, %v401_v63  ;;  %v430_v25 = vor.u32 %v429_v15, %v425_v12  ;;  %v435_v26 = vrot.slane %v433_v17, 5  ;;  %v440_v27 = vrot.slane %v438_v19, 4 }
  0x3e   : > { %v412_v29 = vsel %vm3140_vm4, %v407_v20, %v411_v21  ;;  %v421_v30 = vrot.slane %v420_v22, 4  ;;  %v443_v31 = vrot.slane %v441_v23, 5  ;;  %v447_v32 = vshll.u32 %v166_v18, 16  ;;  %v190_v21 = vld [vmem:[%s3124_s22 + $0x98] sm:$0x1] }
  0x3f   : > { %v2551_v6 = vcombine.low %v402_v24, %v412_v29  ;;  %v431_v34 = vrot.slane %v430_v25, 4  ;;  %v451_v35 = vshrl.u32 %v166_v18, 16  ;;  %v2585_v37 = vcombine.low %v165_v1, %v166_v18  ;;  %v191_v22 = vld [vmem:[%s3124_s22 + $0xa4] sm:$0x1] }
  0x40   : > { %v426_v41 = vsel %vm3140_vm4, %v421_v30, %v425_v12  ;;  %v449_v42 = vrot.slane %v447_v32, 5  ;;  %v462_v43 = vshrl.u32 %v167_v28, 16  ;;  %v465_v44 = vshll.u32 %v167_v28, 16 }
  0x41   : > { %2906 = vmatprep.mubr.msk.bf16.mxu0 %vm631_vm1, %v2551_v6  ;;  %v436_v45 = vsel %vm3140_vm4, %v431_v34, %v435_v26  ;;  %v453_v46 = vrot.slane %v451_v35, 4  ;;  %2944 = vmatprep.mubr.msk.bf16.mxu1 %vm631_vm1, %v2585_v37  ;;  %v471_v47 = vshll.u32 %v168_v33, 16  ;;  %v475_v48 = vshrl.u32 %v168_v33, 16  ;;  %v174_v35 = vld [vmem:[%s3124_s22 + $0xac] sm:$0xf] }
  0x42   : > { %v2552_v49 = vcombine.low %v426_v41, %v436_v45  ;;  %v464_v50 = vrot.slane %v462_v43, 4  ;;  %v467_v51 = vrot.slane %v465_v44, 5  ;;  %v2586_v52 = vcombine.low %v167_v28, %v168_v33  ;;  %v175_v41 = vld [vmem:[%s3124_s22 + $0xb4] sm:$0xf] }
  0x43   : > { %v473_v53 = vrot.slane %v471_v47, 5  ;;  %v477_v54 = vrot.slane %v475_v48, 4  ;;  %v444_v55 = vor.u32 %v443_v31, %v440_v27  ;;  %v454_v56 = vor.u32 %v453_v46, %v449_v42  ;;  %v173_v27 = vld [vmem:[%s3124_s22 + $0xa8] sm:$0xf] }
  0x44   : > { %2907 = vmatmul.mubr.msk.bf16.gmra.mxu0 %vm631_vm1, %v2552_v49  ;;  %2945 = vmatmul.mubr.msk.bf16.gmra.mxu1 %vm631_vm1, %v2586_v52  ;;  %v457_v58 = vshll.u32 %v188_v38, 16  ;;  %v468_v59 = vor.u32 %v467_v51, %v464_v50  ;;  %v481_v60 = vshll.u32 %v189_v39, 16  ;;  %v486_v61 = vshrl.u32 %v169_v40, 16 }
  0x45   : > { %v445_v63 = vrot.slane %v444_v55, 4  ;;  %v455_v0 = vrot.slane %v454_v56, 4  ;;  %v478_v1 = vor.u32 %v477_v54, %v473_v53  ;;  %v489_v2 = vshll.u32 %v169_v40, 16  ;;  %v176_v54 = vld [vmem:[%s3124_s22 + $0xb8] sm:$0xf] }
  0x46   : > { %v459_v4 = vrot.slane %v457_v58, 5  ;;  %v469_v5 = vrot.slane %v468_v59, 4  ;;  %v483_v7 = vrot.slane %v481_v60, 5  ;;  %v488_v8 = vrot.slane %v486_v61, 4  ;;  %v192_v59 = vld [vmem:[%s3124_s22 + $0xb0] sm:$0x1] }
  0x47   : > { %v450_v9 = vsel %vm3140_vm4, %v445_v63, %v449_v42  ;;  %v479_v10 = vrot.slane %v478_v1, 4  ;;  %v491_v11 = vrot.slane %v489_v2, 5  ;;  %v495_v12 = vshll.u32 %v170_v57, 16 }
  0x48   : > { %v460_v13 = vsel %vm3140_vm4, %v455_v0, %v459_v4  ;;  %v474_v14 = vsel %vm3140_vm4, %v469_v5, %v473_v53  ;;  %v499_v15 = vshrl.u32 %v170_v57, 16  ;;  %v2587_v16 = vcombine.low %v169_v40, %v170_v57  ;;  %v193_v0 = vld [vmem:[%s3124_s22 + $0xbc] sm:$0x1]  ;;  %v2672_v5 = vld [vmem:[%s3124_s22 + $0xc] sm:$0xf] }
  0x49   : > { %v2553_v17 = vcombine.low %v450_v9, %v460_v13  ;;  %v484_v18 = vsel %vm3140_vm4, %v479_v10, %v483_v7  ;;  %v497_v19 = vrot.slane %v495_v12, 5  ;;  %v510_v20 = vshrl.u32 %v171_v62, 16 }
  0x4a   : > { %v2554_v23 = vcombine.low %v474_v14, %v484_v18  ;;  %v501_v24 = vrot.slane %v499_v15, 4  ;;  %2948 = vmatprep.mubr.msk.bf16.mxu1 %vm631_vm1, %v2587_v16  ;;  %v513_v25 = vshll.u32 %v171_v62, 16  ;;  %v519_v26 = vshll.u32 %v172_v3, 16 }
  0x4b   : > { %2910 = vmatprep.mubr.msk.bf16.mxu0 %vm631_vm1, %v2553_v17  ;;  %v512_v28 = vrot.slane %v510_v20, 4  ;;  %v523_v29 = vshrl.u32 %v172_v3, 16  ;;  %v2588_v30 = vcombine.low %v171_v62, %v172_v3  ;;  %v492_v31 = vor.u32 %v491_v11, %v488_v8  ;;  %v2673_v11 = vld [vmem:[%s3124_s22 + $0x10] sm:$0xf] }
  0x4c   : > { %2911 = vmatmul.mubr.msk.bf16.gmra.mxu0 %vm631_vm1, %v2554_v23  ;;  %v515_v32 = vrot.slane %v513_v25, 5  ;;  %v521_v33 = vrot.slane %v519_v26, 5  ;;  %v502_v6 = vor.u32 %v501_v24, %v497_v19  ;;  %v505_v34 = vshll.u32 %v190_v21, 16  ;;  %v2674_v23 = vld [vmem:[%s3124_s22 + $0x14] sm:$0x1] }
  0x4d   : > { %v525_v37 = vrot.slane %v523_v29, 4  ;;  %2949 = vmatmul.mubr.msk.bf16.gmra.mxu1 %vm631_vm1, %v2588_v30  ;;  %v493_v38 = vrot.slane %v492_v31, 4  ;;  %v529_v39 = vshll.u32 %v191_v22, 16  ;;  %v534_v40 = vshrl.u32 %v173_v27, 16 }
  0x4e   : > { %v503_v42 = vrot.slane %v502_v6, 4  ;;  %v507_v43 = vrot.slane %v505_v34, 5  ;;  %v516_v44 = vor.u32 %v515_v32, %v512_v28  ;;  %v537_v45 = vshll.u32 %v173_v27, 16 }
  0x4f   : > { %v498_v46 = vsel %vm3140_vm4, %v493_v38, %v497_v19  ;;  %v526_v47 = vor.u32 %v525_v37, %v521_v33  ;;  %v531_v48 = vrot.slane %v529_v39, 5  ;;  %v536_v49 = vrot.slane %v534_v40, 4  ;;  %v2676_v38 = vld [vmem:[%s3124_s22 + $0x1c] sm:$0xf]  ;;  %v2677_v39 = vld [vmem:[%s3124_s22 + $0x20] sm:$0x1] }
  0x50   : > { %v508_v50 = vsel %vm3140_vm4, %v503_v42, %v507_v43  ;;  %v517_v51 = vrot.slane %v516_v44, 4  ;;  %v539_v52 = vrot.slane %v537_v45, 5  ;;  %v543_v53 = vshll.u32 %v174_v35, 16  ;;  %v3053_v44 = vld [vmem:[%s3124_s22 + $0xc] sm:$0xff]   ;;  %v2678_v45 = vld [vmem:[%s3124_s22 + $0x24] sm:$0xf] }
  0x51   : > { %v2555_v55 = vcombine.low %v498_v46, %v508_v50  ;;  %v527_v56 = vrot.slane %v526_v47, 4  ;;  %v547_v57 = vshrl.u32 %v174_v35, 16  ;;  %v2589_v58 = vcombine.low %v173_v27, %v174_v35  ;;  %v2679_v50 = vld [vmem:[%s3124_s22 + $0x28] sm:$0xf] }
  0x52   : > { %v522_v60 = vsel %vm3140_vm4, %v517_v51, %v521_v33  ;;  %v545_v61 = vrot.slane %v543_v53, 5  ;;  %v558_v62 = vshrl.u32 %v175_v41, 16  ;;  %v561_v63 = vshll.u32 %v175_v41, 16  ;;  %v2675_v33 = vld [vmem:[%s3124_s22 + $0x18] sm:$0xf] }
  0x53   : > { %2914 = vmatprep.mubr.msk.bf16.mxu0 %vm631_vm1, %v2555_v55  ;;  %v532_v1 = vsel %vm3140_vm4, %v527_v56, %v531_v48  ;;  %v549_v2 = vrot.slane %v547_v57, 4  ;;  %2952 = vmatprep.mubr.msk.bf16.mxu1 %vm631_vm1, %v2589_v58  ;;  %v567_v3 = vshll.u32 %v176_v54, 16  ;;  %v571_v4 = vshrl.u32 %v176_v54, 16  ;;  %v2680_v55 = vld [vmem:[%s3124_s22 + $0x2c] sm:$0x1] }
  0x54   : > { %v2556_v7 = vcombine.low %v522_v60, %v532_v1  ;;  %v560_v8 = vrot.slane %v558_v62, 4  ;;  %v563_v9 = vrot.slane %v561_v63, 5  ;;  %v2590_v10 = vcombine.low %v175_v41, %v176_v54 }
  0x55   : > { %v569_v12 = vrot.slane %v567_v3, 5  ;;  %v573_v13 = vrot.slane %v571_v4, 4  ;;  %v540_v14 = vor.u32 %v539_v52, %v536_v49  ;;  %v550_v15 = vor.u32 %v549_v2, %v545_v61 }
  0x56   : > { %2915 = vmatmul.mubr.msk.bf16.gmra.mxu0 %vm631_vm1, %v2556_v7  ;;  %2953 = vmatmul.mubr.msk.bf16.gmra.mxu1 %vm631_vm1, %v2590_v10  ;;  %v553_v16 = vshll.u32 %v192_v59, 16  ;;  %v564_v17 = vor.u32 %v563_v9, %v560_v8  ;;  %v577_v18 = vshll.u32 %v193_v0, 16  ;;  %v1545_v19 = vshrl.u32 %v2672_v5, 16  ;;  %v2681_v0 = vld [vmem:[%s3124_s22 + $0x30] sm:$0xf] }
  0x57   : > { %v541_v20 = vrot.slane %v540_v14, 4  ;;  %v551_v21 = vrot.slane %v550_v15, 4  ;;  %v574_v22 = vor.u32 %v573_v13, %v569_v12  ;;  %v1548_v24 = vshll.u32 %v2672_v5, 16  ;;  %v2682_v10 = vld [vmem:[%s3124_s22 + $0x34] sm:$0xf] }
  0x58   : > { %v555_v25 = vrot.slane %v553_v16, 5  ;;  %v565_v26 = vrot.slane %v564_v17, 4  ;;  %v579_v27 = vrot.slane %v577_v18, 5  ;;  %v1547_v28 = vrot.slane %v1545_v19, 4  ;;  %v2683_v15 = vld [vmem:[%s3124_s22 + $0x38] sm:$0x1] }
  0x59   : > { %v546_v29 = vsel %vm3140_vm4, %v541_v20, %v545_v61  ;;  %v575_v30 = vrot.slane %v574_v22, 4  ;;  %v1550_v31 = vrot.slane %v1548_v24, 5  ;;  %v1554_v32 = vshll.u32 %v2673_v11, 16  ;;  %v2684_v22 = vld [vmem:[%s3124_s22 + $0x3c] sm:$0xf] }
  0x5a   : > { %v556_v6 = vsel %vm3140_vm4, %v551_v21, %v555_v25  ;;  %v570_v34 = vsel %vm3140_vm4, %v565_v26, %v569_v12  ;;  %v1558_v35 = vshrl.u32 %v2673_v11, 16  ;;  %v1564_v37 = vshll.u32 %v2674_v23, 16  ;;  %v3054_v12 = vld [vmem:[%s3124_s22 + $0x18] sm:$0xff]   ;;  %v3055_v21 = vld [vmem:[%s3124_s22 + $0x24] sm:$0xff]  }
  0x5b   : > { %v2557_v40 = vcombine.low %v546_v29, %v556_v6  ;;  %v580_v41 = vsel %vm3140_vm4, %v575_v30, %v579_v27  ;;  %v1551_v42 = vor.u32 %v1550_v31, %v1547_v28  ;;  %v1556_v43 = vrot.slane %v1554_v32, 5 }
  0x5c   : > { %v2558_v46 = vcombine.low %v570_v34, %v580_v41  ;;  %v1560_v47 = vrot.slane %v1558_v35, 4  ;;  %v1566_v48 = vrot.slane %v1564_v37, 5  ;;  %v1569_v49 = vshrl.u32 %v2675_v33, 16  ;;  %v2685_v34 = vld [vmem:[%s3124_s22 + $0x40] sm:$0xf] }
  0x5d   : > { %2918 = vmatprep.mubr.msk.bf16.mxu0 %vm631_vm1, %v2557_v40  ;;  %v1552_v51 = vrot.slane %v1551_v42, 4  ;;  %v1572_v52 = vshll.u32 %v2675_v33, 16  ;;  %v1578_v53 = vshll.u32 %v2676_v38, 16  ;;  %v1582_v54 = vshrl.u32 %v2676_v38, 16 }
  0x5e   : > { %2919 = vmatmul.mubr.msk.bf16.gmra.mxu0 %vm631_vm1, %v2558_v46  ;;  %v1561_v56 = vor.u32 %v1560_v47, %v1556_v43  ;;  %v1571_v57 = vrot.slane %v1569_v49, 4  ;;  %v1588_v58 = vshll.u32 %v2677_v39, 16  ;;  %v1593_v59 = vshrl.u32 %v2678_v45, 16  ;;  %v2687_v49 = vld [vmem:[%s3124_s22 + $0x48] sm:$0xf] }
  0x5f   : > { %v1557_v60 = vsel %vm3140_vm4, %v1552_v51, %v1556_v43  ;;  %v1574_v61 = vrot.slane %v1572_v52, 5  ;;  %v1580_v62 = vrot.slane %v1578_v53, 5  ;;  %v1584_v63 = vrot.slane %v1582_v54, 4  ;;  %2958 = vmatprep.mubr.msk.bf16.mxu0 %vm631_vm1, %v3053_v44  ;;  %v2686_v43 = vld [vmem:[%s3124_s22 + $0x44] sm:$0x1]  ;;  %v3056_v52 = vld [vmem:[%s3124_s22 + $0x30] sm:$0xff]  }
  0x60   : > { %v1562_v1 = vrot.slane %v1561_v56, 4  ;;  %v1590_v2 = vrot.slane %v1588_v58, 5  ;;  %v1595_v3 = vrot.slane %v1593_v59, 4  ;;  %v1596_v4 = vshll.u32 %v2678_v45, 16 }
  0x61   : > { %v1575_v5 = vor.u32 %v1574_v61, %v1571_v57  ;;  %v1585_v7 = vor.u32 %v1584_v63, %v1580_v62  ;;  %v1602_v8 = vshll.u32 %v2679_v50, 16  ;;  %v1606_v9 = vshrl.u32 %v2679_v50, 16  ;;  %v3057_v61 = vld [vmem:[%s3124_s22 + $0x3c] sm:$0xff]  }
  0x62   : > { %v1567_v11 = vsel %vm3140_vm4, %v1562_v1, %v1566_v48  ;;  %v1598_v13 = vrot.slane %v1596_v4, 5  ;;  %v1612_v14 = vshll.u32 %v2680_v55, 16  ;;  %v1617_v16 = vshrl.u32 %v2681_v0, 16  ;;  %v2688_v55 = vld [vmem:[%s3124_s22 + $0x4c] sm:$0xf] }
  0x63   : > { %v2721_v17 = vcombine.low %v1557_v60, %v1567_v11  ;;  %v1576_v18 = vrot.slane %v1575_v5, 4  ;;  %v1586_v19 = vrot.slane %v1585_v7, 4  ;;  %v1604_v20 = vrot.slane %v1602_v8, 5  ;;  %v2689_v60 = vld [vmem:[%s3124_s22 + $0x50] sm:$0x1] }
  0x64   : > { %v1599_v23 = vor.u32 %v1598_v13, %v1595_v3  ;;  %v1608_v24 = vrot.slane %v1606_v9, 4  ;;  %v1614_v25 = vrot.slane %v1612_v14, 5  ;;  %v1619_v26 = vrot.slane %v1617_v16, 4 }
  0x65   : > { %2992 = vmatprep.mubr.msk.bf16.mxu1 %vm631_vm1, %v2721_v17  ;;  %v1581_v27 = vsel %vm3140_vm4, %v1576_v18, %v1580_v62  ;;  %v1591_v28 = vsel %vm3140_vm4, %v1586_v19, %v1590_v2  ;;  %v1620_v29 = vshll.u32 %v2681_v0, 16  ;;  %v1626_v30 = vshll.u32 %v2682_v10, 16  ;;  %v2690_v62 = vld [vmem:[%s3124_s22 + $0x54] sm:$0xf] }
  0x66   : > { %v2722_v31 = vcombine.low %v1581_v27, %v1591_v28  ;;  %2959 = vmatmul.mubr.msk.bf16.vlgmr.msra.gmra.mxu0 %vm631_vm1, %v3054_v12  ;;  %v1600_v32 = vrot.slane %v1599_v23, 4  ;;  %v1609_v33 = vor.u32 %v1608_v24, %v1604_v20  ;;  %v1630_v6 = vshrl.u32 %v2682_v10, 16  ;;  %v2691_v12 = vld [vmem:[%s3124_s22 + $0x58] sm:$0xf] }
  0x67   : > { %v1622_v35 = vrot.slane %v1620_v29, 5  ;;  %v1628_v37 = vrot.slane %v1626_v30, 5  ;;  %v1636_v38 = vshll.u32 %v2683_v15, 16  ;;  %2962 = vmatprep.mubr.msk.bf16.mxu0 %vm631_vm1, %v3055_v21  ;;  %v1641_v39 = vshrl.u32 %v2684_v22, 16  ;;  %v3058_v29 = vld [vmem:[%s3124_s22 + $0x48] sm:$0xff]  }
  0x68   : > { %2993 = vmatmul.mubr.msk.bf16.vlgmr.msra.gmra.mxu1 %vm631_vm1, %v2722_v31  ;;  %v1605_v40 = vsel %vm3140_vm4, %v1600_v32, %v1604_v20  ;;  %v1610_v41 = vrot.slane %v1609_v33, 4  ;;  %v1632_v42 = vrot.slane %v1630_v6, 4  ;;  %v1644_v44 = vshll.u32 %v2684_v22, 16  ;;  %v2692_v20 = vld [vmem:[%s3124_s22 + $0x5c] sm:$0x1] }
  0x69   : > { %v1623_v45 = vor.u32 %v1622_v35, %v1619_v26  ;;  %v1638_v46 = vrot.slane %v1636_v38, 5  ;;  %v1643_v47 = vrot.slane %v1641_v39, 4  ;;  %v1650_v48 = vshll.u32 %v2685_v34, 16  ;;  %v2693_v26 = vld [vmem:[%s3124_s22 + $0x60] sm:$0xf] }
  0x6a   : > { %v1615_v50 = vsel %vm3140_vm4, %v1610_v41, %v1614_v25  ;;  %v1633_v51 = vor.u32 %v1632_v42, %v1628_v37  ;;  %v1646_v53 = vrot.slane %v1644_v44, 5  ;;  %v1654_v54 = vshrl.u32 %v2685_v34, 16  ;;  %v2694_v35 = vld [vmem:[%s3124_s22 + $0x64] sm:$0xf] }
  0x6b   : > { %v2723_v56 = vcombine.low %v1605_v40, %v1615_v50  ;;  %v1624_v57 = vrot.slane %v1623_v45, 4  ;;  %v1652_v58 = vrot.slane %v1650_v48, 5  ;;  %v1660_v59 = vshll.u32 %v2686_v43, 16  ;;  %v2695_v45 = vld [vmem:[%s3124_s22 + $0x68] sm:$0x1] }
  0x6c   : > { %v1634_v63 = vrot.slane %v1633_v51, 4  ;;  %v1647_v0 = vor.u32 %v1646_v53, %v1643_v47  ;;  %v1656_v1 = vrot.slane %v1654_v54, 4  ;;  %v1665_v2 = vshrl.u32 %v2687_v49, 16  ;;  %v2696_v51 = vld [vmem:[%s3124_s22 + $0x6c] sm:$0xf] }
  0x6d   : > { %2996 = vmatprep.mubr.msk.bf16.mxu1 %vm631_vm1, %v2723_v56  ;;  %v1629_v3 = vsel %vm3140_vm4, %v1624_v57, %v1628_v37  ;;  %v1662_v4 = vrot.slane %v1660_v59, 5  ;;  %v1668_v5 = vshll.u32 %v2687_v49, 16  ;;  %v1674_v7 = vshll.u32 %v2688_v55, 16  ;;  %v3059_v37 = vld [vmem:[%s3124_s22 + $0x54] sm:$0xff]   ;;  %v2697_v56 = vld [vmem:[%s3124_s22 + $0x70] sm:$0xf] }
  0x6e   : > { %v1639_v8 = vsel %vm3140_vm4, %v1634_v63, %v1638_v46  ;;  %2963 = vmatmul.mubr.msk.bf16.gmra.mxu0 %vm631_vm1, %v3056_v52  ;;  %v1648_v9 = vrot.slane %v1647_v0, 4  ;;  %v1657_v10 = vor.u32 %v1656_v1, %v1652_v58  ;;  %v1667_v11 = vrot.slane %v1665_v2, 4  ;;  %v2698_v0 = vld [vmem:[%s3124_s22 + $0x74] sm:$0x1] }
  0x6f   : > { %v2724_v13 = vcombine.low %v1629_v3, %v1639_v8  ;;  %v1670_v14 = vrot.slane %v1668_v5, 5  ;;  %v1676_v15 = vrot.slane %v1674_v7, 5  ;;  %v1678_v16 = vshrl.u32 %v2688_v55, 16  ;;  %2966 = vmatprep.mubr.msk.bf16.mxu0 %vm631_vm1, %v3057_v61  ;;  %v2699_v8 = vld [vmem:[%s3124_s22 + $0x78] sm:$0xf] }
  0x70   : > { %v1653_v17 = vsel %vm3140_vm4, %v1648_v9, %v1652_v58  ;;  %v1658_v18 = vrot.slane %v1657_v10, 4  ;;  %v1684_v19 = vshll.u32 %v2689_v60, 16  ;;  %v1689_v21 = vshrl.u32 %v2690_v62, 16 }
  0x71   : > { %2997 = vmatmul.mubr.msk.bf16.gmra.mxu1 %vm631_vm1, %v2724_v13  ;;  %v1671_v22 = vor.u32 %v1670_v14, %v1667_v11  ;;  %v1680_v23 = vrot.slane %v1678_v16, 4  ;;  %v1692_v24 = vshll.u32 %v2690_v62, 16  ;;  %v1698_v25 = vshll.u32 %v2691_v12, 16  ;;  %v2700_v13 = vld [vmem:[%s3124_s22 + $0x7c] sm:$0xf]  ;;  %v3061_v14 = vld [vmem:[%s3124_s22 + $0x6c] sm:$0xff]  }
  0x72   : > { %v1663_v27 = vsel %vm3140_vm4, %v1658_v18, %v1662_v4  ;;  %v1686_v28 = vrot.slane %v1684_v19, 5  ;;  %v1691_v30 = vrot.slane %v1689_v21, 4  ;;  %v1702_v31 = vshrl.u32 %v2691_v12, 16  ;;  %v3060_v4 = vld [vmem:[%s3124_s22 + $0x60] sm:$0xff]  }
  0x73   : > { %v2725_v32 = vcombine.low %v1653_v17, %v1663_v27  ;;  %v1672_v33 = vrot.slane %v1671_v22, 4  ;;  %v1681_v6 = vor.u32 %v1680_v23, %v1676_v15  ;;  %v1694_v34 = vrot.slane %v1692_v24, 5  ;;  %v2701_v21 = vld [vmem:[%s3124_s22 + $0x80] sm:$0x1] }
  0x74   : > { %v1700_v38 = vrot.slane %v1698_v25, 5  ;;  %v1704_v39 = vrot.slane %v1702_v31, 4  ;;  %v1708_v40 = vshll.u32 %v2692_v20, 16  ;;  %v1713_v41 = vshrl.u32 %v2693_v26, 16 }
  0x75   : > { %3000 = vmatprep.mubr.msk.bf16.mxu1 %vm631_vm1, %v2725_v32  ;;  %v1677_v42 = vsel %vm3140_vm4, %v1672_v33, %v1676_v15  ;;  %v1682_v43 = vrot.slane %v1681_v6, 4  ;;  %v1695_v44 = vor.u32 %v1694_v34, %v1691_v30  ;;  %v1716_v46 = vshll.u32 %v2693_v26, 16  ;;  %v2703_v33 = vld [vmem:[%s3124_s22 + $0x88] sm:$0xf] }
  0x76   : > { %2967 = vmatmul.mubr.msk.bf16.gmra.mxu0 %vm631_vm1, %v3058_v29  ;;  %v1705_v47 = vor.u32 %v1704_v39, %v1700_v38  ;;  %v1710_v48 = vrot.slane %v1708_v40, 5  ;;  %v1715_v49 = vrot.slane %v1713_v41, 4  ;;  %v1722_v50 = vshll.u32 %v2694_v35, 16 }
  0x77   : > { %v1687_v52 = vsel %vm3140_vm4, %v1682_v43, %v1686_v28  ;;  %v1696_v53 = vrot.slane %v1695_v44, 4  ;;  %v1718_v54 = vrot.slane %v1716_v46, 5  ;;  %v1726_v55 = vshrl.u32 %v2694_v35, 16  ;;  %2970 = vmatprep.mubr.msk.bf16.mxu0 %vm631_vm1, %v3059_v37  ;;  %v2702_v28 = vld [vmem:[%s3124_s22 + $0x84] sm:$0xf]  ;;  %v3062_v44 = vld [vmem:[%s3124_s22 + $0x78] sm:$0xff]  }
  0x78   : > { %v2726_v57 = vcombine.low %v1677_v42, %v1687_v52  ;;  %v1706_v58 = vrot.slane %v1705_v47, 4  ;;  %v1724_v59 = vrot.slane %v1722_v50, 5  ;;  %v1732_v60 = vshll.u32 %v2695_v45, 16  ;;  %v2704_v45 = vld [vmem:[%s3124_s22 + $0x8c] sm:$0x1] }
  0x79   : > { %v1701_v61 = vsel %vm3140_vm4, %v1696_v53, %v1700_v38  ;;  %v1719_v62 = vor.u32 %v1718_v54, %v1715_v49  ;;  %v1728_v63 = vrot.slane %v1726_v55, 4  ;;  %v1737_v1 = vshrl.u32 %v2696_v51, 16  ;;  %v2705_v52 = vld [vmem:[%s3124_s22 + $0x90] sm:$0xf]  ;;  %v3063_v53 = vld [vmem:[%s3124_s22 + $0x84] sm:$0xff]  }
  0x7a   : > { %3001 = vmatmul.mubr.msk.bf16.gmra.mxu1 %vm631_vm1, %v2726_v57  ;;  %v1711_v2 = vsel %vm3140_vm4, %v1706_v58, %v1710_v48  ;;  %v1734_v3 = vrot.slane %v1732_v60, 5  ;;  %v1740_v5 = vshll.u32 %v2696_v51, 16  ;;  %v1746_v7 = vshll.u32 %v2697_v56, 16  ;;  %v2706_v58 = vld [vmem:[%s3124_s22 + $0x94] sm:$0xf] }
  0x7b   : > { %v2727_v9 = vcombine.low %v1701_v61, %v1711_v2  ;;  %v1720_v10 = vrot.slane %v1719_v62, 4  ;;  %v1729_v11 = vor.u32 %v1728_v63, %v1724_v59  ;;  %v1739_v12 = vrot.slane %v1737_v1, 4  ;;  %v2707_v1 = vld [vmem:[%s3124_s22 + $0x98] sm:$0x1] }
  0x7c   : > { %v1742_v15 = vrot.slane %v1740_v5, 5  ;;  %v1748_v16 = vrot.slane %v1746_v7, 5  ;;  %v1750_v17 = vshrl.u32 %v2697_v56, 16  ;;  %v1756_v18 = vshll.u32 %v2698_v0, 16 }
  0x7d   : > { %3004 = vmatprep.mubr.msk.bf16.mxu1 %vm631_vm1, %v2727_v9  ;;  %v1725_v19 = vsel %vm3140_vm4, %v1720_v10, %v1724_v59  ;;  %v1730_v20 = vrot.slane %v1729_v11, 4  ;;  %v1761_v22 = vshrl.u32 %v2699_v8, 16  ;;  %v1764_v23 = vshll.u32 %v2699_v8, 16  ;;  %v2708_v9 = vld [vmem:[%s3124_s22 + $0x9c] sm:$0xf] }
  0x7e   : > { %2971 = vmatmul.mubr.msk.bf16.gmra.mxu0 %vm631_vm1, %v3060_v4  ;;  %v1743_v24 = vor.u32 %v1742_v15, %v1739_v12  ;;  %v1752_v25 = vrot.slane %v1750_v17, 4  ;;  %v1758_v26 = vrot.slane %v1756_v18, 5  ;;  %v1770_v27 = vshll.u32 %v2700_v13, 16 }
  0x7f   : > { %v1735_v29 = vsel %vm3140_vm4, %v1730_v20, %v1734_v3  ;;  %v1763_v30 = vrot.slane %v1761_v22, 4  ;;  %v1766_v31 = vrot.slane %v1764_v23, 5  ;;  %v1774_v32 = vshrl.u32 %v2700_v13, 16  ;;  %2974 = vmatprep.mubr.msk.bf16.mxu0 %vm631_vm1, %v3061_v14  ;;  %v2709_v14 = vld [vmem:[%s3124_s22 + $0xa0] sm:$0xf] }
  0x80   : > { %v2728_v6 = vcombine.low %v1725_v19, %v1735_v29  ;;  %v1744_v34 = vrot.slane %v1743_v24, 4  ;;  %v1753_v35 = vor.u32 %v1752_v25, %v1748_v16  ;;  %v1772_v37 = vrot.slane %v1770_v27, 5  ;;  %v3065_v24 = vld [vmem:[%s3124_s22 + $0x9c] sm:$0xff]  }
  0x81   : > { %v1767_v38 = vor.u32 %v1766_v31, %v1763_v30  ;;  %v1776_v39 = vrot.slane %v1774_v32, 4  ;;  %v1780_v40 = vshll.u32 %v2701_v21, 16  ;;  %v1785_v41 = vshrl.u32 %v2702_v28, 16  ;;  %v3064_v21 = vld [vmem:[%s3124_s22 + $0x90] sm:$0xff]   ;;  %v2711_v30 = vld [vmem:[%s3124_s22 + $0xa8] sm:$0xf] }
  0x82   : > { %3005 = vmatmul.mubr.msk.bf16.gmra.mxu1 %vm631_vm1, %v2728_v6  ;;  %v1749_v42 = vsel %vm3140_vm4, %v1744_v34, %v1748_v16  ;;  %v1754_v43 = vrot.slane %v1753_v35, 4  ;;  %v1788_v46 = vshll.u32 %v2702_v28, 16  ;;  %v1794_v47 = vshll.u32 %v2703_v33, 16  ;;  %v2710_v28 = vld [vmem:[%s3124_s22 + $0xa4] sm:$0x1] }
  0x83   : > { %v1768_v48 = vrot.slane %v1767_v38, 4  ;;  %v1777_v49 = vor.u32 %v1776_v39, %v1772_v37  ;;  %v1782_v50 = vrot.slane %v1780_v40, 5  ;;  %v1787_v51 = vrot.slane %v1785_v41, 4  ;;  %v2712_v34 = vld [vmem:[%s3124_s22 + $0xac] sm:$0xf] }
  0x84   : > { %v1759_v54 = vsel %vm3140_vm4, %v1754_v43, %v1758_v26  ;;  %v1790_v55 = vrot.slane %v1788_v46, 5  ;;  %v1796_v56 = vrot.slane %v1794_v47, 5  ;;  %v1798_v57 = vshrl.u32 %v2703_v33, 16  ;;  %v2713_v46 = vld [vmem:[%s3124_s22 + $0xb0] sm:$0x1] }
  0x85   : > { %v2729_v59 = vcombine.low %v1749_v42, %v1759_v54  ;;  %v1773_v60 = vsel %vm3140_vm4, %v1768_v48, %v1772_v37  ;;  %v1778_v61 = vrot.slane %v1777_v49, 4  ;;  %v1804_v62 = vshll.u32 %v2704_v45, 16  ;;  %v2714_v49 = vld [vmem:[%s3124_s22 + $0xb4] sm:$0xf]  ;;  %v2715_v54 = vld [vmem:[%s3124_s22 + $0xb8] sm:$0xf] }
  0x86   : > { %2975 = vmatmul.mubr.msk.bf16.gmra.mxu0 %vm631_vm1, %v3062_v44  ;;  %v1791_v63 = vor.u32 %v1790_v55, %v1787_v51  ;;  %v1800_v0 = vrot.slane %v1798_v57, 4  ;;  %v1809_v2 = vshrl.u32 %v2705_v52, 16  ;;  %v1812_v3 = vshll.u32 %v2705_v52, 16 }
  0x87   : > { %3008 = vmatprep.mubr.msk.bf16.mxu1 %vm631_vm1, %v2729_v59  ;;  %v1783_v4 = vsel %vm3140_vm4, %v1778_v61, %v1782_v50  ;;  %v1806_v5 = vrot.slane %v1804_v62, 5  ;;  %v1818_v7 = vshll.u32 %v2706_v58, 16  ;;  %v1822_v8 = vshrl.u32 %v2706_v58, 16  ;;  %2978 = vmatprep.mubr.msk.bf16.mxu0 %vm631_vm1, %v3063_v53  ;;  %v3066_v62 = vld [vmem:[%s3124_s22 + $0xa8] sm:$0xff]  }
  0x88   : > { %v2730_v10 = vcombine.low %v1773_v60, %v1783_v4  ;;  %v1792_v11 = vrot.slane %v1791_v63, 4  ;;  %v1801_v12 = vor.u32 %v1800_v0, %v1796_v56  ;;  %v1811_v13 = vrot.slane %v1809_v2, 4  ;;  %v2716_v63 = vld [vmem:[%s3124_s22 + $0xbc] sm:$0x1] }
  0x89   : > { %v1814_v15 = vrot.slane %v1812_v3, 5  ;;  %v1820_v16 = vrot.slane %v1818_v7, 5  ;;  %v1824_v17 = vrot.slane %v1822_v8, 4  ;;  %v1828_v18 = vshll.u32 %v2707_v1, 16  ;;  %v3067_v7 = vld [vmem:[%s3124_s22 + $0xb4] sm:$0xff]  }
  0x8a   : > { %3009 = vmatmul.mubr.msk.bf16.gmra.mxu1 %vm631_vm1, %v2730_v10  ;;  %v1797_v19 = vsel %vm3140_vm4, %v1792_v11, %v1796_v56  ;;  %v1802_v20 = vrot.slane %v1801_v12, 4  ;;  %v1833_v22 = vshrl.u32 %v2708_v9, 16  ;;  %v1836_v23 = vshll.u32 %v2708_v9, 16 }
  0x8b   : > { %v1815_v25 = vor.u32 %v1814_v15, %v1811_v13  ;;  %v1825_v26 = vor.u32 %v1824_v17, %v1820_v16  ;;  %v1830_v27 = vrot.slane %v1828_v18, 5  ;;  %v1842_v29 = vshll.u32 %v2709_v14, 16 }
  0x8c   : > { %v1807_v31 = vsel %vm3140_vm4, %v1802_v20, %v1806_v5  ;;  %v1835_v32 = vrot.slane %v1833_v22, 4  ;;  %v1838_v33 = vrot.slane %v1836_v23, 5  ;;  %v1846_v6 = vshrl.u32 %v2709_v14, 16  ;;  %v2717_v5 = vld [vmem:[%s3124_s22 + $0xc0] sm:$0xf] }
  0x8d   : > { %v2731_v35 = vcombine.low %v1797_v19, %v1807_v31  ;;  %v1816_v37 = vrot.slane %v1815_v25, 4  ;;  %v1826_v38 = vrot.slane %v1825_v26, 4  ;;  %v1844_v39 = vrot.slane %v1842_v29, 5 }
  0x8e   : > { %2979 = vmatmul.mubr.msk.bf16.gmra.mxu0 %vm631_vm1, %v3064_v21  ;;  %v1839_v40 = vor.u32 %v1838_v33, %v1835_v32  ;;  %v1848_v41 = vrot.slane %v1846_v6, 4  ;;  %v1852_v42 = vshll.u32 %v2710_v28, 16  ;;  %v1857_v43 = vshrl.u32 %v2711_v30, 16 }
  0x8f   : > { %3012 = vmatprep.mubr.msk.bf16.mxu1 %vm631_vm1, %v2731_v35  ;;  %v1821_v44 = vsel %vm3140_vm4, %v1816_v37, %v1820_v16  ;;  %v1831_v45 = vsel %vm3140_vm4, %v1826_v38, %v1830_v27  ;;  %v1860_v47 = vshll.u32 %v2711_v30, 16  ;;  %v1866_v48 = vshll.u32 %v2712_v34, 16  ;;  %2982 = vmatprep.mubr.msk.bf16.mxu0 %vm631_vm1, %v3065_v24  ;;  %v2718_v16 = vld [vmem:[%s3124_s22 + $0xc4] sm:$0xf]  ;;  %v2719_v24 = vld [vmem:[%s3124_s22 + $0xc8] sm:$0x1] }
  0x90   : > { %v2732_v50 = vcombine.low %v1821_v44, %v1831_v45  ;;  %v1840_v51 = vrot.slane %v1839_v40, 4  ;;  %v1849_v52 = vor.u32 %v1848_v41, %v1844_v39  ;;  %v1854_v53 = vrot.slane %v1852_v42, 5  ;;  %v3068_v38 = vld [vmem:[%s3124_s22 + $0xc0] sm:$0xff]  }
  0x91   : > { %v1859_v55 = vrot.slane %v1857_v43, 4  ;;  %v1862_v56 = vrot.slane %v1860_v47, 5  ;;  %v1868_v57 = vrot.slane %v1866_v48, 5  ;;  %v1870_v58 = vshrl.u32 %v2712_v34, 16 }
  0x92   : > { %3013 = vmatmul.mubr.msk.bf16.gmra.mxu1 %vm631_vm1, %v2732_v50  ;;  %v1845_v59 = vsel %vm3140_vm4, %v1840_v51, %v1844_v39  ;;  %v1850_v60 = vrot.slane %v1849_v52, 4  ;;  %v1876_v61 = vshll.u32 %v2713_v46, 16  ;;  %v1881_v0 = vshrl.u32 %v2714_v49, 16 }
  0x93   : > { %v1863_v1 = vor.u32 %v1862_v56, %v1859_v55  ;;  %v1872_v2 = vrot.slane %v1870_v58, 4  ;;  %v1884_v3 = vshll.u32 %v2714_v49, 16  ;;  %v1890_v4 = vshll.u32 %v2715_v54, 16 }
  0x94   : > { %v1855_v8 = vsel %vm3140_vm4, %v1850_v60, %v1854_v53  ;;  %v1878_v9 = vrot.slane %v1876_v61, 5  ;;  %v1883_v10 = vrot.slane %v1881_v0, 4  ;;  %v1894_v11 = vshrl.u32 %v2715_v54, 16 }
  0x95   : > { %v2733_v12 = vcombine.low %v1845_v59, %v1855_v8  ;;  %v1864_v13 = vrot.slane %v1863_v1, 4  ;;  %v1873_v14 = vor.u32 %v1872_v2, %v1868_v57  ;;  %v1886_v15 = vrot.slane %v1884_v3, 5 }
  0x96   : > { %2983 = vmatmul.mubr.msk.bf16.gmra.mxu0 %vm631_vm1, %v3066_v62  ;;  %v1892_v17 = vrot.slane %v1890_v4, 5  ;;  %v1896_v18 = vrot.slane %v1894_v11, 4  ;;  %v1900_v19 = vshll.u32 %v2716_v63, 16  ;;  %v1905_v20 = vshrl.u32 %v2717_v5, 16 }
  0x97   : > { %3016 = vmatprep.mubr.msk.bf16.mxu1 %vm631_vm1, %v2733_v12  ;;  %v1869_v21 = vsel %vm3140_vm4, %v1864_v13, %v1868_v57  ;;  %v1874_v22 = vrot.slane %v1873_v14, 4  ;;  %v1887_v23 = vor.u32 %v1886_v15, %v1883_v10  ;;  %v1908_v25 = vshll.u32 %v2717_v5, 16  ;;  %2986 = vmatprep.mubr.msk.bf16.mxu0 %vm631_vm1, %v3067_v7 }
  0x98   : > { %v1897_v26 = vor.u32 %v1896_v18, %v1892_v17  ;;  %v1902_v27 = vrot.slane %v1900_v19, 5  ;;  %v1907_v28 = vrot.slane %v1905_v20, 4  ;;  %v1914_v29 = vshll.u32 %v2718_v16, 16 }
  0x99   : > { %v1879_v30 = vsel %vm3140_vm4, %v1874_v22, %v1878_v9  ;;  %v1888_v31 = vrot.slane %v1887_v23, 4  ;;  %v1910_v32 = vrot.slane %v1908_v25, 5  ;;  %v1918_v33 = vshrl.u32 %v2718_v16, 16 }
  0x9a   : > { %v2734_v6 = vcombine.low %v1869_v21, %v1879_v30  ;;  %v1898_v34 = vrot.slane %v1897_v26, 4  ;;  %v1916_v35 = vrot.slane %v1914_v29, 5  ;;  %v1924_v37 = vshll.u32 %v2719_v24, 16 }
  0x9b   : > { %v1893_v39 = vsel %vm3140_vm4, %v1888_v31, %v1892_v17  ;;  %v1911_v40 = vor.u32 %v1910_v32, %v1907_v28  ;;  %v1920_v41 = vrot.slane %v1918_v33, 4 }
  0x9c   : > { %3017 = vmatmul.mubr.msk.bf16.gmra.mxu1 %vm631_vm1, %v2734_v6  ;;  %v1903_v42 = vsel %vm3140_vm4, %v1898_v34, %v1902_v27  ;;  %v1926_v46 = vrot.slane %v1924_v37, 5 }
  0x9d   : > { %v2735_v43 = vcombine.low %v1893_v39, %v1903_v42  ;;  %v1912_v44 = vrot.slane %v1911_v40, 4  ;;  %v1921_v45 = vor.u32 %v1920_v41, %v1916_v35 }
  0x9e   : > { %2987 = vmatmul.mubr.msk.bf16.gmra.mxu0 %vm631_vm1, %v3068_v38 }
  0x9f   : > { %3020 = vmatprep.mubr.msk.bf16.mxu1 %vm631_vm1, %v2735_v43  ;;  %v1917_v47 = vsel %vm3140_vm4, %v1912_v44, %v1916_v35  ;;  %v1922_v48 = vrot.slane %v1921_v45, 4 }
  0xa1   : > { %v1927_v49 = vsel %vm3140_vm4, %v1922_v48, %v1926_v46 }
  0xa2   : > { %v2736_v50 = vcombine.low %v1917_v47, %v1927_v49 }
  0xa4   : > { %3021 = vmatmul.mubr.msk.bf16.gmra.mxu1 %vm631_vm1, %v2736_v50 }
  0xd8   : > { %v3441_v51 = vpop.f32.mrf.mxu1 }
  0xda   : > { %v3443_v52 = vpop.f32.mrf.mxu1 }
  0xdc   : > { %v3445_v53 = vpop.f32.mrf.mxu1 }
  0xde   : > { %v3447_v54 = vpop.f32.mrf.mxu1 }
  0xe0   : > { %v3449_v55 = vpop.f32.mrf.mxu0  ;;  %v3451_v56 = vpop.f32.mrf.mxu1 }
  0xe2   : > { %v3453_v57 = vpop.f32.mrf.mxu0  ;;  %v3455_v58 = vpop.f32.mrf.mxu1 }
  0xe4   : > { %v3457_v36 = vpop.f32.mrf.mxu0  ;;  %v3459_v59 = vpop.f32.mrf.mxu1 }
  0xe6   : > { %v3461_v60 = vpop.f32.mrf.mxu0  ;;  %v3463_v61 = vpop.f32.mrf.mxu1 }
  0xe8   : > { %v3465_v62 = vpop.f32.mrf.mxu0 }
  0xe9   : > { %v3467_v63 = vpop.f32.mrf.mxu1 }
  0xea   : > { %v3469_v0 = vpop.f32.mrf.mxu0 }
  0xeb   : > { %v3471_v1 = vpop.f32.mrf.mxu1 }
  0xec   : > { %v3473_v2 = vpop.f32.mrf.mxu0 }
  0xed   : > { %v3475_v3 = vpop.f32.mrf.mxu1 }
  0xee   : > { %v3477_v4 = vpop.f32.mrf.mxu0 }
  0xef   : > { %v3479_v5 = vpop.f32.mrf.mxu1 }
  0xf2   : > { %v3481_v7 = vpop.f32.mrf.mxu0  ;;  %v3483_v8 = vpop.f32.mrf.mxu1 }
  0xf4   : > { %v3485_v9 = vpop.f32.mrf.mxu0  ;;  %v3487_v10 = vpop.f32.mrf.mxu1 }
  0xf6   : > { %v3489_v11 = vpop.f32.mrf.mxu0  ;;  %v3491_v12 = vpop.f32.mrf.mxu1 }
  0xf8   : > { %v3493_v13 = vpop.f32.mrf.mxu0  ;;  %v3495_v14 = vpop.f32.mrf.mxu1 }
  0xfa   : > { %v3497_v15 = vpop.f32.mrf.mxu0 }
  0xfb   : > { %v3499_v16 = vpop.f32.mrf.mxu1 }
  0xfc   : > { %v3501_v17 = vpop.f32.mrf.mxu0 }
  0xfd   : > { %v3503_v18 = vpop.f32.mrf.mxu1 }
  0xfe   : > { %v3505_v19 = vpop.f32.mrf.mxu0 }
  0xff   : > { %v3507_v20 = vpop.f32.mrf.mxu1 }
 0x100   : > { %v3509_v21 = vpop.f32.mrf.mxu0 }
 0x101   : > { %v3511_v22 = vpop.f32.mrf.mxu1 }
 0x104   : > { %v3513_v23 = vpop.f32.mrf.mxu0  ;;  %v3515_v24 = vpop.f32.mrf.mxu1 }
 0x106   : > { %v3517_v25 = vpop.f32.mrf.mxu0  ;;  %v3519_v26 = vpop.f32.mrf.mxu1 }
 0x108   : > { %v3521_v27 = vpop.f32.mrf.mxu0  ;;  %v3523_v28 = vpop.f32.mrf.mxu1 }
 0x109   : > { %3687 = vst [vmem:[#allocation2_spill] sm:$0xff] %v3523_v28 }
 0x10a   : > { %v3525_v29 = vpop.f32.mrf.mxu0  ;;  %v3527_v30 = vpop.f32.mrf.mxu1 }
 0x10b   : > { %3688 = vst [vmem:[#allocation3_spill] sm:$0xff] %v3527_v30 }
 0x10c   : > { %v3529_v31 = vpop.f32.mrf.mxu0 }
 0x10d   : > { %v2950_v32 = vpop.f32.mrf.mxu1 }
 0x10e   : > { %v3531_v33 = vpop.f32.mrf.mxu0 }
 0x10f   : > { %v1106_v6 = vpop.f32.mrf.mxu1 }
 0x110   : > { %v3533_v34 = vpop.f32.mrf.mxu0 }
 0x111   : > { %v2951_v35 = vpop.f32.mrf.mxu1 }
 0x112   : > { %v3535_v37 = vpop.f32.mrf.mxu0 }
 0x113   : > { %3689 = vst [vmem:[#allocation4_spill] sm:$0xff] %v3535_v37  ;;  %v1109_v38 = vpop.f32.mrf.mxu1 }
 0x116   : > { %v2916_v39 = vpop.f32.mrf.mxu0  ;;  %v2954_v42 = vpop.f32.mrf.mxu1 }
 0x117   : > { %v3537_v40 = vadd.f32 %v2950_v32, %v2916_v39 }
 0x118   : > { %v814_v41 = vpop.f32.mrf.mxu0  ;;  %v1122_v47 = vpop.f32.mrf.mxu1 }
 0x119   : > { %v3539_v43 = vadd.f32 %v1106_v6, %v814_v41 }
 0x11a   : > { %v2917_v44 = vpop.f32.mrf.mxu0  ;;  %v2955_v30 = vpop.f32.mrf.mxu1 }
 0x11b   : > { %v3541_v45 = vadd.f32 %v2951_v35, %v2917_v44  ;;  %v1019_v35 = vadd.f32 %v3441_v51, %v3449_v55 }
 0x11c   : > { %v817_v46 = vpop.f32.mrf.mxu0  ;;  %v1125_v6 = vpop.f32.mrf.mxu1 }
 0x11d   : > { %v3543_v48 = vadd.f32 %v1109_v38, %v817_v46 }
 0x11e   : > { %v2920_v49 = vpop.f32.mrf.mxu0 }
 0x11f   : > { %v3545_v50 = vadd.f32 %v2954_v42, %v2920_v49  ;;  %v1011_v42 = vadd.f32 %v3443_v52, %v3453_v57  ;;  %v1035_v52 = vadd.f32 %v3451_v56, %v3465_v62 }
 0x120   : > { %v830_v37 = vpop.f32.mrf.mxu0 }
 0x121   : > { %3690 = vst [vmem:[#allocation5_spill] sm:$0xff] %v3545_v50  ;;  %v3547_v28 = vadd.f32 %v1122_v47, %v830_v37  ;;  %v1022_v37 = vadd.f32 %v3445_v53, %v3457_v36 }
 0x122   : > { %v2921_v32 = vpop.f32.mrf.mxu0 }
 0x123   : > { %3691 = vst [vmem:[#allocation6_spill] sm:$0xff] %v3547_v28  ;;  %v3549_v39 = vadd.f32 %v2955_v30, %v2921_v32 }
 0x124   : > { %v833_v41 = vpop.f32.mrf.mxu0 }
 0x125   : > { %3692 = vst [vmem:[#allocation7_spill] sm:$0xff] %v3549_v39  ;;  %v3553_v44 = vadd.f32 %v1125_v6, %v833_v41  ;;  %v1014_v6 = vadd.f32 %v3447_v54, %v3461_v60 }
 0x126   : > { %v2960_v38 = vpop.f32.mrf.mxu0 }
 0x127   : > { %v1466_v46 = vadd.f32 %v2960_v38, %v1019_v35 }
 0x128   : > { %v2994_v49 = vpop.f32.mrf.mxu1  ;;  %v1337_v50 = vpop.f32.mrf.mxu0 }
 0x129   : > { %v2192_v47 = vadd.f32 %v2994_v49, %v1466_v46  ;;  %v1464_v30 = vadd.f32 %v1337_v50, %v1011_v42 }
 0x12a   : > { %v2063_v32 = vpop.f32.mrf.mxu1  ;;  %v2961_v39 = vpop.f32.mrf.mxu0 }
 0x12b   : > { %vm2224_vm5 = vcmp.gt.f32.partialorder %v2192_v47, 0.0  ;;  %v2256_v28 = vmul.f32 0.2, %v2192_v47  ;;  %v2190_v51 = vadd.f32 %v2063_v32, %v1464_v30  ;;  %v1467_v55 = vadd.f32 %v2961_v39, %v1022_v37 }
 0x12c   : > { %v2995_v57 = vpop.f32.mrf.mxu1  ;;  %v1340_v41 = vpop.f32.mrf.mxu0  ;;  %v1027_v39 = vadd.f32 %v3455_v58, %v3469_v0  ;;  %v1038_v37 = vadd.f32 %v3459_v59, %v3473_v2 }
 0x12d   : > { %v2288_v53 = vsel %vm2224_vm5, %v2192_v47, %v2256_v28  ;;  %vm2222_vm7 = vcmp.gt.f32.partialorder %v2190_v51, 0.0  ;;  %v2254_v36 = vmul.f32 0.2, %v2190_v51  ;;  %v2193_v50 = vadd.f32 %v2995_v57, %v1467_v55 }
 0x12e   : > { %v2790_v54 = vpack.c.bf16 %v2288_v53, %v2288_v53  ;;  %v2066_v60 = vpop.f32.mrf.mxu1  ;;  %v1465_v56 = vadd.f32 %v1340_v41, %v1014_v6  ;;  %v2964_v62 = vpop.f32.mrf.mxu0  ;;  %v1030_v6 = vadd.f32 %v3463_v61, %v3477_v4 }
 0x12f   : > { %v2286_v35 = vsel %vm2222_vm7, %v2190_v51, %v2254_v36  ;;  %vm2225_vm8 = vcmp.gt.f32.partialorder %v2193_v50, 0.0  ;;  %v2257_v38 = vmul.f32 0.2, %v2193_v50  ;;  %v1470_v42 = vadd.f32 %v2964_v62, %v1035_v52 }
 0x130   : > { %2449 = vst.msk [vmem:[%s3567_s26 + $0x8] sm:$0xf] %vm2446_vm6, %v2790_v54  ;;  %v2788_v46 = vpack.c.bf16 %v2286_v35, %v2286_v35  ;;  %v2191_v28 = vadd.f32 %v2066_v60, %v1465_v56  ;;  %v1353_v49 = vpop.f32.mrf.mxu0  ;;  %v1051_v36 = vadd.f32 %v3467_v63, %v3481_v7  ;;  %v1043_v62 = vadd.f32 %v3471_v1, %v3485_v9 }
 0x131   : > { %v2289_v47 = vsel %vm2225_vm8, %v2193_v50, %v2257_v38  ;;  %v2998_v58 = vpop.f32.mrf.mxu1  ;;  %v1468_v0 = vadd.f32 %v1353_v49, %v1027_v39  ;;  %v1054_v49 = vadd.f32 %v3475_v3, %v3489_v11 }
 0x132   : > { %2447 = vst.msk [vmem:[%s3567_s26] sm:$0xf] %vm2446_vm6, %v2788_v46  ;;  %v2791_v30 = vpack.c.bf16 %v2289_v47, %v2289_v47  ;;  %vm2223_vm9 = vcmp.gt.f32.partialorder %v2191_v28, 0.0  ;;  %v2255_v32 = vmul.f32 0.2, %v2191_v28  ;;  %v2196_v51 = vadd.f32 %v2998_v58, %v1470_v42  ;;  %v2965_v55 = vpop.f32.mrf.mxu0 }
 0x133   : > { %v2079_v52 = vpop.f32.mrf.mxu1  ;;  %v1471_v57 = vadd.f32 %v2965_v55, %v1038_v37  ;;  %v1046_v55 = vadd.f32 %v3479_v5, %v3493_v13 }
 0x134   : > { %2450 = vst.msk [vmem:[%s3567_s26 + $0xc] sm:$0xf] %vm2446_vm6, %v2791_v30  ;;  %v2287_v41 = vsel %vm2223_vm9, %v2191_v28, %v2255_v32  ;;  %vm2228_vm10 = vcmp.gt.f32.partialorder %v2196_v51, 0.0  ;;  %v2260_v59 = vmul.f32 0.2, %v2196_v51  ;;  %v2194_v2 = vadd.f32 %v2079_v52, %v1468_v0  ;;  %v1356_v53 = vpop.f32.mrf.mxu0 }
 0x135   : > { %v2789_v50 = vpack.c.bf16 %v2287_v41, %v2287_v41  ;;  %v2999_v39 = vpop.f32.mrf.mxu1  ;;  %v1469_v54 = vadd.f32 %v1356_v53, %v1030_v6 }
 0x136   : > { %v2292_v60 = vsel %vm2228_vm10, %v2196_v51, %v2260_v59  ;;  %vm2226_vm11 = vcmp.gt.f32.partialorder %v2194_v2, 0.0  ;;  %v2258_v61 = vmul.f32 0.2, %v2194_v2  ;;  %v2197_v4 = vadd.f32 %v2999_v39, %v1471_v57  ;;  %v2968_v56 = vpop.f32.mrf.mxu0 }
 0x137   : > { %2448 = vst.msk [vmem:[%s3567_s26 + $0x4] sm:$0xf] %vm2446_vm6, %v2789_v50  ;;  %v2794_v35 = vpack.c.bf16 %v2292_v60, %v2292_v60  ;;  %v2082_v38 = vpop.f32.mrf.mxu1  ;;  %v1474_v42 = vadd.f32 %v2968_v56, %v1051_v36  ;;  %v1067_v59 = vadd.f32 %v3483_v8, %v3497_v15  ;;  %v1059_v39 = vadd.f32 %v3487_v10, %v3501_v17 }
 0x138   : > { %v2290_v46 = vsel %vm2226_vm11, %v2194_v2, %v2258_v61  ;;  %vm2229_vm12 = vcmp.gt.f32.partialorder %v2197_v4, 0.0  ;;  %v2261_v63 = vmul.f32 0.2, %v2197_v4  ;;  %v2195_v7 = vadd.f32 %v2082_v38, %v1469_v54  ;;  %v1369_v28 = vpop.f32.mrf.mxu0 }
 0x139   : > { %2453 = vst.msk [vmem:[%s3567_s26 + $0x18] sm:$0xf] %vm2446_vm6, %v2794_v35  ;;  %v2792_v37 = vpack.c.bf16 %v2290_v46, %v2290_v46  ;;  %v1472_v47 = vadd.f32 %v1369_v28, %v1043_v62  ;;  %v1070_v62 = vadd.f32 %v3491_v12, %v3505_v19 }
 0x13a   : > { %v2293_v1 = vsel %vm2229_vm12, %v2197_v4, %v2261_v63  ;;  %v3002_v9 = vpop.f32.mrf.mxu1  ;;  %vm2227_vm13 = vcmp.gt.f32.partialorder %v2195_v7, 0.0  ;;  %v2259_v58 = vmul.f32 0.2, %v2195_v7  ;;  %v2969_v0 = vpop.f32.mrf.mxu0 }
 0x13b   : > { %2451 = vst.msk [vmem:[%s3567_s26 + $0x10] sm:$0xf] %vm2446_vm6, %v2792_v37  ;;  %v2795_v30 = vpack.c.bf16 %v2293_v1, %v2293_v1  ;;  %v2200_v32 = vadd.f32 %v3002_v9, %v1474_v42  ;;  %v1475_v51 = vadd.f32 %v2969_v0, %v1054_v49  ;;  %v1083_v9 = vadd.f32 %v3499_v16, %v3513_v23 }
 0x13c   : > { %v2291_v3 = vsel %vm2227_vm13, %v2195_v7, %v2259_v58  ;;  %v2095_v11 = vpop.f32.mrf.mxu1  ;;  %v1372_v6 = vpop.f32.mrf.mxu0  ;;  %v1062_v7 = vadd.f32 %v3495_v14, %v3509_v21 }
 0x13d   : > { %2454 = vst.msk [vmem:[%s3567_s26 + $0x1c] sm:$0xf] %vm2446_vm6, %v2795_v30  ;;  %v2793_v52 = vpack.c.bf16 %v2291_v3, %v2291_v3  ;;  %vm2232_vm14 = vcmp.gt.f32.partialorder %v2200_v32, 0.0  ;;  %v2264_v57 = vmul.f32 0.2, %v2200_v32  ;;  %v2198_v41 = vadd.f32 %v2095_v11, %v1472_v47 }
 0x13e   : > { %v3003_v2 = vpop.f32.mrf.mxu1  ;;  %v1473_v53 = vadd.f32 %v1372_v6, %v1046_v55  ;;  %v2972_v36 = vpop.f32.mrf.mxu0  ;;  %v1075_v55 = vadd.f32 %v3503_v18, %v3517_v25 }
 0x13f   : > { %2452 = vst.msk [vmem:[%s3567_s26 + $0x14] sm:$0xf] %vm2446_vm6, %v2793_v52  ;;  %v2296_v50 = vsel %vm2232_vm14, %v2200_v32, %v2264_v57  ;;  %vm2230_vm15 = vcmp.gt.f32.partialorder %v2198_v41, 0.0  ;;  %v2262_v5 = vmul.f32 0.2, %v2198_v41  ;;  %v2201_v13 = vadd.f32 %v3003_v2, %v1475_v51 }
 0x140   : > { %v2798_v54 = vpack.c.bf16 %v2296_v50, %v2296_v50  ;;  %v2098_v60 = vpop.f32.mrf.mxu1  ;;  %v1478_v61 = vadd.f32 %v2972_v36, %v1067_v59  ;;  %v1385_v4 = vpop.f32.mrf.mxu0 }
 0x141   : > { %v2294_v56 = vsel %vm2230_vm15, %v2198_v41, %v2262_v5  ;;  %vm2233_vm0 = vcmp.gt.f32.partialorder %v2201_v13, 0.0  ;;  %v2265_v8 = vmul.f32 0.2, %v2201_v13  ;;  %v2199_v15 = vadd.f32 %v2098_v60, %v1473_v53 }
 0x142   : > { %2457 = vst.msk [vmem:[%s3567_s26 + $0x28] sm:$0xf] %vm2446_vm6, %v2798_v54  ;;  %v2796_v35 = vpack.c.bf16 %v2294_v56, %v2294_v56  ;;  %v3006_v38 = vpop.f32.mrf.mxu1  ;;  %v1476_v42 = vadd.f32 %v1385_v4, %v1059_v39  ;;  %v2973_v46 = vpop.f32.mrf.mxu0  ;;  %v1086_v41 = vadd.f32 %v3507_v20, %v3521_v27  ;;  %v1078_v5 = vadd.f32 %v3511_v22, %v3525_v29 }
 0x143   : > { %v2297_v10 = vsel %vm2233_vm0, %v2201_v13, %v2265_v8  ;;  %vm2231_vm1 = vcmp.gt.f32.partialorder %v2199_v15, 0.0  ;;  %v2263_v17 = vmul.f32 0.2, %v2199_v15  ;;  %v2204_v63 = vadd.f32 %v3006_v38, %v1478_v61 }
 0x144   : > { %2455 = vst.msk [vmem:[%s3567_s26 + $0x20] sm:$0xf] %vm2446_vm6, %v2796_v35  ;;  %v2799_v28 = vpack.c.bf16 %v2297_v10, %v2297_v10  ;;  %v2111_v49 = vpop.f32.mrf.mxu1  ;;  %v1479_v37 = vadd.f32 %v2973_v46, %v1070_v62  ;;  %v1388_v12 = vpop.f32.mrf.mxu0  ;;  %v1099_v4 = vadd.f32 %v3515_v24, %v3529_v31  ;;  %v1091_v38 = vadd.f32 %v3519_v26, %v3531_v33 }
 0x145   : > { %v2295_v19 = vsel %vm2231_vm1, %v2199_v15, %v2263_v17  ;;  %vm2236_vm2 = vcmp.gt.f32.partialorder %v2204_v63, 0.0  ;;  %v2268_v47 = vmul.f32 0.2, %v2204_v63  ;;  %v2202_v1 = vadd.f32 %v2111_v49, %v1476_v42 }
 0x146   : > { %2458 = vst.msk [vmem:[%s3567_s26 + $0x2c] sm:$0xf] %vm2446_vm6, %v2799_v28  ;;  %v2797_v58 = vpack.c.bf16 %v2295_v19, %v2295_v19  ;;  %v3007_v0 = vpop.f32.mrf.mxu1  ;;  %v1477_v30 = vadd.f32 %v1388_v12, %v1062_v7  ;;  %v2976_v14 = vpop.f32.mrf.mxu0  ;;  %v3693_v7 = vld [vmem:[#allocation2_spill] sm:$0xff] }
 0x147   : > { %v2300_v21 = vsel %vm2236_vm2, %v2204_v63, %v2268_v47  ;;  %vm2234_vm3 = vcmp.gt.f32.partialorder %v2202_v1, 0.0  ;;  %v2266_v32 = vmul.f32 0.2, %v2202_v1  ;;  %v2205_v51 = vadd.f32 %v3007_v0, %v1479_v37 }
 0x148   : > { %2456 = vst.msk [vmem:[%s3567_s26 + $0x24] sm:$0xf] %vm2446_vm6, %v2797_v58  ;;  %v2802_v3 = vpack.c.bf16 %v2300_v21, %v2300_v21  ;;  %v2114_v11 = vpop.f32.mrf.mxu1  ;;  %v1482_v6 = vadd.f32 %v2976_v14, %v1083_v9  ;;  %v1401_v16 = vpop.f32.mrf.mxu0  ;;  %v1102_v28 = vadd.f32 %v3693_v7, %v3533_v34  ;;  %v3695_v9 = vld [vmem:[#allocation3_spill] sm:$0xff] }
 0x149   : > { %v2298_v23 = vsel %vm2234_vm3, %v2202_v1, %v2266_v32  ;;  %vm2237_vm4 = vcmp.gt.f32.partialorder %v2205_v51, 0.0  ;;  %v2269_v52 = vmul.f32 0.2, %v2205_v51  ;;  %v2203_v57 = vadd.f32 %v2114_v11, %v1477_v30  ;;  %v3694_v1 = vld [vmem:[#allocation4_spill] sm:$0xff] }
 0x14a   : > { %2461 = vst.msk [vmem:[%s3567_s26 + $0x38] sm:$0xf] %vm2446_vm6, %v2802_v3  ;;  %v2800_v59 = vpack.c.bf16 %v2298_v23, %v2298_v23  ;;  %v3010_v2 = vpop.f32.mrf.mxu1  ;;  %v1480_v53 = vadd.f32 %v1401_v16, %v1075_v55  ;;  %v2977_v18 = vpop.f32.mrf.mxu0  ;;  %v1094_v58 = vadd.f32 %v3695_v9, %v3694_v1 }
 0x14b   : > { %v2301_v25 = vsel %vm2237_vm4, %v2205_v51, %v2269_v52  ;;  %vm2235_vm5 = vcmp.gt.f32.partialorder %v2203_v57, 0.0  ;;  %v2267_v36 = vmul.f32 0.2, %v2203_v57  ;;  %v2208_v50 = vadd.f32 %v3010_v2, %v1482_v6 }
 0x14c   : > { %2459 = vst.msk [vmem:[%s3567_s26 + $0x30] sm:$0xf] %vm2446_vm6, %v2800_v59  ;;  %v2803_v13 = vpack.c.bf16 %v2301_v25, %v2301_v25  ;;  %v2127_v39 = vpop.f32.mrf.mxu1  ;;  %v1483_v54 = vadd.f32 %v2977_v18, %v1086_v41  ;;  %v1404_v20 = vpop.f32.mrf.mxu0 }
 0x14d   : > { %v2299_v27 = vsel %vm2235_vm5, %v2203_v57, %v2267_v36  ;;  %vm2240_vm7 = vcmp.gt.f32.partialorder %v2208_v50, 0.0  ;;  %v2272_v60 = vmul.f32 0.2, %v2208_v50  ;;  %v2206_v61 = vadd.f32 %v2127_v39, %v1480_v53 }
 0x14e   : > { %2462 = vst.msk [vmem:[%s3567_s26 + $0x3c] sm:$0xf] %vm2446_vm6, %v2803_v13  ;;  %v2801_v56 = vpack.c.bf16 %v2299_v27, %v2299_v27  ;;  %v3011_v8 = vpop.f32.mrf.mxu1  ;;  %v1481_v15 = vadd.f32 %v1404_v20, %v1078_v5  ;;  %v2980_v22 = vpop.f32.mrf.mxu0 }
 0x14f   : > { %v2304_v29 = vsel %vm2240_vm7, %v2208_v50, %v2272_v60  ;;  %vm2238_vm8 = vcmp.gt.f32.partialorder %v2206_v61, 0.0  ;;  %v2270_v62 = vmul.f32 0.2, %v2206_v61  ;;  %v2209_v35 = vadd.f32 %v3011_v8, %v1483_v54 }
 0x150   : > { %2460 = vst.msk [vmem:[%s3567_s26 + $0x34] sm:$0xf] %vm2446_vm6, %v2801_v56  ;;  %v2806_v42 = vpack.c.bf16 %v2304_v29, %v2304_v29  ;;  %v2130_v46 = vpop.f32.mrf.mxu1  ;;  %v1486_v10 = vadd.f32 %v2980_v22, %v1099_v4  ;;  %v1417_v24 = vpop.f32.mrf.mxu0 }
 0x151   : > { %v2302_v31 = vsel %vm2238_vm8, %v2206_v61, %v2270_v62  ;;  %vm2241_vm9 = vcmp.gt.f32.partialorder %v2209_v35, 0.0  ;;  %v2273_v17 = vmul.f32 0.2, %v2209_v35  ;;  %v2207_v63 = vadd.f32 %v2130_v46, %v1481_v15  ;;  %v3696_v62 = vld [vmem:[#allocation5_spill] sm:$0xff] }
 0x152   : > { %2465 = vst.msk [vmem:[%s3567_s26 + $0x48] sm:$0xf] %vm2446_vm6, %v2806_v42  ;;  %v2804_v49 = vpack.c.bf16 %v2302_v31, %v2302_v31  ;;  %v3014_v37 = vpop.f32.mrf.mxu1  ;;  %v1484_v12 = vadd.f32 %v1417_v24, %v1091_v38  ;;  %v2981_v26 = vpop.f32.mrf.mxu0  ;;  %v3697_v31 = vld [vmem:[#allocation6_spill] sm:$0xff] }
 0x153   : > { %v2305_v33 = vsel %vm2241_vm9, %v2209_v35, %v2273_v17  ;;  %vm2239_vm10 = vcmp.gt.f32.partialorder %v2207_v63, 0.0  ;;  %v2271_v19 = vmul.f32 0.2, %v2207_v63  ;;  %v2212_v47 = vadd.f32 %v3014_v37, %v1486_v10 }
 0x154   : > { %2463 = vst.msk [vmem:[%s3567_s26 + $0x40] sm:$0xf] %vm2446_vm6, %v2804_v49  ;;  %v2807_v0 = vpack.c.bf16 %v2305_v33, %v2305_v33  ;;  %v2143_v30 = vpop.f32.mrf.mxu1  ;;  %v1487_v34 = vadd.f32 %v2981_v26, %v1102_v28  ;;  %v1420_v14 = vpop.f32.mrf.mxu0 }
 0x155   : > { %v2303_v21 = vsel %vm2239_vm10, %v2207_v63, %v2271_v19  ;;  %vm2244_vm11 = vcmp.gt.f32.partialorder %v2212_v47, 0.0  ;;  %v2276_v32 = vmul.f32 0.2, %v2212_v47  ;;  %v2210_v51 = vadd.f32 %v2143_v30, %v1484_v12  ;;  %v3698_v12 = vld [vmem:[#allocation7_spill] sm:$0xff] }
 0x156   : > { %2466 = vst.msk [vmem:[%s3567_s26 + $0x4c] sm:$0xf] %vm2446_vm6, %v2807_v0  ;;  %v2805_v55 = vpack.c.bf16 %v2303_v21, %v2303_v21  ;;  %v3015_v3 = vpop.f32.mrf.mxu1  ;;  %v1485_v11 = vadd.f32 %v1420_v14, %v1094_v58  ;;  %v2984_v6 = vpop.f32.mrf.mxu0 }
 0x157   : > { %v2308_v16 = vsel %vm2244_vm11, %v2212_v47, %v2276_v32  ;;  %vm2242_vm12 = vcmp.gt.f32.partialorder %v2210_v51, 0.0  ;;  %v2274_v23 = vmul.f32 0.2, %v2210_v51  ;;  %v2213_v52 = vadd.f32 %v3015_v3, %v1487_v34 }
 0x158   : > { %2464 = vst.msk [vmem:[%s3567_s26 + $0x44] sm:$0xf] %vm2446_vm6, %v2805_v55  ;;  %v2810_v57 = vpack.c.bf16 %v2308_v16, %v2308_v16  ;;  %v2146_v41 = vpop.f32.mrf.mxu1  ;;  %v1490_v59 = vadd.f32 %v2984_v6, %v3537_v40  ;;  %v1433_v2 = vpop.f32.mrf.mxu0 }
 0x159   : > { %v2306_v53 = vsel %vm2242_vm12, %v2210_v51, %v2274_v23  ;;  %vm2245_vm13 = vcmp.gt.f32.partialorder %v2213_v52, 0.0  ;;  %v2277_v18 = vmul.f32 0.2, %v2213_v52  ;;  %v2211_v25 = vadd.f32 %v2146_v41, %v1485_v11 }
 0x15a   : > { %2469 = vst.msk [vmem:[%s3567_s26 + $0x58] sm:$0xf] %vm2446_vm6, %v2810_v57  ;;  %v2808_v36 = vpack.c.bf16 %v2306_v53, %v2306_v53  ;;  %v2985_v50 = vpop.f32.mrf.mxu0  ;;  %v1488_v39 = vadd.f32 %v1433_v2, %v3539_v43 }
 0x15b   : > { %v2309_v5 = vsel %vm2245_vm13, %v2213_v52, %v2277_v18  ;;  %vm2243_vm14 = vcmp.gt.f32.partialorder %v2211_v25, 0.0  ;;  %v2275_v13 = vmul.f32 0.2, %v2211_v25  ;;  %v1491_v61 = vadd.f32 %v2985_v50, %v3541_v45 }
 0x15c   : > { %2467 = vst.msk [vmem:[%s3567_s26 + $0x50] sm:$0xf] %vm2446_vm6, %v2808_v36  ;;  %v2811_v54 = vpack.c.bf16 %v2309_v5, %v2309_v5  ;;  %v3018_v40 = vpop.f32.mrf.mxu1  ;;  %v1436_v20 = vpop.f32.mrf.mxu0 }
 0x15d   : > { %v2307_v27 = vsel %vm2243_vm14, %v2211_v25, %v2275_v13  ;;  %v2216_v60 = vadd.f32 %v3018_v40, %v1490_v59  ;;  %v1489_v43 = vadd.f32 %v1436_v20, %v3543_v48 }
 0x15e   : > { %2470 = vst.msk [vmem:[%s3567_s26 + $0x5c] sm:$0xf] %vm2446_vm6, %v2811_v54  ;;  %v2809_v4 = vpack.c.bf16 %v2307_v27, %v2307_v27  ;;  %v2159_v56 = vpop.f32.mrf.mxu1  ;;  %v2988_v8 = vpop.f32.mrf.mxu0 }
 0x15f   : > { %vm2248_vm15 = vcmp.gt.f32.partialorder %v2216_v60, 0.0  ;;  %v2280_v15 = vmul.f32 0.2, %v2216_v60  ;;  %v2214_v22 = vadd.f32 %v2159_v56, %v1488_v39  ;;  %v1494_v35 = vadd.f32 %v2988_v8, %v3696_v62 }
 0x160   : > { %2468 = vst.msk [vmem:[%s3567_s26 + $0x54] sm:$0xf] %vm2446_vm6, %v2809_v4  ;;  %v3019_v29 = vpop.f32.mrf.mxu1  ;;  %v1449_v38 = vpop.f32.mrf.mxu0 }
 0x161   : > { %v2312_v42 = vsel %vm2248_vm15, %v2216_v60, %v2280_v15  ;;  %vm2246_vm0 = vcmp.gt.f32.partialorder %v2214_v22, 0.0  ;;  %v2278_v45 = vmul.f32 0.2, %v2214_v22  ;;  %v2217_v46 = vadd.f32 %v3019_v29, %v1491_v61 }
 0x162   : > { %v2814_v10 = vpack.c.bf16 %v2312_v42, %v2312_v42  ;;  %v2162_v24 = vpop.f32.mrf.mxu1  ;;  %v1492_v17 = vadd.f32 %v1449_v38, %v3697_v31  ;;  %v2989_v63 = vpop.f32.mrf.mxu0 }
 0x163   : > { %v2310_v7 = vsel %vm2246_vm0, %v2214_v22, %v2278_v45  ;;  %vm2249_vm1 = vcmp.gt.f32.partialorder %v2217_v46, 0.0  ;;  %v2281_v48 = vmul.f32 0.2, %v2217_v46  ;;  %v2215_v28 = vadd.f32 %v2162_v24, %v1489_v43 }
 0x164   : > { %2473 = vst.msk [vmem:[%s3567_s26 + $0x68] sm:$0xf] %vm2446_vm6, %v2814_v10  ;;  %v2812_v49 = vpack.c.bf16 %v2310_v7, %v2310_v7  ;;  %v3022_v37 = vpop.f32.mrf.mxu1  ;;  %v1495_v26 = vadd.f32 %v2989_v63, %v3698_v12  ;;  %v1452_v33 = vpop.f32.mrf.mxu0 }
 0x165   : > { %v2313_v19 = vsel %vm2249_vm1, %v2217_v46, %v2281_v48  ;;  %vm2247_vm2 = vcmp.gt.f32.partialorder %v2215_v28, 0.0  ;;  %v2279_v47 = vmul.f32 0.2, %v2215_v28  ;;  %v2220_v1 = vadd.f32 %v3022_v37, %v1494_v35 }
 0x166   : > { %2471 = vst.msk [vmem:[%s3567_s26 + $0x60] sm:$0xf] %vm2446_vm6, %v2812_v49  ;;  %v2815_v9 = vpack.c.bf16 %v2313_v19, %v2313_v19  ;;  %v2175_v58 = vpop.f32.mrf.mxu1  ;;  %v1493_v0 = vadd.f32 %v1452_v33, %v3553_v44 }
 0x167   : > { %v2311_v30 = vsel %vm2247_vm2, %v2215_v28, %v2279_v47  ;;  %vm2252_vm3 = vcmp.gt.f32.partialorder %v2220_v1, 0.0  ;;  %v2284_v34 = vmul.f32 0.2, %v2220_v1  ;;  %v2218_v14 = vadd.f32 %v2175_v58, %v1492_v17 }
 0x168   : > { %2474 = vst.msk [vmem:[%s3567_s26 + $0x6c] sm:$0xf] %vm2446_vm6, %v2815_v9  ;;  %v2813_v21 = vpack.c.bf16 %v2311_v30, %v2311_v30  ;;  %v3023_v32 = vpop.f32.mrf.mxu1 }
 0x169   : > { %v2316_v51 = vsel %vm2252_vm3, %v2220_v1, %v2284_v34  ;;  %vm2250_vm4 = vcmp.gt.f32.partialorder %v2218_v14, 0.0  ;;  %v2282_v55 = vmul.f32 0.2, %v2218_v14  ;;  %v2221_v3 = vadd.f32 %v3023_v32, %v1495_v26 }
 0x16a   : > { %2472 = vst.msk [vmem:[%s3567_s26 + $0x64] sm:$0xf] %vm2446_vm6, %v2813_v21  ;;  %v2818_v11 = vpack.c.bf16 %v2316_v51, %v2316_v51  ;;  %v2178_v44 = vpop.f32.mrf.mxu1 }
 0x16b   : > { %v2314_v6 = vsel %vm2250_vm4, %v2218_v14, %v2282_v55  ;;  %vm2253_vm5 = vcmp.gt.f32.partialorder %v2221_v3, 0.0  ;;  %v2285_v16 = vmul.f32 0.2, %v2221_v3  ;;  %v2219_v23 = vadd.f32 %v2178_v44, %v1493_v0 }
 0x16c   : > { %2477 = vst.msk [vmem:[%s3567_s26 + $0x78] sm:$0xf] %vm2446_vm6, %v2818_v11  ;;  %v2816_v52 = vpack.c.bf16 %v2314_v6, %v2314_v6 }
 0x16d   : > { %v2317_v57 = vsel %vm2253_vm5, %v2221_v3, %v2285_v16  ;;  %vm2251_vm7 = vcmp.gt.f32.partialorder %v2219_v23, 0.0  ;;  %v2283_v41 = vmul.f32 0.2, %v2219_v23 }
 0x16e   : > { %2475 = vst.msk [vmem:[%s3567_s26 + $0x70] sm:$0xf] %vm2446_vm6, %v2816_v52  ;;  %v2819_v59 = vpack.c.bf16 %v2317_v57, %v2317_v57 }
 0x16f   : > { %v2315_v2 = vsel %vm2251_vm7, %v2219_v23, %v2283_v41 }
 0x170   : > { %2478 = vst.msk [vmem:[%s3567_s26 + $0x7c] sm:$0xf] %vm2446_vm6, %v2819_v59  ;;  %v2817_v53 = vpack.c.bf16 %v2315_v2, %v2315_v2 }
 0x172   : > { %2476 = vst.msk [vmem:[%s3567_s26 + $0x74] sm:$0xf] %vm2446_vm6, %v2817_v53 }
 0x173 PF: > { %s12_s9 = sadd.s32 1, %s3075_s9  }
 0x174   : > { %p9_p4 = scmp.ge.s32.totalorder %s12_s9, 4  }
 0x176   :  { %11 = sbr.rel (!%p9_p4) target bundleno = 1 (0x1), region = 62 }

// kernel: _lambda_.7
= control target key start
LH: loop header
LB: loop body
LE: loop exit
PB: predicated region body
PF: predicated region fallthrough
CT: control target
= control target key end

     0   :  { %s387_s9 = smov 0   ;;  %s435_s0 = inlined_call_operand.vmem [shape: bf16[2,64,16], index: 0, kind: input, shape index: {}]   ;;  %s436_s1 = inlined_call_operand.vmem [shape: f32[2,16], index: 1, kind: input, shape index: {}]   ;;  %s437_s2 = inlined_call_operand.vmem [shape: bf16[2,64,16], index: 2, kind: output, shape index: {}]  }
   0x1 LB: > { %s306_s10 = sadd.s32 4294967295, %s370_s9   ;;  %p310_p0 = scmp.ge.s32.totalorder %s370_s9, 1  ;;  %s370_s9 = sphi %s387_s9, %s12_s9  }
   0x2   : > { %p112_p1 = scmp.lt.s32.totalorder %s370_s9, 3 }
   0x4   : > { %p113_p2 = pnand %p310_p0, %p112_p1 }
   0x5   : > { %p134_p3 = scmp.lt.s32.totalorder (!%p113_p2), %s306_s10, 1 }
   0x6   : > { %116 = sbr.rel (%p113_p2) target bundleno = 34 (0x22), region = 28 }
   0xb   : > { %s439_s10 = smov (!%p134_p3, %s306_s10), 1  ;;  %v315_v0 = vld [vmem:[%s436_s1] ss:$0 sm:$0xff]  ;;  %vm242_vm0 = vcmask 125952   ;;  %v316_v9 = vld [vmem:[%s436_s1 + $0x1] ss:$0 sm:$0xff] }
   0xc   : > { %s327_s11 = sshll.u32 %s439_s10, 5 }
   0xd   : > { %s138_s14 = scalar_lea.vmem %s435_s0, %s327_s11  ;;  %s414_s21 = scalar_lea.vmem %s437_s2, %s327_s11 }
   0xe   : > { %v338_v1 = vld [vmem:[%s138_s14] sm:$0xff]   ;;  %v353_v2 = vld [vmem:[%s138_s14 + $0x8] sm:$0xff]   ;;  %v354_v3 = vld [vmem:[%s138_s14 + $0x10] sm:$0xff]  }
   0xf   : > { %v339_v4 = vunpack.c.l.bf16 %v338_v1  ;;  %v340_v5 = vunpack.c.h.bf16 %v338_v1  ;;  %v343_v6 = vunpack.c.l.bf16 %v353_v2  ;;  %v344_v7 = vunpack.c.h.bf16 %v353_v2  ;;  %v355_v8 = vld [vmem:[%s138_s14 + $0x18] sm:$0xff]  }
  0x10   : > { %v347_v10 = vunpack.c.l.bf16 %v354_v3  ;;  %v348_v11 = vunpack.c.h.bf16 %v354_v3  ;;  %v351_v12 = vunpack.c.l.bf16 %v355_v8  ;;  %v352_v13 = vunpack.c.h.bf16 %v355_v8 }
  0x11   : > { %v165_v14 = vmul.f32 %v339_v4, %v315_v0  ;;  %v166_v15 = vmul.f32 %v340_v5, %v315_v0  ;;  %v167_v16 = vmul.f32 %v343_v6, %v315_v0  ;;  %v168_v17 = vmul.f32 %v344_v7, %v315_v0 }
  0x12   : > { %v169_v18 = vmul.f32 %v347_v10, %v315_v0  ;;  %v170_v19 = vmul.f32 %v348_v11, %v315_v0  ;;  %v171_v20 = vmul.f32 %v351_v12, %v315_v0  ;;  %v172_v21 = vmul.f32 %v352_v13, %v315_v0 }
  0x13   : > { %v178_v22 = vadd.f32 %v316_v9, %v165_v14  ;;  %v179_v23 = vadd.f32 %v316_v9, %v166_v15  ;;  %v180_v24 = vadd.f32 %v316_v9, %v167_v16  ;;  %v181_v25 = vadd.f32 %v316_v9, %v168_v17 }
  0x14   : > { %v182_v26 = vadd.f32 %v316_v9, %v169_v18  ;;  %v183_v27 = vadd.f32 %v316_v9, %v170_v19  ;;  %v184_v28 = vadd.f32 %v316_v9, %v171_v20  ;;  %v185_v29 = vadd.f32 %v316_v9, %v172_v21 }
  0x15   : > { %vm186_vm1 = vcmp.gt.f32.partialorder %v178_v22, 0.0  ;;  %v194_v30 = vmul.f32 0.2, %v178_v22  ;;  %vm187_vm2 = vcmp.gt.f32.partialorder %v179_v23, 0.0  ;;  %v195_v31 = vmul.f32 0.2, %v179_v23 }
  0x16   : > { %vm188_vm3 = vcmp.gt.f32.partialorder %v180_v24, 0.0  ;;  %v196_v32 = vmul.f32 0.2, %v180_v24  ;;  %vm189_vm4 = vcmp.gt.f32.partialorder %v181_v25, 0.0  ;;  %v197_v33 = vmul.f32 0.2, %v181_v25 }
  0x17   : > { %v202_v34 = vsel %vm186_vm1, %v178_v22, %v194_v30  ;;  %v203_v35 = vsel %vm187_vm2, %v179_v23, %v195_v31  ;;  %vm190_vm5 = vcmp.gt.f32.partialorder %v182_v26, 0.0  ;;  %v198_v36 = vmul.f32 0.2, %v182_v26 }
  0x18   : > { %v329_v37 = vpack.c.bf16 %v202_v34, %v202_v34  ;;  %v330_v38 = vpack.c.bf16 %v203_v35, %v203_v35  ;;  %v204_v39 = vsel %vm188_vm3, %v180_v24, %v196_v32  ;;  %v205_v40 = vsel %vm189_vm4, %v181_v25, %v197_v33 }
  0x19   : > { %v331_v41 = vpack.c.bf16 %v204_v39, %v204_v39  ;;  %v332_v42 = vpack.c.bf16 %v205_v40, %v205_v40  ;;  %v206_v43 = vsel %vm190_vm5, %v182_v26, %v198_v36  ;;  %vm191_vm6 = vcmp.gt.f32.partialorder %v183_v27, 0.0 }
  0x1a   : > { %243 = vst.msk [vmem:[%s414_s21] sm:$0xf] %vm242_vm0, %v329_v37  ;;  %244 = vst.msk [vmem:[%s414_s21 + $0x4] sm:$0xf] %vm242_vm0, %v330_v38  ;;  %v333_v44 = vpack.c.bf16 %v206_v43, %v206_v43  ;;  %v199_v45 = vmul.f32 0.2, %v183_v27 }
  0x1b   : > { %vm192_vm7 = vcmp.gt.f32.partialorder %v184_v28, 0.0  ;;  %v200_v46 = vmul.f32 0.2, %v184_v28  ;;  %245 = vst.msk [vmem:[%s414_s21 + $0x8] sm:$0xf] %vm242_vm0, %v331_v41  ;;  %vm193_vm8 = vcmp.gt.f32.partialorder %v185_v29, 0.0 }
  0x1c   : > { %246 = vst.msk [vmem:[%s414_s21 + $0xc] sm:$0xf] %vm242_vm0, %v332_v42  ;;  %v201_v47 = vmul.f32 0.2, %v185_v29  ;;  %247 = vst.msk [vmem:[%s414_s21 + $0x10] sm:$0xf] %vm242_vm0, %v333_v44  ;;  %v207_v48 = vsel %vm191_vm6, %v183_v27, %v199_v45 }
  0x1d   : > { %v208_v49 = vsel %vm192_vm7, %v184_v28, %v200_v46  ;;  %v334_v50 = vpack.c.bf16 %v207_v48, %v207_v48 }
  0x1e   : > { %v335_v51 = vpack.c.bf16 %v208_v49, %v208_v49  ;;  %v209_v52 = vsel %vm193_vm8, %v185_v29, %v201_v47 }
  0x1f   : > { %v336_v53 = vpack.c.bf16 %v209_v52, %v209_v52  ;;  %248 = vst.msk [vmem:[%s414_s21 + $0x14] sm:$0xf] %vm242_vm0, %v334_v50 }
  0x20   : > { %249 = vst.msk [vmem:[%s414_s21 + $0x18] sm:$0xf] %vm242_vm0, %v335_v51 }
  0x21   : > { %250 = vst.msk [vmem:[%s414_s21 + $0x1c] sm:$0xf] %vm242_vm0, %v336_v53 }
  0x22 PF: > { %s12_s9 = sadd.s32 1, %s370_s9  }
  0x23   : > { %p9_p4 = scmp.ge.s32.totalorder %s12_s9, 4  }
  0x25   :  { %11 = sbr.rel (!%p9_p4) target bundleno = 1 (0x1), region = 58 }

// kernel: _lambda_.6
= control target key start
LH: loop header
LB: loop body
LE: loop exit
PB: predicated region body
PF: predicated region fallthrough
CT: control target
= control target key end

     0   :  { %s1318_s12 = smov 0   ;;  %s1497_s0 = inlined_call_operand.vmem [shape: bf16[2,9,9,32], index: 0, kind: input, shape index: {}]   ;;  %s1498_s1 = inlined_call_operand.vmem [shape: bf16[4,32,16], index: 1, kind: input, shape index: {}]   ;;  %s1499_s2 = inlined_call_operand.vmem [shape: bf16[2,64,16], index: 2, kind: output, shape index: {0}]   ;;  %s1500_s3 = inlined_call_operand.vmem [shape: f32[2,2,16], index: 3, kind: output, shape index: {1}]  }
   0x1 LB: > { %s1089_s13 = sadd.s32 4294967295, %s1296_s12   ;;  %p1093_p0 = scmp.ge.s32.totalorder %s1296_s12, 1  ;;  %s1296_s12 = sphi %s1318_s12, %s14_s12  }
   0x2   : > { %p140_p1 = scmp.lt.s32.totalorder %s1296_s12, 3 }
   0x4   : > { %p141_p2 = pnand %p1093_p0, %p140_p1 }
   0x5   : > { %p168_p3 = scmp.lt.s32.totalorder (!%p141_p2), %s1089_s13, 1 }
   0x6   : > { %144 = sbr.rel (%p141_p2) target bundleno = 285 (0x11d), region = 28 }
   0xb   : > { %v1274_v0 = vld [vmem:[%s1498_s1 + $0x8] sm:$0xff]   ;;  %v1275_v1 = vld [vmem:[%s1498_s1 + $0x18] sm:$0xff]   ;;  %v1276_v2 = vld [vmem:[%s1498_s1] sm:$0xff]   ;;  %s1504_s13 = smov (!%p168_p3, %s1089_s13), 1  ;;  %vm203_vm0 = vsmask.f32 3328 }
   0xc   : > { %1229 = vmatprep.subr.bf16.mxu1 %v1274_v0  ;;  %1217 = vmatprep.subr.bf16.mxu0 %v1275_v1  ;;  %v1277_v3 = vld [vmem:[%s1498_s1 + $0x10] sm:$0xff]   ;;  %s1265_s22 = smul.u32 72, %s1504_s13  ;;  %vm204_vm1 = vsmask.f32 7440  ;;  %v1344_v4 = vld [vmem:[%s1498_s1 + $0x28] sm:$0xff]   ;;  %vm347_vm2 = vcmask 261120  }
   0xd   : > { %1230 = vmatpush3.bf16.msra.mxu1 %v1274_v0  ;;  %1218 = vmatpush3.bf16.msra.mxu0 %v1275_v1  ;;  %v1281_v5 = vld [vmem:[%s1498_s1 + $0x38] sm:$0xff]   ;;  %v1285_v34 = vld [vmem:[%s1498_s1 + $0x30] sm:$0xff]   ;;  %vm1369_vm3 = vmor %vm203_vm0, %vm204_vm1  ;;  %s1184_s7 = sshll.u32 %s1504_s13, 5  ;;  %vm939_vm4 = vcmask 125952   ;;  %vm948_vm5 = vcmask 130048   ;;  %s1097_s11 = sshll.u32 %s1504_s13, 1 }
   0xe   : > { %1231 = vmatprep.subr.bf16.mxu1 %v1276_v2  ;;  %1219 = vmatprep.subr.bf16.mxu0 %v1277_v3  ;;  %s1349_s27 = scalar_lea.vmem %s1497_s0, %s1265_s22  ;;  %s1456_s10 = scalar_lea.vmem %s1499_s2, %s1184_s7  ;;  %vm999_vm6 = vcmask 1040384   ;;  %vm1001_vm7 = vcmask 123904  }
   0xf   : > { %v183_v6 = vld [vmem:[%s1349_s27] sm:$0xf]  ;;  %v184_v7 = vld [vmem:[%s1349_s27 + $0x8] sm:$0xf]  ;;  %v185_v8 = vld [vmem:[%s1349_s27 + $0x10] sm:$0xf]  ;;  %s181_s16 = scalar_lea.vmem %s1500_s3, %s1097_s11 }
  0x10   : > { %v207_v9 = vshrl.u32 %v183_v6, 16  ;;  %v210_v10 = vshll.u32 %v183_v6, 16  ;;  %v221_v11 = vshrl.u32 %v184_v7, 16  ;;  %v224_v12 = vshll.u32 %v184_v7, 16  ;;  %v186_v13 = vld [vmem:[%s1349_s27 + $0x18] sm:$0xf] }
  0x11   : > { %1232 = vmatpush3.bf16.msra.mxu1 %v1276_v2  ;;  %1220 = vmatpush3.bf16.msra.mxu0 %v1277_v3  ;;  %v1112_v14 = vcombine.low %v183_v6, %v184_v7  ;;  %v235_v15 = vshrl.u32 %v185_v8, 16  ;;  %v238_v16 = vshll.u32 %v185_v8, 16  ;;  %v249_v17 = vshrl.u32 %v186_v13, 16  ;;  %v195_v18 = vld [vmem:[%s1349_s27 + $0x4] sm:$0x1] }
  0x12   : > { %1253 = vmatprep.subr.bf16.mxu1 %v1281_v5  ;;  %1241 = vmatprep.subr.bf16.mxu0 %v1344_v4  ;;  %v209_v19 = vrot.slane %v207_v9, 4  ;;  %v212_v20 = vrot.slane %v210_v10, 5  ;;  %v223_v21 = vrot.slane %v221_v11, 4  ;;  %v226_v22 = vrot.slane %v224_v12, 5  ;;  %v196_v23 = vld [vmem:[%s1349_s27 + $0xc] sm:$0x1] }
  0x13   : > { %1233 = vmatprep.mubr.msk.bf16.mxu1 %vm347_vm2, %v1112_v14  ;;  %v237_v24 = vrot.slane %v235_v15, 4  ;;  %v240_v25 = vrot.slane %v238_v16, 5  ;;  %v251_v26 = vrot.slane %v249_v17, 4  ;;  %v252_v27 = vshll.u32 %v186_v13, 16  ;;  %v197_v28 = vld [vmem:[%s1349_s27 + $0x14] sm:$0x1] }
  0x14   : > { %v1113_v29 = vcombine.low %v185_v8, %v186_v13  ;;  %v213_v30 = vor.u32 %v212_v20, %v209_v19  ;;  %v216_v31 = vshll.u32 %v195_v18, 16  ;;  %v227_v32 = vor.u32 %v226_v22, %v223_v21  ;;  %v198_v33 = vld [vmem:[%s1349_s27 + $0x1c] sm:$0x1]  ;;  %v187_v40 = vld [vmem:[%s1349_s27 + $0x20] sm:$0xf] }
  0x15   : > { %v254_v35 = vrot.slane %v252_v27, 5  ;;  %v230_v37 = vshll.u32 %v196_v23, 16  ;;  %v241_v38 = vor.u32 %v240_v25, %v237_v24  ;;  %v244_v39 = vshll.u32 %v197_v28, 16  ;;  %v188_v45 = vld [vmem:[%s1349_s27 + $0x28] sm:$0xf]  ;;  %v1284_v13 = vld [vmem:[%s1498_s1 + $0x20] sm:$0xff]  }
  0x16   : > { %1234 = vmatmul.mubr.msk.bf16.vlgmr.msra.gmra.mxu1 %vm347_vm2, %v1113_v29  ;;  %v214_v41 = vrot.slane %v213_v30, 4  ;;  %v218_v42 = vrot.slane %v216_v31, 5  ;;  %v228_v43 = vrot.slane %v227_v32, 4  ;;  %v258_v44 = vshll.u32 %v198_v33, 16  ;;  %v189_v50 = vld [vmem:[%s1349_s27 + $0x30] sm:$0xf] }
  0x17   : > { %v232_v46 = vrot.slane %v230_v37, 5  ;;  %v242_v47 = vrot.slane %v241_v38, 4  ;;  %v246_v48 = vrot.slane %v244_v39, 5  ;;  %v255_v49 = vor.u32 %v254_v35, %v251_v26  ;;  %1254 = vmatpush3.bf16.msra.mxu1 %v1281_v5  ;;  %v190_v55 = vld [vmem:[%s1349_s27 + $0x38] sm:$0xf] }
  0x18   : > { %v219_v51 = vsel %vm1369_vm3, %v214_v41, %v218_v42  ;;  %v260_v52 = vrot.slane %v258_v44, 5  ;;  %v263_v53 = vshrl.u32 %v187_v40, 16  ;;  %v266_v54 = vshll.u32 %v187_v40, 16  ;;  %1255 = vmatprep.subr.bf16.mxu1 %v1285_v34  ;;  %v199_v60 = vld [vmem:[%s1349_s27 + $0x24] sm:$0x1] }
  0x19   : > { %v233_v56 = vsel %vm1369_vm3, %v228_v43, %v232_v46  ;;  %v247_v57 = vsel %vm1369_vm3, %v242_v47, %v246_v48  ;;  %v256_v58 = vrot.slane %v255_v49, 4  ;;  %v277_v59 = vshrl.u32 %v188_v45, 16  ;;  %v200_v1 = vld [vmem:[%s1349_s27 + $0x2c] sm:$0x1]  ;;  %v201_v7 = vld [vmem:[%s1349_s27 + $0x34] sm:$0x1] }
  0x1a   : > { %v1102_v61 = vcombine.low %v219_v51, %v233_v56  ;;  %v265_v62 = vrot.slane %v263_v53, 4  ;;  %v268_v63 = vrot.slane %v266_v54, 5  ;;  %v280_v0 = vshll.u32 %v188_v45, 16  ;;  %v202_v8 = vld [vmem:[%s1349_s27 + $0x3c] sm:$0x1] }
  0x1b   : > { %v261_v2 = vsel %vm1369_vm3, %v256_v58, %v260_v52  ;;  %v279_v3 = vrot.slane %v277_v59, 4  ;;  %v1114_v5 = vcombine.low %v187_v40, %v188_v45  ;;  %v291_v6 = vshrl.u32 %v189_v50, 16  ;;  %1256 = vmatpush3.bf16.msra.mxu1 %v1285_v34  ;;  %v1144_v18 = vld [vmem:[%s1349_s27 + $0x8] sm:$0xf]  ;;  %v1145_v23 = vld [vmem:[%s1349_s27 + $0xc] sm:$0x1] }
  0x1c   : > { %1221 = vmatprep.mubr.msk.bf16.mxu0 %vm347_vm2, %v1102_v61  ;;  %v1103_v9 = vcombine.low %v247_v57, %v261_v2  ;;  %v282_v10 = vrot.slane %v280_v0, 5  ;;  %v294_v11 = vshll.u32 %v189_v50, 16  ;;  %v305_v12 = vshrl.u32 %v190_v55, 16  ;;  %v1146_v28 = vld [vmem:[%s1349_s27 + $0x10] sm:$0xf] }
  0x1d   : > { %1237 = vmatprep.mubr.msk.bf16.mxu1 %vm347_vm2, %v1114_v5  ;;  %v293_v14 = vrot.slane %v291_v6, 4  ;;  %v308_v15 = vshll.u32 %v190_v55, 16  ;;  %v1115_v16 = vcombine.low %v189_v50, %v190_v55  ;;  %v269_v17 = vor.u32 %v268_v63, %v265_v62  ;;  %v1147_v33 = vld [vmem:[%s1349_s27 + $0x14] sm:$0x1]  ;;  %v1148_v38 = vld [vmem:[%s1349_s27 + $0x18] sm:$0xf] }
  0x1e   : > { %1222 = vmatmul.mubr.msk.bf16.vlgmr.msra.gmra.mxu0 %vm347_vm2, %v1103_v9  ;;  %v296_v19 = vrot.slane %v294_v11, 5  ;;  %v307_v20 = vrot.slane %v305_v12, 4  ;;  %v272_v21 = vshll.u32 %v199_v60, 16  ;;  %v283_v22 = vor.u32 %v282_v10, %v279_v3  ;;  %v1149_v43 = vld [vmem:[%s1349_s27 + $0x1c] sm:$0x1] }
  0x1f   : > { %1242 = vmatpush3.bf16.msra.mxu0 %v1344_v4  ;;  %v310_v24 = vrot.slane %v308_v15, 5  ;;  %1238 = vmatmul.mubr.msk.bf16.gmra.mxu1 %vm347_vm2, %v1115_v16  ;;  %v270_v25 = vrot.slane %v269_v17, 4  ;;  %v286_v26 = vshll.u32 %v200_v1, 16  ;;  %v300_v27 = vshll.u32 %v201_v7, 16  ;;  %v1150_v48 = vld [vmem:[%s1349_s27 + $0x20] sm:$0xf] }
  0x20   : > { %v274_v29 = vrot.slane %v272_v21, 5  ;;  %v284_v30 = vrot.slane %v283_v22, 4  ;;  %1243 = vmatprep.subr.bf16.mxu0 %v1284_v13  ;;  %v297_v31 = vor.u32 %v296_v19, %v293_v14  ;;  %v314_v32 = vshll.u32 %v202_v8, 16  ;;  %v1151_v53 = vld [vmem:[%s1349_s27 + $0x24] sm:$0x1] }
  0x21   : > { %v288_v34 = vrot.slane %v286_v26, 5  ;;  %v302_v35 = vrot.slane %v300_v27, 5  ;;  %v311_v37 = vor.u32 %v310_v24, %v307_v20  ;;  %v682_v4 = vshrl.u32 %v1144_v18, 16  ;;  %v1286_v62 = vld [vmem:[%s1349_s27 + $0x8] ss:$8 sps:$4 sm:$0xff]  }
  0x22   : > { %v275_v39 = vsel %vm1369_vm3, %v270_v25, %v274_v29  ;;  %v298_v40 = vrot.slane %v297_v31, 4  ;;  %v316_v41 = vrot.slane %v314_v32, 5  ;;  %v685_v42 = vshll.u32 %v1144_v18, 16  ;;  %v1152_v12 = vld [vmem:[%s1349_s27 + $0x28] sm:$0xf] }
  0x23   : > { %v289_v44 = vsel %vm1369_vm3, %v284_v30, %v288_v34  ;;  %v312_v45 = vrot.slane %v311_v37, 4  ;;  %1244 = vmatpush3.bf16.msra.mxu0 %v1284_v13  ;;  %v684_v46 = vrot.slane %v682_v4, 4  ;;  %v691_v47 = vshll.u32 %v1145_v23, 16  ;;  %v1287_v16 = vld [vmem:[%s1349_s27 + $0x18] ss:$8 sps:$4 sm:$0xff]  }
  0x24   : > { %v1104_v49 = vcombine.low %v275_v39, %v289_v44  ;;  %v303_v50 = vsel %vm1369_vm3, %v298_v40, %v302_v35  ;;  %v687_v51 = vrot.slane %v685_v42, 5  ;;  %v696_v52 = vshrl.u32 %v1146_v28, 16  ;;  %v1153_v17 = vld [vmem:[%s1349_s27 + $0x2c] sm:$0x1]  ;;  %v1154_v18 = vld [vmem:[%s1349_s27 + $0x30] sm:$0xf] }
  0x25   : > { %v317_v54 = vsel %vm1369_vm3, %v312_v45, %v316_v41  ;;  %v693_v55 = vrot.slane %v691_v47, 5  ;;  %v699_v56 = vshll.u32 %v1146_v28, 16  ;;  %v705_v57 = vshll.u32 %v1147_v33, 16  ;;  %v1155_v22 = vld [vmem:[%s1349_s27 + $0x34] sm:$0x1] }
  0x26   : > { %1225 = vmatprep.mubr.msk.bf16.mxu0 %vm347_vm2, %v1104_v49  ;;  %v1105_v58 = vcombine.low %v303_v50, %v317_v54  ;;  %v688_v59 = vor.u32 %v687_v51, %v684_v46  ;;  %v698_v60 = vrot.slane %v696_v52, 4  ;;  %v710_v61 = vshrl.u32 %v1148_v38, 16  ;;  %v1156_v28 = vld [vmem:[%s1349_s27 + $0x38] sm:$0xf]  ;;  %v1157_v33 = vld [vmem:[%s1349_s27 + $0x3c] sm:$0x1] }
  0x27   : > { %v701_v63 = vrot.slane %v699_v56, 5  ;;  %v707_v0 = vrot.slane %v705_v57, 5  ;;  %v713_v1 = vshll.u32 %v1148_v38, 16  ;;  %v719_v2 = vshll.u32 %v1149_v43, 16  ;;  %v1158_v38 = vld [vmem:[%s1349_s27 + $0x40] sm:$0xf] }
  0x28   : > { %1226 = vmatmul.mubr.msk.bf16.gmra.mxu0 %vm347_vm2, %v1105_v58  ;;  %v689_v3 = vrot.slane %v688_v59, 4  ;;  %v712_v5 = vrot.slane %v710_v61, 4  ;;  %v724_v6 = vshrl.u32 %v1150_v48, 16  ;;  %v727_v7 = vshll.u32 %v1150_v48, 16  ;;  %v1159_v43 = vld [vmem:[%s1349_s27 + $0x44] sm:$0x1] }
  0x29   : > { %v702_v8 = vor.u32 %v701_v63, %v698_v60  ;;  %v715_v9 = vrot.slane %v713_v1, 5  ;;  %v721_v10 = vrot.slane %v719_v2, 5  ;;  %v733_v11 = vshll.u32 %v1151_v53, 16  ;;  %1245 = vmatprep.mubr.msk.bf16.mxu0 %vm347_vm2, %v1286_v62  ;;  %v1288_v52 = vld [vmem:[%s1349_s27 + $0x28] ss:$8 sps:$4 sm:$0xff]  }
  0x2a   : > { %v694_v13 = vsel %vm1369_vm3, %v689_v3, %v693_v55  ;;  %v726_v14 = vrot.slane %v724_v6, 4  ;;  %v729_v15 = vrot.slane %v727_v7, 5  ;;  %v738_v23 = vshrl.u32 %v1152_v12, 16  ;;  %v1289_v63 = vld [vmem:[%s1349_s27 + $0x38] ss:$8 sps:$4 sm:$0xff]  }
  0x2b   : > { %v703_v19 = vrot.slane %v702_v8, 4  ;;  %v716_v20 = vor.u32 %v715_v9, %v712_v5  ;;  %v735_v21 = vrot.slane %v733_v11, 5  ;;  %v741_v25 = vshll.u32 %v1152_v12, 16 }
  0x2c   : > { %v730_v24 = vor.u32 %v729_v15, %v726_v14  ;;  %v747_v26 = vshll.u32 %v1153_v17, 16  ;;  %v752_v27 = vshrl.u32 %v1154_v18, 16  ;;  %v740_v31 = vrot.slane %v738_v23, 4 }
  0x2d   : > { %v708_v29 = vsel %vm1369_vm3, %v703_v19, %v707_v0  ;;  %v717_v30 = vrot.slane %v716_v20, 4  ;;  %v755_v32 = vshll.u32 %v1154_v18, 16  ;;  %v743_v37 = vrot.slane %v741_v25, 5 }
  0x2e   : > { %v1164_v34 = vcombine.low %v694_v13, %v708_v29  ;;  %v731_v35 = vrot.slane %v730_v24, 4  ;;  %v749_v4 = vrot.slane %v747_v26, 5  ;;  %v754_v40 = vrot.slane %v752_v27, 4 }
  0x2f   : > { %v722_v39 = vsel %vm1369_vm3, %v717_v30, %v721_v10  ;;  %v757_v41 = vrot.slane %v755_v32, 5  ;;  %v761_v42 = vshll.u32 %v1155_v22, 16  ;;  %v744_v45 = vor.u32 %v743_v37, %v740_v31 }
  0x30   : > { %1257 = vmatprep.mubr.msk.bf16.mxu1 %vm347_vm2, %v1164_v34  ;;  %v736_v44 = vsel %vm1369_vm3, %v731_v35, %v735_v21  ;;  %1246 = vmatmul.mubr.msk.bf16.vlgmr.msra.gmra.mxu0 %vm347_vm2, %v1287_v16  ;;  %v766_v46 = vshrl.u32 %v1156_v28, 16  ;;  %v769_v47 = vshll.u32 %v1156_v28, 16  ;;  %v775_v51 = vshll.u32 %v1157_v33, 16 }
  0x31   : > { %v1165_v48 = vcombine.low %v722_v39, %v736_v44  ;;  %v758_v49 = vor.u32 %v757_v41, %v754_v40  ;;  %v763_v50 = vrot.slane %v761_v42, 5  ;;  %v745_v53 = vrot.slane %v744_v45, 4  ;;  %1249 = vmatprep.mubr.msk.bf16.mxu0 %vm347_vm2, %v1288_v52 }
  0x32   : > { %v768_v54 = vrot.slane %v766_v46, 4  ;;  %v771_v55 = vrot.slane %v769_v47, 5  ;;  %v780_v56 = vshrl.u32 %v1158_v38, 16  ;;  %v783_v58 = vshll.u32 %v1158_v38, 16 }
  0x33   : > { %1258 = vmatmul.mubr.msk.bf16.vlgmr.msra.gmra.mxu1 %vm347_vm2, %v1165_v48  ;;  %v759_v57 = vrot.slane %v758_v49, 4  ;;  %v789_v59 = vshll.u32 %v1159_v43, 16  ;;  %v750_v60 = vsel %vm1369_vm3, %v745_v53, %v749_v4  ;;  %v777_v1 = vrot.slane %v775_v51, 5 }
  0x34   : > { %v772_v61 = vor.u32 %v771_v55, %v768_v54  ;;  %v782_v62 = vrot.slane %v780_v56, 4  ;;  %v785_v2 = vrot.slane %v783_v58, 5 }
  0x35   : > { %v764_v0 = vsel %vm1369_vm3, %v759_v57, %v763_v50  ;;  %v791_v7 = vrot.slane %v789_v59, 5 }
  0x36   : > { %v1166_v3 = vcombine.low %v750_v60, %v764_v0  ;;  %v773_v5 = vrot.slane %v772_v61, 4  ;;  %v786_v6 = vor.u32 %v785_v2, %v782_v62 }
  0x38   : > { %1261 = vmatprep.mubr.msk.bf16.mxu1 %vm347_vm2, %v1166_v3  ;;  %1250 = vmatmul.mubr.msk.bf16.gmra.mxu0 %vm347_vm2, %v1289_v63  ;;  %v778_v8 = vsel %vm1369_vm3, %v773_v5, %v777_v1  ;;  %v787_v9 = vrot.slane %v786_v6, 4 }
  0x3a   : > { %v792_v10 = vsel %vm1369_vm3, %v787_v9, %v791_v7 }
  0x3b   : > { %v1167_v11 = vcombine.low %v778_v8, %v792_v10 }
  0x3d   : > { %1262 = vmatmul.mubr.msk.bf16.gmra.mxu1 %vm347_vm2, %v1167_v11 }
  0xd6   : > { %v1235_v12 = vpop.f32.mrf.mxu1 }
  0xd8   : > { %v503_v13 = vpop.f32.mrf.mxu1 }
  0xda   : > { %v1236_v14 = vpop.f32.mrf.mxu1 }
  0xdc   : > { %v506_v16 = vpop.f32.mrf.mxu1 }
  0xde   : > { %v1223_v15 = vpop.f32.mrf.mxu0 }
  0xdf   : > { %v1239_v19 = vpop.f32.mrf.mxu1  ;;  %v512_v26 = vadd.f32 %v1235_v12, %v1223_v15 }
  0xe0   : > { %v394_v17 = vpop.f32.mrf.mxu0 }
  0xe1   : > { %v519_v21 = vpop.f32.mrf.mxu1  ;;  %v504_v29 = vadd.f32 %v503_v13, %v394_v17 }
  0xe2   : > { %v1224_v18 = vpop.f32.mrf.mxu0 }
  0xe3   : > { %v1240_v24 = vpop.f32.mrf.mxu1  ;;  %v515_v32 = vadd.f32 %v1236_v14, %v1224_v18 }
  0xe4   : > { %v397_v20 = vpop.f32.mrf.mxu0 }
  0xe5   : > { %v522_v27 = vpop.f32.mrf.mxu1  ;;  %v507_v4 = vadd.f32 %v506_v16, %v397_v20 }
  0xe8   : > { %v1227_v22 = vpop.f32.mrf.mxu0 }
  0xe9   : > { %v528_v47 = vadd.f32 %v1239_v19, %v1227_v22 }
  0xea   : > { %v410_v23 = vpop.f32.mrf.mxu0 }
  0xeb   : > { %v520_v53 = vadd.f32 %v519_v21, %v410_v23 }
  0xec   : > { %v1228_v25 = vpop.f32.mrf.mxu0 }
  0xed   : > { %v531_v62 = vadd.f32 %v1240_v24, %v1228_v25 }
  0xee   : > { %v413_v36 = vpop.f32.mrf.mxu0 }
  0xef   : > { %v523_v12 = vadd.f32 %v522_v27, %v413_v36 }
  0xf0   : > { %v1247_v28 = vpop.f32.mrf.mxu0 }
  0xf1   : > { %v659_v30 = vadd.f32 %v1247_v28, %v512_v26 }
  0xf2   : > { %v626_v31 = vpop.f32.mrf.mxu0 }
  0xf3   : > { %v1259_v33 = vpop.f32.mrf.mxu1  ;;  %v657_v34 = vadd.f32 %v626_v31, %v504_v29 }
  0xf4   : > { %v901_v35 = vadd.f32 %v1259_v33, %v659_v30  ;;  %v1248_v37 = vpop.f32.mrf.mxu0 }
  0xf5   : > { %v868_v38 = vpop.f32.mrf.mxu1  ;;  %v660_v39 = vadd.f32 %v1248_v37, %v515_v32 }
  0xf6   : > { %v1187_v40 = vpack.c.bf16 %v901_v35, %v901_v35  ;;  %v899_v41 = vadd.f32 %v868_v38, %v657_v34  ;;  %v629_v42 = vpop.f32.mrf.mxu0  ;;  %v972_v54 = vmul.f32 %v901_v35, %v901_v35  ;;  %v952_v63 = vsel %vm948_vm5, %v901_v35, 0.0 }
  0xf7   : > { %v1260_v43 = vpop.f32.mrf.mxu1  ;;  %v658_v44 = vadd.f32 %v629_v42, %v507_v4 }
  0xf8   : > { %942 = vst.msk [vmem:[%s1456_s10 + $0x8] sm:$0xf] %vm939_vm4, %v1187_v40  ;;  %v1185_v45 = vpack.c.bf16 %v899_v41, %v899_v41  ;;  %v1251_v46 = vpop.f32.mrf.mxu0  ;;  %v902_v49 = vadd.f32 %v1260_v43, %v660_v39  ;;  %v970_v50 = vmul.f32 %v899_v41, %v899_v41  ;;  %v949_v57 = vsel %vm948_vm5, %v899_v41, 0.0 }
  0xf9   : > { %v871_v48 = vpop.f32.mrf.mxu1  ;;  %v663_v56 = vadd.f32 %v1251_v46, %v528_v47  ;;  %v981_v13 = vsel %vm948_vm5, %v972_v54, 0.0 }
  0xfa   : > { %940 = vst.msk [vmem:[%s1456_s10] sm:$0xf] %vm939_vm4, %v1185_v45  ;;  %v900_v51 = vadd.f32 %v871_v48, %v658_v44  ;;  %v642_v52 = vpop.f32.mrf.mxu0  ;;  %v1188_v55 = vpack.c.bf16 %v902_v49, %v902_v49  ;;  %v978_v1 = vsel %vm948_vm5, %v970_v50, 0.0  ;;  %v973_v2 = vmul.f32 %v902_v49, %v902_v49 }
  0xfb   : > { %v661_v6 = vadd.f32 %v642_v52, %v520_v53  ;;  %v954_v15 = vsel %vm948_vm5, %v902_v49, 0.0 }
  0xfc   : > { %v1186_v58 = vpack.c.bf16 %v900_v51, %v900_v51  ;;  %v950_v59 = vsel %vm948_vm5, %v900_v51, 0.0  ;;  %v971_v60 = vmul.f32 %v900_v51, %v900_v51  ;;  %v1252_v61 = vpop.f32.mrf.mxu0  ;;  %943 = vst.msk [vmem:[%s1456_s10 + $0xc] sm:$0xf] %vm939_vm4, %v1188_v55  ;;  %v983_v18 = vsel %vm948_vm5, %v973_v2, 0.0 }
  0xfd   : > { %v951_v0 = vadd.f32 %v950_v59, %v949_v57  ;;  %v1263_v3 = vpop.f32.mrf.mxu1  ;;  %v664_v10 = vadd.f32 %v1252_v61, %v531_v62 }
  0xfe   : > { %941 = vst.msk [vmem:[%s1456_s10 + $0x4] sm:$0xf] %vm939_vm4, %v1186_v58  ;;  %v979_v5 = vsel %vm948_vm5, %v971_v60, 0.0  ;;  %v905_v9 = vadd.f32 %v1263_v3, %v663_v56  ;;  %v645_v11 = vpop.f32.mrf.mxu0 }
  0xff   : > { %v953_v7 = vadd.f32 %v952_v63, %v951_v0  ;;  %v980_v8 = vadd.f32 %v979_v5, %v978_v1  ;;  %v884_v14 = vpop.f32.mrf.mxu1  ;;  %v662_v22 = vadd.f32 %v645_v11, %v523_v12 }
 0x100   : > { %v1191_v17 = vpack.c.bf16 %v905_v9, %v905_v9  ;;  %v903_v20 = vadd.f32 %v884_v14, %v661_v6  ;;  %v976_v33 = vmul.f32 %v905_v9, %v905_v9  ;;  %v960_v38 = vsel %vm948_vm5, %v905_v9, 0.0 }
 0x101   : > { %v982_v16 = vadd.f32 %v981_v13, %v980_v8  ;;  %v1264_v19 = vpop.f32.mrf.mxu1  ;;  %v955_v21 = vadd.f32 %v954_v15, %v953_v7 }
 0x102   : > { %946 = vst.msk [vmem:[%s1456_s10 + $0x18] sm:$0xf] %vm939_vm4, %v1191_v17  ;;  %v906_v24 = vadd.f32 %v1264_v19, %v664_v10  ;;  %v1189_v25 = vpack.c.bf16 %v903_v20, %v903_v20  ;;  %v956_v36 = vsel %vm948_vm5, %v903_v20, 0.0  ;;  %v974_v26 = vmul.f32 %v903_v20, %v903_v20 }
 0x103   : > { %v984_v23 = vadd.f32 %v983_v18, %v982_v16  ;;  %v957_v27 = vadd.f32 %v956_v36, %v955_v21  ;;  %v887_v28 = vpop.f32.mrf.mxu1  ;;  %v989_v43 = vsel %vm948_vm5, %v976_v33, 0.0 }
 0x104   : > { %v1192_v29 = vpack.c.bf16 %v906_v24, %v906_v24  ;;  %944 = vst.msk [vmem:[%s1456_s10 + $0x10] sm:$0xf] %vm939_vm4, %v1189_v25  ;;  %v985_v30 = vsel %vm948_vm5, %v974_v26, 0.0  ;;  %v904_v31 = vadd.f32 %v887_v28, %v662_v22  ;;  %v977_v39 = vmul.f32 %v906_v24, %v906_v24 }
 0x105   : > { %v986_v32 = vadd.f32 %v985_v30, %v984_v23  ;;  %v962_v44 = vsel %vm948_vm5, %v906_v24, 0.0 }
 0x106   : > { %947 = vst.msk [vmem:[%s1456_s10 + $0x1c] sm:$0xf] %vm939_vm4, %v1192_v29  ;;  %v1190_v34 = vpack.c.bf16 %v904_v31, %v904_v31  ;;  %v958_v35 = vsel %vm948_vm5, %v904_v31, 0.0  ;;  %v975_v37 = vmul.f32 %v904_v31, %v904_v31  ;;  %v991_v47 = vsel %vm948_vm5, %v977_v39, 0.0 }
 0x107   : > { %v959_v4 = vadd.f32 %v958_v35, %v957_v27 }
 0x108   : > { %945 = vst.msk [vmem:[%s1456_s10 + $0x14] sm:$0xf] %vm939_vm4, %v1190_v34  ;;  %v987_v40 = vsel %vm948_vm5, %v975_v37, 0.0 }
 0x109   : > { %v961_v41 = vadd.f32 %v960_v38, %v959_v4  ;;  %v988_v42 = vadd.f32 %v987_v40, %v986_v32 }
 0x10b   : > { %v963_v45 = vadd.f32 %v962_v44, %v961_v41  ;;  %v990_v46 = vadd.f32 %v989_v43, %v988_v42 }
 0x10d   : > { %v964_v48 = vrot.slane %v963_v45, 4  ;;  %v992_v49 = vadd.f32 %v991_v47, %v990_v46 }
 0x10f   : > { %v965_v50 = vadd.f32 %v964_v48, %v963_v45  ;;  %v993_v51 = vrot.slane %v992_v49, 4 }
 0x111   : > { %v966_v52 = vrot.slane %v965_v50, 2  ;;  %v994_v53 = vadd.f32 %v993_v51, %v992_v49 }
 0x113   : > { %v967_v54 = vadd.f32 %v966_v52, %v965_v50  ;;  %v995_v55 = vrot.slane %v994_v53, 2 }
 0x115   : > { %v968_v56 = vrot.slane %v967_v54, 1  ;;  %v996_v57 = vadd.f32 %v995_v55, %v994_v53 }
 0x117   : > { %v997_v58 = vrot.slane %v996_v57, 1  ;;  %v969_v59 = vadd.f32 %v968_v56, %v967_v54 }
 0x119   : > { %v998_v60 = vadd.f32 %v997_v58, %v996_v57 }
 0x11b   : > { %v1000_v61 = vsel %vm999_vm6, %v969_v59, %v998_v60 }
 0x11c   : > { %1002 = vst.msk [vmem:[%s181_s16] sm:$0x3] %vm1001_vm7, %v1000_v61 }
 0x11d PF: > { %s14_s12 = sadd.s32 1, %s1296_s12  }
 0x11e   : > { %p11_p4 = scmp.ge.s32.totalorder %s14_s12, 4  }
 0x120   :  { %13 = sbr.rel (!%p11_p4) target bundleno = 1 (0x1), region = 74 }

// kernel: _lambda_.8
= control target key start
LH: loop header
LB: loop body
LE: loop exit
PB: predicated region body
PF: predicated region fallthrough
CT: control target
= control target key end

     0   :  { %vm229_vm0 = vcmask 257024   ;;  %s419_s1 = inlined_call_operand.vmem [shape: bf16[256,32], index: 1, kind: input, shape index: {}]   ;;  %s420_s0 = inlined_call_operand.vmem [shape: bf16[32,256], index: 0, kind: input, shape index: {}]   ;;  %s421_s2 = inlined_call_operand.vmem [shape: bf16[32,32], index: 2, kind: output, shape index: {}]  }
   0x1   :  { %v310_v0 = vld [vmem:[%s419_s1 + $0x78] sm:$0xff]   ;;  %v312_v2 = vld [vmem:[%s419_s1 + $0x70] sm:$0xff]   ;;  %v314_v4 = vld [vmem:[%s419_s1 + $0x68] sm:$0xff]  }
   0x2   :  { %v311_v1 = vld [vmem:[%s419_s1 + $0x38] sm:$0xff]   ;;  %266 = vmatprep.subr.bf16.mxu0 %v310_v0  ;;  %294 = vmatprep.subr.bf16.mxu1 %v310_v0  ;;  %v313_v3 = vld [vmem:[%s419_s1 + $0x30] sm:$0xff]   ;;  %v315_v5 = vld [vmem:[%s419_s1 + $0x28] sm:$0xff]  }
   0x3   :  { %267 = vmatpush3.bf16.msra.mxu0 %v311_v1  ;;  %302 = vmatpush3.bf16.msra.mxu1 %v311_v1  ;;  %v316_v6 = vld [vmem:[%s419_s1 + $0x60] sm:$0xff]   ;;  %v318_v8 = vld [vmem:[%s419_s1 + $0x58] sm:$0xff]   ;;  %v320_v10 = vld [vmem:[%s419_s1 + $0x50] sm:$0xff]  }
   0x4   :  { %268 = vmatprep.subr.bf16.mxu0 %v312_v2  ;;  %295 = vmatprep.subr.bf16.mxu1 %v312_v2  ;;  %v317_v7 = vld [vmem:[%s419_s1 + $0x20] sm:$0xff]   ;;  %v319_v9 = vld [vmem:[%s419_s1 + $0x18] sm:$0xff]   ;;  %v321_v13 = vld [vmem:[%s419_s1 + $0x10] sm:$0xff]  }
   0x5   :  { %v328_v11 = vld [vmem:[%s420_s0 + $0x4] ss:$8 sps:$4 sm:$0xff]   ;;  %v331_v12 = vld [vmem:[%s420_s0 + $0x14] ss:$8 sps:$4 sm:$0xff]   ;;  %v326_v18 = vld [vmem:[%s420_s0] ss:$8 sps:$4 sm:$0xff]  }
   0x6   :  { %v322_v14 = vld [vmem:[%s419_s1 + $0x48] sm:$0xff]   ;;  %196 = vmatprep.mubr.bf16.mxu0 %v328_v11  ;;  %204 = vmatprep.mubr.bf16.mxu1 %v331_v12  ;;  %v324_v16 = vld [vmem:[%s419_s1 + $0x40] sm:$0xff]   ;;  %v329_v19 = vld [vmem:[%s420_s0 + $0x10] ss:$8 sps:$4 sm:$0xff]  }
   0x7   :  { %269 = vmatpush3.bf16.msra.mxu0 %v313_v3  ;;  %303 = vmatpush3.bf16.msra.mxu1 %v313_v3  ;;  %v323_v15 = vld [vmem:[%s419_s1 + $0x8] sm:$0xff]   ;;  %v325_v17 = vld [vmem:[%s419_s1] sm:$0xff]  }
   0x8   :  { %270 = vmatprep.subr.bf16.mxu0 %v314_v4  ;;  %296 = vmatprep.subr.bf16.mxu1 %v314_v4 }
   0xb   :  { %271 = vmatpush3.bf16.msra.mxu0 %v315_v5  ;;  %304 = vmatpush3.bf16.msra.mxu1 %v315_v5 }
   0xc   :  { %272 = vmatprep.subr.bf16.mxu0 %v316_v6  ;;  %297 = vmatprep.subr.bf16.mxu1 %v316_v6 }
   0xf   :  { %273 = vmatpush3.bf16.msra.mxu0 %v317_v7  ;;  %305 = vmatpush3.bf16.msra.mxu1 %v317_v7 }
  0x10   :  { %274 = vmatprep.subr.bf16.mxu0 %v318_v8  ;;  %298 = vmatprep.subr.bf16.mxu1 %v318_v8 }
  0x13   :  { %275 = vmatpush3.bf16.msra.mxu0 %v319_v9  ;;  %306 = vmatpush3.bf16.msra.mxu1 %v319_v9 }
  0x14   :  { %276 = vmatprep.subr.bf16.mxu0 %v320_v10  ;;  %299 = vmatprep.subr.bf16.mxu1 %v320_v10 }
  0x17   :  { %277 = vmatpush3.bf16.msra.mxu0 %v321_v13  ;;  %307 = vmatpush3.bf16.msra.mxu1 %v321_v13 }
  0x18   :  { %278 = vmatprep.subr.bf16.mxu0 %v322_v14  ;;  %300 = vmatprep.subr.bf16.mxu1 %v322_v14 }
  0x1b   :  { %279 = vmatpush3.bf16.msra.mxu0 %v323_v15  ;;  %308 = vmatpush3.bf16.msra.mxu1 %v323_v15 }
  0x1c   :  { %280 = vmatprep.subr.bf16.mxu0 %v324_v16  ;;  %301 = vmatprep.subr.bf16.mxu1 %v324_v16 }
  0x1f   :  { %281 = vmatpush3.bf16.msra.mxu0 %v325_v17  ;;  %309 = vmatpush3.bf16.msra.mxu1 %v325_v17 }
  0x22   :  { %197 = vmatmul.mubr.bf16.vlgmr.msra.gmra.mxu0 %v326_v18  ;;  %205 = vmatmul.mubr.bf16.vlgmr.msra.gmra.mxu1 %v329_v19 }
  0xe2   :  { %v282_v20 = vpop.f32.mrf.mxu0  ;;  %v288_v21 = vpop.f32.mrf.mxu1 }
  0xe4   :  { %v283_v22 = vpop.f32.mrf.mxu0  ;;  %v289_v23 = vpop.f32.mrf.mxu1 }
  0xe5   :  { %v284_v24 = vadd.f32 %v283_v22, %v282_v20  ;;  %v290_v25 = vadd.f32 %v289_v23, %v288_v21 }
  0xe6   :  { %v285_v26 = vpop.f32.mrf.mxu0  ;;  %v291_v27 = vpop.f32.mrf.mxu1 }
  0xe7   :  { %v262_v28 = vpack.c.bf16 %v284_v24, %v284_v24  ;;  %v264_v29 = vpack.c.bf16 %v290_v25, %v290_v25 }
  0xe8   :  { %v286_v30 = vpop.f32.mrf.mxu0  ;;  %v292_v31 = vpop.f32.mrf.mxu1 }
  0xe9   :  { %230 = vst.msk [vmem:[%s421_s2] sm:$0xf] %vm229_vm0, %v262_v28  ;;  %232 = vst.msk [vmem:[%s421_s2 + $0x8] sm:$0xf] %vm229_vm0, %v264_v29  ;;  %v287_v32 = vadd.f32 %v286_v30, %v285_v26  ;;  %v293_v33 = vadd.f32 %v292_v31, %v291_v27 }
  0xeb   :  { %v263_v34 = vpack.c.bf16 %v287_v32, %v287_v32  ;;  %v265_v35 = vpack.c.bf16 %v293_v33, %v293_v33 }
  0xed   :  { %231 = vst.msk [vmem:[%s421_s2 + $0x4] sm:$0xf] %vm229_vm0, %v263_v34  ;;  %233 = vst.msk [vmem:[%s421_s2 + $0xc] sm:$0xf] %vm229_vm0, %v265_v35 }

// kernel: _lambda_.9
= control target key start
LH: loop header
LB: loop body
LE: loop exit
PB: predicated region body
PF: predicated region fallthrough
CT: control target
= control target key end

     0   :  { %v1442_v0 = vmov 0.0   ;;  %vm1443_vm0 = vmmov 0   ;;  %vm69_vm5 = vcmask 1041409   ;;  %vm84_vm6 = vcmask 261120   ;;  %s1719_s2 = inlined_call_operand.vmem [shape: bf16[16,32,1], index: 2, kind: input, shape index: {}]   ;;  %s1720_s0 = inlined_call_operand.vmem [shape: bf16[2,16,32], index: 0, kind: input, shape index: {}]   ;;  %s1721_s1 = inlined_call_operand.vmem [shape: f32[2,32], index: 1, kind: input, shape index: {}]   ;;  %s1722_s3 = inlined_call_operand.vmem [shape: f32[2,1], index: 3, kind: output, shape index: {}]  }
   0x1   :  { %1276 = vmatprep.subr.bf16.mxu0 %v1442_v0  ;;  %v1406_v1 = vld [vmem:[%s1719_s2 + $0x18] sm:$0xff]   ;;  %1284 = vmatprep.subr.bf16.mxu1 %v1442_v0  ;;  %v1407_v2 = vld [vmem:[%s1719_s2 + $0x8] sm:$0xff]   ;;  %v1408_v3 = vld [vmem:[%s1719_s2 + $0x10] sm:$0xff]   ;;  %vm1102_vm7 = vcmask 1024  }
   0x2   :  { %1280 = vmatprep.mubr.msk.bf16.mxu0 %vm1443_vm0, %v1442_v0  ;;  %1288 = vmatprep.mubr.msk.bf16.mxu1 %vm1443_vm0, %v1442_v0  ;;  %v1409_v4 = vld [vmem:[%s1719_s2] sm:$0xff]   ;;  %v1227_v6 = vld [vmem:[%s1720_s0 + $0x8] sm:$0xff]   ;;  %v1411_v37 = vld [vmem:[%s1719_s2 + $0x38] sm:$0xff]  }
   0x3   :  { %1277 = vmatpush3.bf16.msra.mxu0 %v1406_v1  ;;  %1285 = vmatpush3.bf16.msra.mxu1 %v1407_v2  ;;  %v1220_v5 = vld [vmem:[%s1720_s0] sm:$0xff]   ;;  %v1225_v10 = vunpack.c.l.bf16 %v1227_v6  ;;  %v1226_v11 = vunpack.c.h.bf16 %v1227_v6  ;;  %v1410_v36 = vld [vmem:[%s1719_s2 + $0x28] sm:$0xff]   ;;  %v1413_v46 = vld [vmem:[%s1719_s2 + $0x30] sm:$0xff]  }
   0x4   :  { %1278 = vmatprep.subr.bf16.mxu0 %v1442_v0  ;;  %1286 = vmatprep.subr.bf16.mxu1 %v1442_v0  ;;  %v1108_v7 = vld [vmem:[%s1721_s1] ss:$0 sm:$0xff]  ;;  %v1221_v8 = vunpack.c.l.bf16 %v1220_v5  ;;  %v1222_v9 = vunpack.c.h.bf16 %v1220_v5  ;;  %v1109_v12 = vld [vmem:[%s1721_s1 + $0x1] ss:$0 sm:$0xff]  ;;  %v1414_v49 = vld [vmem:[%s1719_s2 + $0x48] sm:$0xff]  }
   0x5   :  { %v30_v15 = vmul.f32 %v1225_v10, %v1108_v7  ;;  %v31_v16 = vmul.f32 %v1226_v11, %v1108_v7  ;;  %v1412_v45 = vld [vmem:[%s1719_s2 + $0x20] sm:$0xff]   ;;  %v1415_v51 = vld [vmem:[%s1719_s2 + $0x58] sm:$0xff]   ;;  %v1417_v59 = vld [vmem:[%s1719_s2 + $0x50] sm:$0xff]  }
   0x6   :  { %v28_v13 = vmul.f32 %v1221_v8, %v1108_v7  ;;  %v29_v14 = vmul.f32 %v1222_v9, %v1108_v7  ;;  %v1416_v57 = vld [vmem:[%s1719_s2 + $0x40] sm:$0xff]   ;;  %v1418_v63 = vld [vmem:[%s1719_s2 + $0x68] sm:$0xff]   ;;  %v1421_v9 = vld [vmem:[%s1719_s2 + $0x70] sm:$0xff]  }
   0x7   :  { %1279 = vmatpush3.bf16.msra.mxu0 %v1408_v3  ;;  %1287 = vmatpush3.bf16.msra.mxu1 %v1409_v4  ;;  %v39_v19 = vadd.f32 %v1109_v12, %v30_v15  ;;  %v40_v20 = vadd.f32 %v1109_v12, %v31_v16  ;;  %v1419_v3 = vld [vmem:[%s1719_s2 + $0x78] sm:$0xff]   ;;  %v1420_v7 = vld [vmem:[%s1719_s2 + $0x60] sm:$0xff]  }
   0x8   :  { %1292 = vmatprep.subr.bf16.mxu0 %v1442_v0  ;;  %1300 = vmatprep.subr.bf16.mxu1 %v1442_v0  ;;  %v37_v17 = vadd.f32 %v1109_v12, %v28_v13  ;;  %v38_v18 = vadd.f32 %v1109_v12, %v29_v14  ;;  %v1422_v14 = vld [vmem:[%s1719_s2 + $0x88] sm:$0xff]   ;;  %v1423_v16 = vld [vmem:[%s1719_s2 + $0x98] sm:$0xff]  }
   0x9   :  { %vm43_vm3 = vcmp.gt.f32.partialorder %v39_v19, 0.0  ;;  %vm44_vm4 = vcmp.gt.f32.partialorder %v40_v20, 0.0  ;;  %v47_v23 = vmul.f32 0.2, %v39_v19  ;;  %v48_v24 = vmul.f32 0.2, %v40_v20 }
   0xa   :  { %vm41_vm1 = vcmp.gt.f32.partialorder %v37_v17, 0.0  ;;  %vm42_vm2 = vcmp.gt.f32.partialorder %v38_v18, 0.0  ;;  %v45_v21 = vmul.f32 0.2, %v37_v17  ;;  %v46_v22 = vmul.f32 0.2, %v38_v18 }
   0xb   :  { %v51_v27 = vsel %vm43_vm3, %v39_v19, %v47_v23  ;;  %v52_v28 = vsel %vm44_vm4, %v40_v20, %v48_v24  ;;  %v1425_v20 = vld [vmem:[%s1719_s2 + $0x90] sm:$0xff]   ;;  %v1426_v24 = vld [vmem:[%s1719_s2 + $0xa8] sm:$0xff]  }
   0xc   :  { %v49_v25 = vsel %vm41_vm1, %v37_v17, %v45_v21  ;;  %v50_v26 = vsel %vm42_vm2, %v38_v18, %v46_v22  ;;  %v1500_v30 = vpack.c.bf16 %v52_v28, %v51_v27  ;;  %v1424_v18 = vld [vmem:[%s1719_s2 + $0x80] sm:$0xff]   ;;  %v1427_v27 = vld [vmem:[%s1719_s2 + $0xb8] sm:$0xff]  }
   0xd   :  { %v1498_v29 = vpack.c.bf16 %v50_v26, %v49_v25 }
   0xe   :  { %v1506_v32 = vunpack.c.l.b16 %v1500_v30  ;;  %v1582_v6 = vunpack.c.h.b16 %v1500_v30  ;;  %v1428_v30 = vld [vmem:[%s1719_s2 + $0xa0] sm:$0xff]  }
   0xf   :  { %v1503_v31 = vunpack.c.l.b16 %v1498_v29  ;;  %v1595_v11 = vunpack.c.h.b16 %v1498_v29 }
  0x10   :  { %v128_v34 = vrot.slane %v1506_v32, 7  ;;  %v192_v39 = vrot.slane %v1506_v32, 1  ;;  %v257_v43 = vrot.slane %v1506_v32, 2  ;;  %v322_v54 = vrot.slane %v1506_v32, 3 }
  0x11   :  { %v68_v33 = vrot.slane %v1503_v31, 1  ;;  %v191_v38 = vrot.slane %v1503_v31, 2  ;;  %v256_v42 = vrot.slane %v1503_v31, 3  ;;  %v321_v53 = vrot.slane %v1503_v31, 4 }
  0x12   :  { %v129_v41 = vsel %vm69_vm5, %v128_v34, %v1503_v31  ;;  %v386_v55 = vrot.slane %v1503_v31, 5  ;;  %v387_v56 = vrot.slane %v1506_v32, 4  ;;  %v451_v1 = vrot.slane %v1503_v31, 6 }
  0x13   :  { %v70_v35 = vsel %vm69_vm5, %v1506_v32, %v68_v33  ;;  %v130_v44 = vpack.c.b16 %v129_v41, %v129_v41  ;;  %v193_v47 = vsel %vm69_vm5, %v192_v39, %v191_v38  ;;  %v258_v48 = vsel %vm69_vm5, %v257_v43, %v256_v42  ;;  %v1431_v39 = vld [vmem:[%s1719_s2 + $0xd8] sm:$0xff]   ;;  %v1432_v42 = vld [vmem:[%s1719_s2 + $0xc0] sm:$0xff]  }
  0x14   :  { %v71_v40 = vpack.c.b16 %v70_v35, %v70_v35  ;;  %v194_v50 = vpack.c.b16 %v193_v47, %v193_v47  ;;  %v259_v52 = vpack.c.b16 %v258_v48, %v258_v48  ;;  %v323_v58 = vsel %vm69_vm5, %v322_v54, %v321_v53  ;;  %v1434_v48 = vld [vmem:[%s1719_s2 + $0xe8] sm:$0xff]   ;;  %v1436_v54 = vld [vmem:[%s1719_s2 + $0xe0] sm:$0xff]  }
  0x15   :  { %1289 = vmatmul.mubr.msk.bf16.vlgmr.msra.gmra.mxu1 %vm84_vm6, %v130_v44  ;;  %v388_v60 = vsel %vm69_vm5, %v387_v56, %v386_v55  ;;  %v324_v61 = vpack.c.b16 %v323_v58, %v323_v58  ;;  %v452_v2 = vrot.slane %v1506_v32, 5  ;;  %v516_v4 = vrot.slane %v1503_v31, 7  ;;  %v1433_v44 = vld [vmem:[%s1719_s2 + $0xd0] sm:$0xff]  }
  0x16   :  { %1281 = vmatmul.mubr.msk.bf16.vlgmr.msra.gmra.mxu0 %vm84_vm6, %v71_v40  ;;  %1301 = vmatpush3.bf16.msra.mxu1 %v1411_v37  ;;  %v389_v62 = vpack.c.b16 %v388_v60, %v388_v60  ;;  %v517_v5 = vrot.slane %v1506_v32, 6  ;;  %v583_v15 = vrot.slane %v1582_v6, 7  ;;  %v647_v17 = vrot.slane %v1595_v11, 1  ;;  %v1429_v32 = vld [vmem:[%s1719_s2 + $0xb0] sm:$0xff]  }
  0x17   :  { %1293 = vmatpush3.bf16.msra.mxu0 %v1410_v36  ;;  %1302 = vmatprep.subr.bf16.mxu1 %v1442_v0  ;;  %v453_v8 = vsel %vm69_vm5, %v452_v2, %v451_v1  ;;  %v711_v25 = vrot.slane %v1595_v11, 2  ;;  %v712_v26 = vrot.slane %v1582_v6, 1  ;;  %v776_v28 = vrot.slane %v1595_v11, 3  ;;  %v1430_v36 = vld [vmem:[%s1719_s2 + $0xc8] sm:$0xff]   ;;  %v1437_v56 = vld [vmem:[%s1719_s2 + $0xf0] sm:$0xff]  }
  0x18   :  { %1294 = vmatprep.subr.bf16.mxu0 %v1442_v0  ;;  %1296 = vmatprep.mubr.msk.bf16.mxu0 %vm1443_vm0, %v1442_v0  ;;  %v518_v10 = vsel %vm69_vm5, %v517_v5, %v516_v4  ;;  %v454_v12 = vpack.c.b16 %v453_v8, %v453_v8  ;;  %v584_v19 = vsel %vm69_vm5, %v583_v15, %v1595_v11  ;;  %v777_v29 = vrot.slane %v1582_v6, 2 }
  0x19   :  { %1304 = vmatprep.mubr.msk.bf16.mxu1 %vm1443_vm0, %v1442_v0  ;;  %v519_v13 = vpack.c.b16 %v518_v10, %v518_v10  ;;  %v648_v21 = vsel %vm69_vm5, %v1582_v6, %v647_v17  ;;  %v585_v22 = vpack.c.b16 %v584_v19, %v584_v19  ;;  %v713_v31 = vsel %vm69_vm5, %v712_v26, %v711_v25 }
  0x1a   :  { %1303 = vmatpush3.bf16.msra.mxu1 %v1413_v46  ;;  %v649_v23 = vpack.c.b16 %v648_v21, %v648_v21  ;;  %v778_v33 = vsel %vm69_vm5, %v777_v29, %v776_v28  ;;  %v714_v34 = vpack.c.b16 %v713_v31, %v713_v31  ;;  %v841_v37 = vrot.slane %v1595_v11, 4 }
  0x1b   :  { %1295 = vmatpush3.bf16.msra.mxu0 %v1412_v45  ;;  %1316 = vmatprep.subr.bf16.mxu1 %v1442_v0  ;;  %v779_v35 = vpack.c.b16 %v778_v33, %v778_v33  ;;  %v842_v38 = vrot.slane %v1582_v6, 3  ;;  %v906_v40 = vrot.slane %v1595_v11, 5  ;;  %v907_v41 = vrot.slane %v1582_v6, 4 }
  0x1c   :  { %1308 = vmatprep.subr.bf16.mxu0 %v1442_v0  ;;  %v1037_v53 = vrot.slane %v1582_v6, 6 }
  0x1d   :  { %1305 = vmatmul.mubr.msk.bf16.vlgmr.msra.gmra.mxu1 %vm84_vm6, %v259_v52  ;;  %v843_v43 = vsel %vm69_vm5, %v842_v38, %v841_v37  ;;  %v908_v45 = vsel %vm69_vm5, %v907_v41, %v906_v40  ;;  %v1036_v52 = vrot.slane %v1595_v11, 7 }
  0x1e   :  { %1297 = vmatmul.mubr.msk.bf16.vlgmr.msra.gmra.mxu0 %vm84_vm6, %v194_v50  ;;  %1317 = vmatpush3.bf16.msra.mxu1 %v1415_v51  ;;  %v844_v46 = vpack.c.b16 %v843_v43, %v843_v43  ;;  %v909_v47 = vpack.c.b16 %v908_v45, %v908_v45  ;;  %v972_v50 = vrot.slane %v1582_v6, 5  ;;  %v1435_v51 = vld [vmem:[%s1719_s2 + $0xf8] sm:$0xff]  }
  0x1f   :  { %1309 = vmatpush3.bf16.msra.mxu0 %v1414_v49  ;;  %1318 = vmatprep.subr.bf16.mxu1 %v1442_v0  ;;  %v971_v49 = vrot.slane %v1595_v11, 6 }
  0x20   :  { %1310 = vmatprep.subr.bf16.mxu0 %v1442_v0  ;;  %1312 = vmatprep.mubr.msk.bf16.mxu0 %vm1443_vm0, %v1442_v0 }
  0x21   :  { %1320 = vmatprep.mubr.msk.bf16.mxu1 %vm1443_vm0, %v1442_v0  ;;  %v973_v55 = vsel %vm69_vm5, %v972_v50, %v971_v49 }
  0x22   :  { %1319 = vmatpush3.bf16.msra.mxu1 %v1417_v59  ;;  %v974_v58 = vpack.c.b16 %v973_v55, %v973_v55 }
  0x23   :  { %1311 = vmatpush3.bf16.msra.mxu0 %v1416_v57  ;;  %1332 = vmatprep.subr.bf16.mxu1 %v1442_v0  ;;  %v1038_v57 = vsel %vm69_vm5, %v1037_v53, %v1036_v52 }
  0x24   :  { %1324 = vmatprep.subr.bf16.mxu0 %v1442_v0  ;;  %v1039_v59 = vpack.c.b16 %v1038_v57, %v1038_v57 }
  0x25   :  { %1321 = vmatmul.mubr.msk.bf16.vlgmr.msra.gmra.mxu1 %vm84_vm6, %v389_v62 }
  0x26   :  { %1313 = vmatmul.mubr.msk.bf16.vlgmr.msra.gmra.mxu0 %vm84_vm6, %v324_v61  ;;  %1333 = vmatpush3.bf16.msra.mxu1 %v1419_v3 }
  0x27   :  { %1325 = vmatpush3.bf16.msra.mxu0 %v1418_v63  ;;  %1334 = vmatprep.subr.bf16.mxu1 %v1442_v0 }
  0x28   :  { %1326 = vmatprep.subr.bf16.mxu0 %v1442_v0  ;;  %1328 = vmatprep.mubr.msk.bf16.mxu0 %vm1443_vm0, %v1442_v0 }
  0x29   :  { %1336 = vmatprep.mubr.msk.bf16.mxu1 %vm1443_vm0, %v1442_v0 }
  0x2a   :  { %1335 = vmatpush3.bf16.msra.mxu1 %v1421_v9 }
  0x2b   :  { %1327 = vmatpush3.bf16.msra.mxu0 %v1420_v7  ;;  %1348 = vmatprep.subr.bf16.mxu1 %v1442_v0 }
  0x2c   :  { %1340 = vmatprep.subr.bf16.mxu0 %v1442_v0 }
  0x2d   :  { %1337 = vmatmul.mubr.msk.bf16.vlgmr.msra.gmra.mxu1 %vm84_vm6, %v519_v13 }
  0x2e   :  { %1329 = vmatmul.mubr.msk.bf16.vlgmr.msra.gmra.mxu0 %vm84_vm6, %v454_v12  ;;  %1349 = vmatpush3.bf16.msra.mxu1 %v1423_v16 }
  0x2f   :  { %1341 = vmatpush3.bf16.msra.mxu0 %v1422_v14  ;;  %1350 = vmatprep.subr.bf16.mxu1 %v1442_v0 }
  0x30   :  { %1342 = vmatprep.subr.bf16.mxu0 %v1442_v0  ;;  %1344 = vmatprep.mubr.msk.bf16.mxu0 %vm1443_vm0, %v1442_v0 }
  0x31   :  { %1352 = vmatprep.mubr.msk.bf16.mxu1 %vm1443_vm0, %v1442_v0 }
  0x32   :  { %1351 = vmatpush3.bf16.msra.mxu1 %v1425_v20 }
  0x33   :  { %1343 = vmatpush3.bf16.msra.mxu0 %v1424_v18  ;;  %1364 = vmatprep.subr.bf16.mxu1 %v1442_v0 }
  0x34   :  { %1356 = vmatprep.subr.bf16.mxu0 %v1442_v0 }
  0x35   :  { %1353 = vmatmul.mubr.msk.bf16.vlgmr.msra.gmra.mxu1 %vm84_vm6, %v649_v23 }
  0x36   :  { %1345 = vmatmul.mubr.msk.bf16.vlgmr.msra.gmra.mxu0 %vm84_vm6, %v585_v22  ;;  %1365 = vmatpush3.bf16.msra.mxu1 %v1427_v27 }
  0x37   :  { %1357 = vmatpush3.bf16.msra.mxu0 %v1426_v24  ;;  %1366 = vmatprep.subr.bf16.mxu1 %v1442_v0 }
  0x38   :  { %1358 = vmatprep.subr.bf16.mxu0 %v1442_v0  ;;  %1360 = vmatprep.mubr.msk.bf16.mxu0 %vm1443_vm0, %v1442_v0 }
  0x39   :  { %1368 = vmatprep.mubr.msk.bf16.mxu1 %vm1443_vm0, %v1442_v0 }
  0x3a   :  { %1367 = vmatpush3.bf16.msra.mxu1 %v1429_v32 }
  0x3b   :  { %1359 = vmatpush3.bf16.msra.mxu0 %v1428_v30  ;;  %1380 = vmatprep.subr.bf16.mxu1 %v1442_v0 }
  0x3c   :  { %1372 = vmatprep.subr.bf16.mxu0 %v1442_v0 }
  0x3d   :  { %1369 = vmatmul.mubr.msk.bf16.vlgmr.msra.gmra.mxu1 %vm84_vm6, %v779_v35 }
  0x3e   :  { %1361 = vmatmul.mubr.msk.bf16.vlgmr.msra.gmra.mxu0 %vm84_vm6, %v714_v34  ;;  %1381 = vmatpush3.bf16.msra.mxu1 %v1431_v39 }
  0x3f   :  { %1373 = vmatpush3.bf16.msra.mxu0 %v1430_v36  ;;  %1382 = vmatprep.subr.bf16.mxu1 %v1442_v0 }
  0x40   :  { %1374 = vmatprep.subr.bf16.mxu0 %v1442_v0  ;;  %1376 = vmatprep.mubr.msk.bf16.mxu0 %vm1443_vm0, %v1442_v0 }
  0x41   :  { %1384 = vmatprep.mubr.msk.bf16.mxu1 %vm1443_vm0, %v1442_v0 }
  0x42   :  { %1383 = vmatpush3.bf16.msra.mxu1 %v1433_v44 }
  0x43   :  { %1375 = vmatpush3.bf16.msra.mxu0 %v1432_v42  ;;  %1396 = vmatprep.subr.bf16.mxu1 %v1442_v0 }
  0x44   :  { %1388 = vmatprep.subr.bf16.mxu0 %v1442_v0 }
  0x45   :  { %1385 = vmatmul.mubr.msk.bf16.vlgmr.msra.gmra.mxu1 %vm84_vm6, %v909_v47 }
  0x46   :  { %1377 = vmatmul.mubr.msk.bf16.vlgmr.msra.gmra.mxu0 %vm84_vm6, %v844_v46  ;;  %1397 = vmatpush3.bf16.msra.mxu1 %v1435_v51 }
  0x47   :  { %1389 = vmatpush3.bf16.msra.mxu0 %v1434_v48  ;;  %1398 = vmatprep.subr.bf16.mxu1 %v1442_v0 }
  0x48   :  { %1390 = vmatprep.subr.bf16.mxu0 %v1442_v0  ;;  %1392 = vmatprep.mubr.msk.bf16.mxu0 %vm1443_vm0, %v1442_v0 }
  0x49   :  { %1400 = vmatprep.mubr.msk.bf16.mxu1 %vm1443_vm0, %v1442_v0 }
  0x4a   :  { %1399 = vmatpush3.bf16.msra.mxu1 %v1437_v56 }
  0x4b   :  { %1391 = vmatpush3.bf16.msra.mxu0 %v1436_v54 }
  0x4d   :  { %1401 = vmatmul.mubr.msk.bf16.vlgmr.msra.gmra.mxu1 %vm84_vm6, %v1039_v59 }
  0x4e   :  { %1393 = vmatmul.mubr.msk.bf16.vlgmr.msra.gmra.mxu0 %vm84_vm6, %v974_v58 }
  0xd5   :  { %v180_v61 = vpop.f32.mrf.mxu1 }
  0xd6   :  { %v122_v60 = vpop.f32.mrf.mxu0 }
  0xd7   :  { %v1290_v63 = vpop.f32.mrf.mxu1  ;;  %v181_v15 = vadd.f32 %v180_v61, %v122_v60 }
  0xd8   :  { %v1282_v62 = vpop.f32.mrf.mxu0 }
  0xd9   :  { %v183_v2 = vpop.f32.mrf.mxu1 }
  0xda   :  { %v125_v1 = vpop.f32.mrf.mxu0 }
  0xdb   :  { %v1291_v4 = vpop.f32.mrf.mxu1 }
  0xdc   :  { %v1283_v3 = vpop.f32.mrf.mxu0 }
  0xdd   :  { %v309_v6 = vpop.f32.mrf.mxu1 }
  0xde   :  { %v244_v5 = vpop.f32.mrf.mxu0 }
  0xdf   :  { %v1306_v0 = vpop.f32.mrf.mxu1  ;;  %v250_v18 = vadd.f32 %v244_v5, %v181_v15 }
  0xe0   :  { %v1298_v7 = vpop.f32.mrf.mxu0 }
  0xe1   :  { %v312_v9 = vpop.f32.mrf.mxu1  ;;  %v315_v23 = vadd.f32 %v309_v6, %v250_v18 }
  0xe2   :  { %v247_v8 = vpop.f32.mrf.mxu0 }
  0xe3   :  { %v1307_v11 = vpop.f32.mrf.mxu1 }
  0xe4   :  { %v1299_v10 = vpop.f32.mrf.mxu0 }
  0xe5   :  { %v439_v13 = vpop.f32.mrf.mxu1 }
  0xe6   :  { %v374_v12 = vpop.f32.mrf.mxu0 }
  0xe7   :  { %v1322_v16 = vpop.f32.mrf.mxu1  ;;  %v380_v26 = vadd.f32 %v374_v12, %v315_v23 }
  0xe8   :  { %v1314_v14 = vpop.f32.mrf.mxu0 }
  0xe9   :  { %v442_v19 = vpop.f32.mrf.mxu1  ;;  %v445_v31 = vadd.f32 %v439_v13, %v380_v26 }
  0xea   :  { %v377_v17 = vpop.f32.mrf.mxu0 }
  0xeb   :  { %v1323_v21 = vpop.f32.mrf.mxu1 }
  0xec   :  { %v1315_v20 = vpop.f32.mrf.mxu0 }
  0xed   :  { %v569_v24 = vpop.f32.mrf.mxu1 }
  0xee   :  { %v504_v22 = vpop.f32.mrf.mxu0 }
  0xef   :  { %v1338_v27 = vpop.f32.mrf.mxu1  ;;  %v510_v34 = vadd.f32 %v504_v22, %v445_v31 }
  0xf0   :  { %v1330_v25 = vpop.f32.mrf.mxu0 }
  0xf1   :  { %v572_v29 = vpop.f32.mrf.mxu1  ;;  %v575_v39 = vadd.f32 %v569_v24, %v510_v34 }
  0xf2   :  { %v507_v28 = vpop.f32.mrf.mxu0 }
  0xf3   :  { %v1339_v32 = vpop.f32.mrf.mxu1 }
  0xf4   :  { %v1331_v30 = vpop.f32.mrf.mxu0 }
  0xf5   :  { %v699_v35 = vpop.f32.mrf.mxu1 }
  0xf6   :  { %v635_v33 = vpop.f32.mrf.mxu0 }
  0xf7   :  { %v1354_v37 = vpop.f32.mrf.mxu1  ;;  %v641_v42 = vadd.f32 %v635_v33, %v575_v39 }
  0xf8   :  { %v1346_v36 = vpop.f32.mrf.mxu0 }
  0xf9   :  { %v702_v40 = vpop.f32.mrf.mxu1  ;;  %v705_v47 = vadd.f32 %v699_v35, %v641_v42 }
  0xfa   :  { %v638_v38 = vpop.f32.mrf.mxu0 }
  0xfb   :  { %v1355_v43 = vpop.f32.mrf.mxu1 }
  0xfc   :  { %v1347_v41 = vpop.f32.mrf.mxu0 }
  0xfd   :  { %v829_v45 = vpop.f32.mrf.mxu1 }
  0xfe   :  { %v764_v44 = vpop.f32.mrf.mxu0 }
  0xff   :  { %v1370_v48 = vpop.f32.mrf.mxu1  ;;  %v770_v50 = vadd.f32 %v764_v44, %v705_v47 }
 0x100   :  { %v1362_v46 = vpop.f32.mrf.mxu0 }
 0x101   :  { %v832_v51 = vpop.f32.mrf.mxu1  ;;  %v835_v55 = vadd.f32 %v829_v45, %v770_v50 }
 0x102   :  { %v767_v49 = vpop.f32.mrf.mxu0 }
 0x103   :  { %v1371_v53 = vpop.f32.mrf.mxu1 }
 0x104   :  { %v1363_v52 = vpop.f32.mrf.mxu0 }
 0x105   :  { %v959_v56 = vpop.f32.mrf.mxu1 }
 0x106   :  { %v894_v54 = vpop.f32.mrf.mxu0 }
 0x107   :  { %v900_v58 = vadd.f32 %v894_v54, %v835_v55  ;;  %v1386_v59 = vpop.f32.mrf.mxu1 }
 0x108   :  { %v1378_v57 = vpop.f32.mrf.mxu0 }
 0x109   :  { %v962_v61 = vpop.f32.mrf.mxu1  ;;  %v965_v63 = vadd.f32 %v959_v56, %v900_v58 }
 0x10a   :  { %v897_v60 = vpop.f32.mrf.mxu0 }
 0x10b   :  { %v1387_v1 = vpop.f32.mrf.mxu1 }
 0x10c   :  { %v1379_v62 = vpop.f32.mrf.mxu0 }
 0x10d   :  { %v1089_v4 = vpop.f32.mrf.mxu1 }
 0x10e   :  { %v1024_v2 = vpop.f32.mrf.mxu0 }
 0x10f   :  { %v1030_v3 = vadd.f32 %v1024_v2, %v965_v63  ;;  %v1402_v7 = vpop.f32.mrf.mxu1 }
 0x110   :  { %v1394_v5 = vpop.f32.mrf.mxu0 }
 0x111   :  { %v1095_v6 = vadd.f32 %v1089_v4, %v1030_v3  ;;  %v1092_v9 = vpop.f32.mrf.mxu1 }
 0x112   :  { %v1027_v0 = vpop.f32.mrf.mxu0 }
 0x113   :  { %v1218_v8 = vmul.f32 -1.442695, %v1095_v6  ;;  %v1403_v11 = vpop.f32.mrf.mxu1 }
 0x114   :  { %v1395_v10 = vpop.f32.mrf.mxu0 }
 0x115   :  { %1438 = vpow2.f32 %v1218_v8 }
 0x122   :  { %v1439_v12 = vpop.eup %1438 }
 0x123   :  { %v1099_v13 = vadd.f32 1.0, %v1439_v12 }
 0x125   :  { %1440 = vrcp.f32 %v1099_v13 }
 0x132   :  { %v1441_v14 = vpop.eup %1440 }
 0x133   :  { %1103 = vst.msk [vmem:[%s1722_s3] sm:$0x3] %vm1102_vm7, %v1441_v14 }

</bundles_post_ra>
